<compile_context>
chip_gen: v7x
topology: tpu7x:2x2x1
jax: 0.10.0
libtpu: 0.0.40
codegen_flags: <defaults>
</compile_context>

<pallas_src>
import jax
import jax.numpy as jnp
from jax.experimental import pallas as pl
from jax.experimental.pallas import tpu as pltpu


def _make_resblock_kernel(Nb, Hp, Wp, C):
    """Kernel for a (Nb, Hp, Wp, C) zero-padded NHWC input block."""
    H, W = Hp - 2, Wp - 2
    M = Nb * H * W

    def kernel(xp_ref, w1_ref, b1_ref, w2_ref, b2_ref, o_ref, hp_ref):
        # xp_ref: (Nb, Hp, Wp, C) padded input     w*_ref: (9, C_in, C_out)
        # b*_ref: (1, C)                            o_ref: (Nb, H*W, C)
        # hp_ref: VMEM scratch (Nb, Hp, Wp, C) f32 for the padded intermediate.

        # ---- conv1: 9 shifted-tap matmuls, then bias + ReLU ----
        acc = jnp.zeros((M, C), jnp.float32)
        for ky in range(3):
            for kx in range(3):
                xs = xp_ref[:, ky:ky + H, kx:kx + W, :].astype(jnp.float32)
                xs = xs.reshape(M, C)                      # lane dim (C) unchanged
                acc = acc + jnp.dot(xs, w1_ref[3 * ky + kx],
                                    preferred_element_type=jnp.float32)
        h = jnp.maximum(acc + b1_ref[...], 0.0)            # (M, C)

        # ---- zero-padded intermediate kept resident in VMEM ----
        hp_ref[...] = jnp.zeros_like(hp_ref)
        hp_ref[:, 1:1 + H, 1:1 + W, :] = h.reshape(Nb, H, W, C)

        # ---- conv2: 9 shifted-tap matmuls on the padded intermediate ----
        acc2 = jnp.zeros((M, C), jnp.float32)
        for ky in range(3):
            for kx in range(3):
                hs = hp_ref[:, ky:ky + H, kx:kx + W, :].reshape(M, C)
                acc2 = acc2 + jnp.dot(hs, w2_ref[3 * ky + kx],
                                      preferred_element_type=jnp.float32)
        y = acc2 + b2_ref[...]

        # ---- residual add with the un-padded interior of the input block ----
        x_in = xp_ref[:, 1:1 + H, 1:1 + W, :].astype(jnp.float32).reshape(M, C)
        o_ref[...] = (x_in + y).reshape(Nb, H * W, C).astype(o_ref.dtype)

    return kernel


def _choose_block_batch(N, per_elem_block_bytes):
    """Largest divisor of N that (a) leaves >=2 grid steps when N>=2 (v7x: both
    TensorCores get work) and (b) keeps the x block under ~8 MiB (v7x VMEM)."""
    vmem_cap = 8 * 1024 * 1024
    nb_cap = max(1, vmem_cap // max(per_elem_block_bytes, 1))
    target = max(1, N // 2) if N >= 2 else 1
    target = min(target, nb_cap)
    nb = 1
    for d in range(1, N + 1):
        if N % d == 0 and d <= target:
            nb = d
    return nb


def residual_block_forward(x, w1, b1, w2, b2):
    """x: (N, C, H, W) f32.  w1, w2: (C, C, 3, 3) (PyTorch OIHW).  b1, b2: (C,)."""
    N, C, H, W = x.shape
    Hp, Wp = H + 2, W + 2
    itemsize = jnp.dtype(x.dtype).itemsize

    # NCHW -> NHWC, pre-pad the spatial dims once (single HBM read of x).
    x_nhwc = jnp.transpose(x, (0, 2, 3, 1))
    xp = jnp.pad(x_nhwc, ((0, 0), (1, 1), (1, 1), (0, 0)))

    # (C_out, C_in, 3, 3) -> tap-major (9, C_in, C_out) matmul matrices.
    w1_t = jnp.transpose(w1, (2, 3, 1, 0)).reshape(9, C, C)
    w2_t = jnp.transpose(w2, (2, 3, 1, 0)).reshape(9, C, C)
    b1_r = b1.reshape(1, C)
    b2_r = b2.reshape(1, C)

    nb = _choose_block_batch(N, Hp * Wp * C * itemsize)
    grid = (N // nb,)
    kernel = _make_resblock_kernel(nb, Hp, Wp, C)

    # VMEM budget: double-buffered in/out blocks + f32 scratch + params.
    per_step = ((2 * nb * Hp * Wp * C + 2 * nb * H * W * C) * itemsize
                + nb * Hp * Wp * C * 4
                + (2 * 9 * C * C + 2 * C) * 4 * 2)
    vmem_limit = int(min(100 * 2 ** 20, max(32 * 2 ** 20, 2 * per_step)))

    flops = 2 * (2 * N * H * W * C * C * 9)            # two 3x3 convs (MACs*2)
    bytes_accessed = (N * Hp * Wp * C + N * H * W * C) * itemsize \
                     + (2 * 9 * C * C + 2 * C) * itemsize

    out_flat = pl.pallas_call(
        kernel,
        out_shape=jax.ShapeDtypeStruct((N, H * W, C), x.dtype),
        grid_spec=pltpu.PrefetchScalarGridSpec(
            num_scalar_prefetch=0,
            grid=grid,
            in_specs=[
                pl.BlockSpec((nb, Hp, Wp, C), lambda n: (n, 0, 0, 0)),
                pl.BlockSpec((9, C, C), lambda n: (0, 0, 0)),
                pl.BlockSpec((1, C), lambda n: (0, 0)),
                pl.BlockSpec((9, C, C), lambda n: (0, 0, 0)),
                pl.BlockSpec((1, C), lambda n: (0, 0)),
            ],
            out_specs=pl.BlockSpec((nb, H * W, C), lambda n: (n, 0, 0)),
            scratch_shapes=[pltpu.VMEM((nb, Hp, Wp, C), jnp.float32)],
        ),
        compiler_params=pltpu.CompilerParams(
            dimension_semantics=("parallel",),
            vmem_limit_bytes=vmem_limit,
        ),
        cost_estimate=pl.CostEstimate(flops=flops, transcendentals=0,
                                      bytes_accessed=bytes_accessed),
    )(xp, w1_t, b1_r, w2_t, b2_r)

    out_nhwc = out_flat.reshape(N, H, W, C)
    return jnp.transpose(out_nhwc, (0, 3, 1, 2))


def _reference(x, w1, b1, w2, b2):
    dn = jax.lax.conv_dimension_numbers(x.shape, w1.shape, ("NCHW", "OIHW", "NCHW"))
    h = jax.lax.conv_general_dilated(x, w1, (1, 1), "SAME", dimension_numbers=dn)
    h = jnp.maximum(h + b1[None, :, None, None], 0.0)
    y = jax.lax.conv_general_dilated(h, w2, (1, 1), "SAME", dimension_numbers=dn)
    y = y + b2[None, :, None, None]
    return x + y


if __name__ == "__main__":
    # Small shapes consistent with ResidualBlock(in_features=4).
    N, C, H, W = 2, 4, 16, 16

    key = jax.random.PRNGKey(0)
    kx, k1, kb1, k2, kb2 = jax.random.split(key, 5)

    x = jax.random.normal(kx, (N, C, H, W), dtype=jnp.float32)
    w1 = jax.random.normal(k1, (C, C, 3, 3), dtype=jnp.float32) * 0.1
    b1 = jax.random.normal(kb1, (C,), dtype=jnp.float32) * 0.1
    w2 = jax.random.normal(k2, (C, C, 3, 3), dtype=jnp.float32) * 0.1
    b2 = jax.random.normal(kb2, (C,), dtype=jnp.float32) * 0.1

    out = residual_block_forward(x, w1, b1, w2, b2)
    jax.block_until_ready(out)

    ref = _reference(x, w1, b1, w2, b2)
    assert out.shape == ref.shape, "shape mismatch vs reference"
    assert jnp.allclose(out, ref, atol=1e-4, rtol=1e-4), "mismatch vs reference"

    print("KERNEL_OK")
</pallas_src>

<mosaic_0001>
module attributes {stable_mosaic.version = 11 : i64} {
  func.func @kernel(%arg0: i32, %arg1: memref<1x18x18x4xf32, #tpu.memory_space<vmem>>, %arg2: memref<9x4x4xf32, #tpu.memory_space<vmem>>, %arg3: memref<1x4xf32, #tpu.memory_space<vmem>>, %arg4: memref<9x4x4xf32, #tpu.memory_space<vmem>>, %arg5: memref<1x4xf32, #tpu.memory_space<vmem>>, %arg6: memref<1x256x4xf32, #tpu.memory_space<vmem>>, %arg7: memref<1x18x18x4xf32, #tpu.memory_space<vmem>>) attributes {dimension_semantics = [#tpu.dimension_semantics<parallel>], iteration_bounds = array<i64: 2>, scalar_prefetch = 0 : i64, scratch_operands = 1 : i64, tpu.core_type = #tpu.core_type<tc>, window_params = [{transform_indices = @transform_0, window_bounds = array<i64: 1, 18, 18, 4>}, {pipeline_mode = #tpu.pipeline_mode<synchronous>, transform_indices = @transform_1, window_bounds = array<i64: 9, 4, 4>}, {pipeline_mode = #tpu.pipeline_mode<synchronous>, transform_indices = @transform_2, window_bounds = array<i64: 1, 4>}, {pipeline_mode = #tpu.pipeline_mode<synchronous>, transform_indices = @transform_3, window_bounds = array<i64: 9, 4, 4>}, {pipeline_mode = #tpu.pipeline_mode<synchronous>, transform_indices = @transform_4, window_bounds = array<i64: 1, 4>}, {transform_indices = @transform_5, window_bounds = array<i64: 1, 256, 4>}]} {
    %cst = arith.constant 0.000000e+00 : f32
    %0 = vector.broadcast %cst : f32 to vector<256x4xf32>
    %c0 = arith.constant 0 : index
    %c0_0 = arith.constant 0 : index
    %c0_1 = arith.constant 0 : index
    %c0_2 = arith.constant 0 : index
    %1 = vector.load %arg1[%c0, %c0_0, %c0_1, %c0_2] : memref<1x18x18x4xf32, #tpu.memory_space<vmem>>, vector<1x16x16x4xf32>
    %2 = vector.shape_cast %1 : vector<1x16x16x4xf32> to vector<256x4xf32>
    %c0_3 = arith.constant 0 : index
    %c0_4 = arith.constant 0 : index
    %c0_5 = arith.constant 0 : index
    %3 = vector.load %arg2[%c0_3, %c0_4, %c0_5] : memref<9x4x4xf32, #tpu.memory_space<vmem>>, vector<1x4x4xf32>
    %4 = vector.shape_cast %3 : vector<1x4x4xf32> to vector<4x4xf32>
    %cst_6 = arith.constant dense<0.000000e+00> : vector<256x4xf32>
    %5 = tpu.matmul %2, %4, %cst_6 {dimension_numbers = #tpu.dot_dimension_numbers<[1], [0], [0], [1], [0, 0, 1, 1], [], []>} : vector<256x4xf32>, vector<4x4xf32>, vector<256x4xf32> -> vector<256x4xf32>
    %6 = arith.addf %0, %5 : vector<256x4xf32>
    %c0_7 = arith.constant 0 : index
    %c0_8 = arith.constant 0 : index
    %c1 = arith.constant 1 : index
    %c0_9 = arith.constant 0 : index
    %7 = vector.load %arg1[%c0_7, %c0_8, %c1, %c0_9] : memref<1x18x18x4xf32, #tpu.memory_space<vmem>>, vector<1x16x16x4xf32>
    %8 = vector.shape_cast %7 : vector<1x16x16x4xf32> to vector<256x4xf32>
    %c1_10 = arith.constant 1 : index
    %c0_11 = arith.constant 0 : index
    %c0_12 = arith.constant 0 : index
    %9 = vector.load %arg2[%c1_10, %c0_11, %c0_12] : memref<9x4x4xf32, #tpu.memory_space<vmem>>, vector<1x4x4xf32>
    %10 = vector.shape_cast %9 : vector<1x4x4xf32> to vector<4x4xf32>
    %cst_13 = arith.constant dense<0.000000e+00> : vector<256x4xf32>
    %11 = tpu.matmul %8, %10, %cst_13 {dimension_numbers = #tpu.dot_dimension_numbers<[1], [0], [0], [1], [0, 0, 1, 1], [], []>} : vector<256x4xf32>, vector<4x4xf32>, vector<256x4xf32> -> vector<256x4xf32>
    %12 = arith.addf %6, %11 : vector<256x4xf32>
    %c0_14 = arith.constant 0 : index
    %c0_15 = arith.constant 0 : index
    %c2 = arith.constant 2 : index
    %c0_16 = arith.constant 0 : index
    %13 = vector.load %arg1[%c0_14, %c0_15, %c2, %c0_16] : memref<1x18x18x4xf32, #tpu.memory_space<vmem>>, vector<1x16x16x4xf32>
    %14 = vector.shape_cast %13 : vector<1x16x16x4xf32> to vector<256x4xf32>
    %c2_17 = arith.constant 2 : index
    %c0_18 = arith.constant 0 : index
    %c0_19 = arith.constant 0 : index
    %15 = vector.load %arg2[%c2_17, %c0_18, %c0_19] : memref<9x4x4xf32, #tpu.memory_space<vmem>>, vector<1x4x4xf32>
    %16 = vector.shape_cast %15 : vector<1x4x4xf32> to vector<4x4xf32>
    %cst_20 = arith.constant dense<0.000000e+00> : vector<256x4xf32>
    %17 = tpu.matmul %14, %16, %cst_20 {dimension_numbers = #tpu.dot_dimension_numbers<[1], [0], [0], [1], [0, 0, 1, 1], [], []>} : vector<256x4xf32>, vector<4x4xf32>, vector<256x4xf32> -> vector<256x4xf32>
    %18 = arith.addf %12, %17 : vector<256x4xf32>
    %c0_21 = arith.constant 0 : index
    %c1_22 = arith.constant 1 : index
    %c0_23 = arith.constant 0 : index
    %c0_24 = arith.constant 0 : index
    %19 = vector.load %arg1[%c0_21, %c1_22, %c0_23, %c0_24] : memref<1x18x18x4xf32, #tpu.memory_space<vmem>>, vector<1x16x16x4xf32>
    %20 = vector.shape_cast %19 : vector<1x16x16x4xf32> to vector<256x4xf32>
    %c3 = arith.constant 3 : index
    %c0_25 = arith.constant 0 : index
    %c0_26 = arith.constant 0 : index
    %21 = vector.load %arg2[%c3, %c0_25, %c0_26] : memref<9x4x4xf32, #tpu.memory_space<vmem>>, vector<1x4x4xf32>
    %22 = vector.shape_cast %21 : vector<1x4x4xf32> to vector<4x4xf32>
    %cst_27 = arith.constant dense<0.000000e+00> : vector<256x4xf32>
    %23 = tpu.matmul %20, %22, %cst_27 {dimension_numbers = #tpu.dot_dimension_numbers<[1], [0], [0], [1], [0, 0, 1, 1], [], []>} : vector<256x4xf32>, vector<4x4xf32>, vector<256x4xf32> -> vector<256x4xf32>
    %24 = arith.addf %18, %23 : vector<256x4xf32>
    %c0_28 = arith.constant 0 : index
    %c1_29 = arith.constant 1 : index
    %c1_30 = arith.constant 1 : index
    %c0_31 = arith.constant 0 : index
    %25 = vector.load %arg1[%c0_28, %c1_29, %c1_30, %c0_31] : memref<1x18x18x4xf32, #tpu.memory_space<vmem>>, vector<1x16x16x4xf32>
    %26 = vector.shape_cast %25 : vector<1x16x16x4xf32> to vector<256x4xf32>
    %c4 = arith.constant 4 : index
    %c0_32 = arith.constant 0 : index
    %c0_33 = arith.constant 0 : index
    %27 = vector.load %arg2[%c4, %c0_32, %c0_33] : memref<9x4x4xf32, #tpu.memory_space<vmem>>, vector<1x4x4xf32>
    %28 = vector.shape_cast %27 : vector<1x4x4xf32> to vector<4x4xf32>
    %cst_34 = arith.constant dense<0.000000e+00> : vector<256x4xf32>
    %29 = tpu.matmul %26, %28, %cst_34 {dimension_numbers = #tpu.dot_dimension_numbers<[1], [0], [0], [1], [0, 0, 1, 1], [], []>} : vector<256x4xf32>, vector<4x4xf32>, vector<256x4xf32> -> vector<256x4xf32>
    %30 = arith.addf %24, %29 : vector<256x4xf32>
    %c0_35 = arith.constant 0 : index
    %c1_36 = arith.constant 1 : index
    %c2_37 = arith.constant 2 : index
    %c0_38 = arith.constant 0 : index
    %31 = vector.load %arg1[%c0_35, %c1_36, %c2_37, %c0_38] : memref<1x18x18x4xf32, #tpu.memory_space<vmem>>, vector<1x16x16x4xf32>
    %32 = vector.shape_cast %31 : vector<1x16x16x4xf32> to vector<256x4xf32>
    %c5 = arith.constant 5 : index
    %c0_39 = arith.constant 0 : index
    %c0_40 = arith.constant 0 : index
    %33 = vector.load %arg2[%c5, %c0_39, %c0_40] : memref<9x4x4xf32, #tpu.memory_space<vmem>>, vector<1x4x4xf32>
    %34 = vector.shape_cast %33 : vector<1x4x4xf32> to vector<4x4xf32>
    %cst_41 = arith.constant dense<0.000000e+00> : vector<256x4xf32>
    %35 = tpu.matmul %32, %34, %cst_41 {dimension_numbers = #tpu.dot_dimension_numbers<[1], [0], [0], [1], [0, 0, 1, 1], [], []>} : vector<256x4xf32>, vector<4x4xf32>, vector<256x4xf32> -> vector<256x4xf32>
    %36 = arith.addf %30, %35 : vector<256x4xf32>
    %c0_42 = arith.constant 0 : index
    %c2_43 = arith.constant 2 : index
    %c0_44 = arith.constant 0 : index
    %c0_45 = arith.constant 0 : index
    %37 = vector.load %arg1[%c0_42, %c2_43, %c0_44, %c0_45] : memref<1x18x18x4xf32, #tpu.memory_space<vmem>>, vector<1x16x16x4xf32>
    %38 = vector.shape_cast %37 : vector<1x16x16x4xf32> to vector<256x4xf32>
    %c6 = arith.constant 6 : index
    %c0_46 = arith.constant 0 : index
    %c0_47 = arith.constant 0 : index
    %39 = vector.load %arg2[%c6, %c0_46, %c0_47] : memref<9x4x4xf32, #tpu.memory_space<vmem>>, vector<1x4x4xf32>
    %40 = vector.shape_cast %39 : vector<1x4x4xf32> to vector<4x4xf32>
    %cst_48 = arith.constant dense<0.000000e+00> : vector<256x4xf32>
    %41 = tpu.matmul %38, %40, %cst_48 {dimension_numbers = #tpu.dot_dimension_numbers<[1], [0], [0], [1], [0, 0, 1, 1], [], []>} : vector<256x4xf32>, vector<4x4xf32>, vector<256x4xf32> -> vector<256x4xf32>
    %42 = arith.addf %36, %41 : vector<256x4xf32>
    %c0_49 = arith.constant 0 : index
    %c2_50 = arith.constant 2 : index
    %c1_51 = arith.constant 1 : index
    %c0_52 = arith.constant 0 : index
    %43 = vector.load %arg1[%c0_49, %c2_50, %c1_51, %c0_52] : memref<1x18x18x4xf32, #tpu.memory_space<vmem>>, vector<1x16x16x4xf32>
    %44 = vector.shape_cast %43 : vector<1x16x16x4xf32> to vector<256x4xf32>
    %c7 = arith.constant 7 : index
    %c0_53 = arith.constant 0 : index
    %c0_54 = arith.constant 0 : index
    %45 = vector.load %arg2[%c7, %c0_53, %c0_54] : memref<9x4x4xf32, #tpu.memory_space<vmem>>, vector<1x4x4xf32>
    %46 = vector.shape_cast %45 : vector<1x4x4xf32> to vector<4x4xf32>
    %cst_55 = arith.constant dense<0.000000e+00> : vector<256x4xf32>
    %47 = tpu.matmul %44, %46, %cst_55 {dimension_numbers = #tpu.dot_dimension_numbers<[1], [0], [0], [1], [0, 0, 1, 1], [], []>} : vector<256x4xf32>, vector<4x4xf32>, vector<256x4xf32> -> vector<256x4xf32>
    %48 = arith.addf %42, %47 : vector<256x4xf32>
    %c0_56 = arith.constant 0 : index
    %c2_57 = arith.constant 2 : index
    %c2_58 = arith.constant 2 : index
    %c0_59 = arith.constant 0 : index
    %49 = vector.load %arg1[%c0_56, %c2_57, %c2_58, %c0_59] : memref<1x18x18x4xf32, #tpu.memory_space<vmem>>, vector<1x16x16x4xf32>
    %50 = vector.shape_cast %49 : vector<1x16x16x4xf32> to vector<256x4xf32>
    %c8 = arith.constant 8 : index
    %c0_60 = arith.constant 0 : index
    %c0_61 = arith.constant 0 : index
    %51 = vector.load %arg2[%c8, %c0_60, %c0_61] : memref<9x4x4xf32, #tpu.memory_space<vmem>>, vector<1x4x4xf32>
    %52 = vector.shape_cast %51 : vector<1x4x4xf32> to vector<4x4xf32>
    %cst_62 = arith.constant dense<0.000000e+00> : vector<256x4xf32>
    %53 = tpu.matmul %50, %52, %cst_62 {dimension_numbers = #tpu.dot_dimension_numbers<[1], [0], [0], [1], [0, 0, 1, 1], [], []>} : vector<256x4xf32>, vector<4x4xf32>, vector<256x4xf32> -> vector<256x4xf32>
    %54 = arith.addf %48, %53 : vector<256x4xf32>
    %c0_63 = arith.constant 0 : index
    %c0_64 = arith.constant 0 : index
    %55 = vector.load %arg3[%c0_63, %c0_64] : memref<1x4xf32, #tpu.memory_space<vmem>>, vector<1x4xf32>
    %56 = vector.broadcast %55 : vector<1x4xf32> to vector<256x4xf32>
    %57 = arith.addf %54, %56 : vector<256x4xf32>
    %cst_65 = arith.constant 0.000000e+00 : f32
    %58 = vector.broadcast %cst_65 : f32 to vector<256x4xf32>
    %59 = arith.maximumf %57, %58 : vector<256x4xf32>
    %cst_66 = arith.constant 0.000000e+00 : f32
    %60 = vector.broadcast %cst_66 : f32 to vector<1x18x18x4xf32>
    %c0_67 = arith.constant 0 : index
    %c0_68 = arith.constant 0 : index
    %c0_69 = arith.constant 0 : index
    %c0_70 = arith.constant 0 : index
    %61 = vector.load %arg7[%c0_67, %c0_68, %c0_69, %c0_70] : memref<1x18x18x4xf32, #tpu.memory_space<vmem>>, vector<1x18x18x4xf32>
    tpu.vector_store %arg7[%c0_67, %c0_68, %c0_69, %c0_70], %60 {strides = array<i32>} : memref<1x18x18x4xf32, #tpu.memory_space<vmem>>, vector<1x18x18x4xf32>,
    %62 = vector.shape_cast %59 : vector<256x4xf32> to vector<1x16x16x4xf32>
    %c0_71 = arith.constant 0 : index
    %c1_72 = arith.constant 1 : index
    %c1_73 = arith.constant 1 : index
    %c0_74 = arith.constant 0 : index
    %63 = vector.load %arg7[%c0_71, %c1_72, %c1_73, %c0_74] : memref<1x18x18x4xf32, #tpu.memory_space<vmem>>, vector<1x16x16x4xf32>
    tpu.vector_store %arg7[%c0_71, %c1_72, %c1_73, %c0_74], %62 {strides = array<i32>} : memref<1x18x18x4xf32, #tpu.memory_space<vmem>>, vector<1x16x16x4xf32>,
    %cst_75 = arith.constant 0.000000e+00 : f32
    %64 = vector.broadcast %cst_75 : f32 to vector<256x4xf32>
    %c0_76 = arith.constant 0 : index
    %c0_77 = arith.constant 0 : index
    %c0_78 = arith.constant 0 : index
    %c0_79 = arith.constant 0 : index
    %65 = vector.load %arg7[%c0_76, %c0_77, %c0_78, %c0_79] : memref<1x18x18x4xf32, #tpu.memory_space<vmem>>, vector<1x16x16x4xf32>
    %66 = vector.shape_cast %65 : vector<1x16x16x4xf32> to vector<256x4xf32>
    %c0_80 = arith.constant 0 : index
    %c0_81 = arith.constant 0 : index
    %c0_82 = arith.constant 0 : index
    %67 = vector.load %arg4[%c0_80, %c0_81, %c0_82] : memref<9x4x4xf32, #tpu.memory_space<vmem>>, vector<1x4x4xf32>
    %68 = vector.shape_cast %67 : vector<1x4x4xf32> to vector<4x4xf32>
    %cst_83 = arith.constant dense<0.000000e+00> : vector<256x4xf32>
    %69 = tpu.matmul %66, %68, %cst_83 {dimension_numbers = #tpu.dot_dimension_numbers<[1], [0], [0], [1], [0, 0, 1, 1], [], []>} : vector<256x4xf32>, vector<4x4xf32>, vector<256x4xf32> -> vector<256x4xf32>
    %70 = arith.addf %64, %69 : vector<256x4xf32>
    %c0_84 = arith.constant 0 : index
    %c0_85 = arith.constant 0 : index
    %c1_86 = arith.constant 1 : index
    %c0_87 = arith.constant 0 : index
    %71 = vector.load %arg7[%c0_84, %c0_85, %c1_86, %c0_87] : memref<1x18x18x4xf32, #tpu.memory_space<vmem>>, vector<1x16x16x4xf32>
    %72 = vector.shape_cast %71 : vector<1x16x16x4xf32> to vector<256x4xf32>
    %c1_88 = arith.constant 1 : index
    %c0_89 = arith.constant 0 : index
    %c0_90 = arith.constant 0 : index
    %73 = vector.load %arg4[%c1_88, %c0_89, %c0_90] : memref<9x4x4xf32, #tpu.memory_space<vmem>>, vector<1x4x4xf32>
    %74 = vector.shape_cast %73 : vector<1x4x4xf32> to vector<4x4xf32>
    %cst_91 = arith.constant dense<0.000000e+00> : vector<256x4xf32>
    %75 = tpu.matmul %72, %74, %cst_91 {dimension_numbers = #tpu.dot_dimension_numbers<[1], [0], [0], [1], [0, 0, 1, 1], [], []>} : vector<256x4xf32>, vector<4x4xf32>, vector<256x4xf32> -> vector<256x4xf32>
    %76 = arith.addf %70, %75 : vector<256x4xf32>
    %c0_92 = arith.constant 0 : index
    %c0_93 = arith.constant 0 : index
    %c2_94 = arith.constant 2 : index
    %c0_95 = arith.constant 0 : index
    %77 = vector.load %arg7[%c0_92, %c0_93, %c2_94, %c0_95] : memref<1x18x18x4xf32, #tpu.memory_space<vmem>>, vector<1x16x16x4xf32>
    %78 = vector.shape_cast %77 : vector<1x16x16x4xf32> to vector<256x4xf32>
    %c2_96 = arith.constant 2 : index
    %c0_97 = arith.constant 0 : index
    %c0_98 = arith.constant 0 : index
    %79 = vector.load %arg4[%c2_96, %c0_97, %c0_98] : memref<9x4x4xf32, #tpu.memory_space<vmem>>, vector<1x4x4xf32>
    %80 = vector.shape_cast %79 : vector<1x4x4xf32> to vector<4x4xf32>
    %cst_99 = arith.constant dense<0.000000e+00> : vector<256x4xf32>
    %81 = tpu.matmul %78, %80, %cst_99 {dimension_numbers = #tpu.dot_dimension_numbers<[1], [0], [0], [1], [0, 0, 1, 1], [], []>} : vector<256x4xf32>, vector<4x4xf32>, vector<256x4xf32> -> vector<256x4xf32>
    %82 = arith.addf %76, %81 : vector<256x4xf32>
    %c0_100 = arith.constant 0 : index
    %c1_101 = arith.constant 1 : index
    %c0_102 = arith.constant 0 : index
    %c0_103 = arith.constant 0 : index
    %83 = vector.load %arg7[%c0_100, %c1_101, %c0_102, %c0_103] : memref<1x18x18x4xf32, #tpu.memory_space<vmem>>, vector<1x16x16x4xf32>
    %84 = vector.shape_cast %83 : vector<1x16x16x4xf32> to vector<256x4xf32>
    %c3_104 = arith.constant 3 : index
    %c0_105 = arith.constant 0 : index
    %c0_106 = arith.constant 0 : index
    %85 = vector.load %arg4[%c3_104, %c0_105, %c0_106] : memref<9x4x4xf32, #tpu.memory_space<vmem>>, vector<1x4x4xf32>
    %86 = vector.shape_cast %85 : vector<1x4x4xf32> to vector<4x4xf32>
    %cst_107 = arith.constant dense<0.000000e+00> : vector<256x4xf32>
    %87 = tpu.matmul %84, %86, %cst_107 {dimension_numbers = #tpu.dot_dimension_numbers<[1], [0], [0], [1], [0, 0, 1, 1], [], []>} : vector<256x4xf32>, vector<4x4xf32>, vector<256x4xf32> -> vector<256x4xf32>
    %88 = arith.addf %82, %87 : vector<256x4xf32>
    %c0_108 = arith.constant 0 : index
    %c1_109 = arith.constant 1 : index
    %c1_110 = arith.constant 1 : index
    %c0_111 = arith.constant 0 : index
    %89 = vector.load %arg7[%c0_108, %c1_109, %c1_110, %c0_111] : memref<1x18x18x4xf32, #tpu.memory_space<vmem>>, vector<1x16x16x4xf32>
    %90 = vector.shape_cast %89 : vector<1x16x16x4xf32> to vector<256x4xf32>
    %c4_112 = arith.constant 4 : index
    %c0_113 = arith.constant 0 : index
    %c0_114 = arith.constant 0 : index
    %91 = vector.load %arg4[%c4_112, %c0_113, %c0_114] : memref<9x4x4xf32, #tpu.memory_space<vmem>>, vector<1x4x4xf32>
    %92 = vector.shape_cast %91 : vector<1x4x4xf32> to vector<4x4xf32>
    %cst_115 = arith.constant dense<0.000000e+00> : vector<256x4xf32>
    %93 = tpu.matmul %90, %92, %cst_115 {dimension_numbers = #tpu.dot_dimension_numbers<[1], [0], [0], [1], [0, 0, 1, 1], [], []>} : vector<256x4xf32>, vector<4x4xf32>, vector<256x4xf32> -> vector<256x4xf32>
    %94 = arith.addf %88, %93 : vector<256x4xf32>
    %c0_116 = arith.constant 0 : index
    %c1_117 = arith.constant 1 : index
    %c2_118 = arith.constant 2 : index
    %c0_119 = arith.constant 0 : index
    %95 = vector.load %arg7[%c0_116, %c1_117, %c2_118, %c0_119] : memref<1x18x18x4xf32, #tpu.memory_space<vmem>>, vector<1x16x16x4xf32>
    %96 = vector.shape_cast %95 : vector<1x16x16x4xf32> to vector<256x4xf32>
    %c5_120 = arith.constant 5 : index
    %c0_121 = arith.constant 0 : index
    %c0_122 = arith.constant 0 : index
    %97 = vector.load %arg4[%c5_120, %c0_121, %c0_122] : memref<9x4x4xf32, #tpu.memory_space<vmem>>, vector<1x4x4xf32>
    %98 = vector.shape_cast %97 : vector<1x4x4xf32> to vector<4x4xf32>
    %cst_123 = arith.constant dense<0.000000e+00> : vector<256x4xf32>
    %99 = tpu.matmul %96, %98, %cst_123 {dimension_numbers = #tpu.dot_dimension_numbers<[1], [0], [0], [1], [0, 0, 1, 1], [], []>} : vector<256x4xf32>, vector<4x4xf32>, vector<256x4xf32> -> vector<256x4xf32>
    %100 = arith.addf %94, %99 : vector<256x4xf32>
    %c0_124 = arith.constant 0 : index
    %c2_125 = arith.constant 2 : index
    %c0_126 = arith.constant 0 : index
    %c0_127 = arith.constant 0 : index
    %101 = vector.load %arg7[%c0_124, %c2_125, %c0_126, %c0_127] : memref<1x18x18x4xf32, #tpu.memory_space<vmem>>, vector<1x16x16x4xf32>
    %102 = vector.shape_cast %101 : vector<1x16x16x4xf32> to vector<256x4xf32>
    %c6_128 = arith.constant 6 : index
    %c0_129 = arith.constant 0 : index
    %c0_130 = arith.constant 0 : index
    %103 = vector.load %arg4[%c6_128, %c0_129, %c0_130] : memref<9x4x4xf32, #tpu.memory_space<vmem>>, vector<1x4x4xf32>
    %104 = vector.shape_cast %103 : vector<1x4x4xf32> to vector<4x4xf32>
    %cst_131 = arith.constant dense<0.000000e+00> : vector<256x4xf32>
    %105 = tpu.matmul %102, %104, %cst_131 {dimension_numbers = #tpu.dot_dimension_numbers<[1], [0], [0], [1], [0, 0, 1, 1], [], []>} : vector<256x4xf32>, vector<4x4xf32>, vector<256x4xf32> -> vector<256x4xf32>
    %106 = arith.addf %100, %105 : vector<256x4xf32>
    %c0_132 = arith.constant 0 : index
    %c2_133 = arith.constant 2 : index
    %c1_134 = arith.constant 1 : index
    %c0_135 = arith.constant 0 : index
    %107 = vector.load %arg7[%c0_132, %c2_133, %c1_134, %c0_135] : memref<1x18x18x4xf32, #tpu.memory_space<vmem>>, vector<1x16x16x4xf32>
    %108 = vector.shape_cast %107 : vector<1x16x16x4xf32> to vector<256x4xf32>
    %c7_136 = arith.constant 7 : index
    %c0_137 = arith.constant 0 : index
    %c0_138 = arith.constant 0 : index
    %109 = vector.load %arg4[%c7_136, %c0_137, %c0_138] : memref<9x4x4xf32, #tpu.memory_space<vmem>>, vector<1x4x4xf32>
    %110 = vector.shape_cast %109 : vector<1x4x4xf32> to vector<4x4xf32>
    %cst_139 = arith.constant dense<0.000000e+00> : vector<256x4xf32>
    %111 = tpu.matmul %108, %110, %cst_139 {dimension_numbers = #tpu.dot_dimension_numbers<[1], [0], [0], [1], [0, 0, 1, 1], [], []>} : vector<256x4xf32>, vector<4x4xf32>, vector<256x4xf32> -> vector<256x4xf32>
    %112 = arith.addf %106, %111 : vector<256x4xf32>
    %c0_140 = arith.constant 0 : index
    %c2_141 = arith.constant 2 : index
    %c2_142 = arith.constant 2 : index
    %c0_143 = arith.constant 0 : index
    %113 = vector.load %arg7[%c0_140, %c2_141, %c2_142, %c0_143] : memref<1x18x18x4xf32, #tpu.memory_space<vmem>>, vector<1x16x16x4xf32>
    %114 = vector.shape_cast %113 : vector<1x16x16x4xf32> to vector<256x4xf32>
    %c8_144 = arith.constant 8 : index
    %c0_145 = arith.constant 0 : index
    %c0_146 = arith.constant 0 : index
    %115 = vector.load %arg4[%c8_144, %c0_145, %c0_146] : memref<9x4x4xf32, #tpu.memory_space<vmem>>, vector<1x4x4xf32>
    %116 = vector.shape_cast %115 : vector<1x4x4xf32> to vector<4x4xf32>
    %cst_147 = arith.constant dense<0.000000e+00> : vector<256x4xf32>
    %117 = tpu.matmul %114, %116, %cst_147 {dimension_numbers = #tpu.dot_dimension_numbers<[1], [0], [0], [1], [0, 0, 1, 1], [], []>} : vector<256x4xf32>, vector<4x4xf32>, vector<256x4xf32> -> vector<256x4xf32>
    %118 = arith.addf %112, %117 : vector<256x4xf32>
    %c0_148 = arith.constant 0 : index
    %c0_149 = arith.constant 0 : index
    %119 = vector.load %arg5[%c0_148, %c0_149] : memref<1x4xf32, #tpu.memory_space<vmem>>, vector<1x4xf32>
    %120 = vector.broadcast %119 : vector<1x4xf32> to vector<256x4xf32>
    %121 = arith.addf %118, %120 : vector<256x4xf32>
    %c0_150 = arith.constant 0 : index
    %c1_151 = arith.constant 1 : index
    %c1_152 = arith.constant 1 : index
    %c0_153 = arith.constant 0 : index
    %122 = vector.load %arg1[%c0_150, %c1_151, %c1_152, %c0_153] : memref<1x18x18x4xf32, #tpu.memory_space<vmem>>, vector<1x16x16x4xf32>
    %123 = vector.shape_cast %122 : vector<1x16x16x4xf32> to vector<256x4xf32>
    %124 = arith.addf %123, %121 : vector<256x4xf32>
    %125 = vector.shape_cast %124 : vector<256x4xf32> to vector<1x256x4xf32>
    %c0_154 = arith.constant 0 : index
    %c0_155 = arith.constant 0 : index
    %c0_156 = arith.constant 0 : index
    %126 = vector.load %arg6[%c0_154, %c0_155, %c0_156] : memref<1x256x4xf32, #tpu.memory_space<vmem>>, vector<1x256x4xf32>
    tpu.vector_store %arg6[%c0_154, %c0_155, %c0_156], %125 {strides = array<i32>} : memref<1x256x4xf32, #tpu.memory_space<vmem>>, vector<1x256x4xf32>,
    return
  }
  func.func @transform_0(%arg0: i32) -> (i32, i32, i32, i32) {
    %c0_i32 = arith.constant 0 : i32
    %c0_i32_0 = arith.constant 0 : i32
    %c0_i32_1 = arith.constant 0 : i32
    %c0_i32_2 = arith.constant 0 : i32
    return %arg0, %c0_i32, %c0_i32_0, %c0_i32_1 : i32, i32, i32, i32
  }
  func.func @transform_1(%arg0: i32) -> (i32, i32, i32) {
    %c0_i32 = arith.constant 0 : i32
    %c0_i32_0 = arith.constant 0 : i32
    %c0_i32_1 = arith.constant 0 : i32
    %c0_i32_2 = arith.constant 0 : i32
    return %c0_i32, %c0_i32_0, %c0_i32_1 : i32, i32, i32
  }
  func.func @transform_2(%arg0: i32) -> (i32, i32) {
    %c0_i32 = arith.constant 0 : i32
    %c0_i32_0 = arith.constant 0 : i32
    %c0_i32_1 = arith.constant 0 : i32
    return %c0_i32, %c0_i32_0 : i32, i32
  }
  func.func @transform_3(%arg0: i32) -> (i32, i32, i32) {
    %c0_i32 = arith.constant 0 : i32
    %c0_i32_0 = arith.constant 0 : i32
    %c0_i32_1 = arith.constant 0 : i32
    %c0_i32_2 = arith.constant 0 : i32
    return %c0_i32, %c0_i32_0, %c0_i32_1 : i32, i32, i32
  }
  func.func @transform_4(%arg0: i32) -> (i32, i32) {
    %c0_i32 = arith.constant 0 : i32
    %c0_i32_0 = arith.constant 0 : i32
    %c0_i32_1 = arith.constant 0 : i32
    return %c0_i32, %c0_i32_0 : i32, i32
  }
  func.func @transform_5(%arg0: i32) -> (i32, i32, i32) {
    %c0_i32 = arith.constant 0 : i32
    %c0_i32_0 = arith.constant 0 : i32
    %c0_i32_1 = arith.constant 0 : i32
    return %arg0, %c0_i32, %c0_i32_0 : i32, i32, i32
  }
}

</mosaic_0001>

<bundles_post_ra>
// kernel: tpu_custom_call.1
= control target key start
LH: loop header
LB: loop body
LE: loop exit
PB: predicated region body
PF: predicated region fallthrough
CT: control target
= control target key end

     0   :  { %s10371_s18 = smov 0   ;;  %s12376_s0 = inlined_call_operand.vmem [shape: f32[2,18,18,4], index: 0, kind: input, shape index: {}]   ;;  %s12377_s1 = inlined_call_operand.vmem [shape: f32[9,4,4], index: 1, kind: input, shape index: {}]   ;;  %s12378_s2 = inlined_call_operand.vmem [shape: f32[1,4], index: 2, kind: input, shape index: {}]   ;;  %s12379_s3 = inlined_call_operand.vmem [shape: f32[9,4,4], index: 3, kind: input, shape index: {}]   ;;  %s12380_s4 = inlined_call_operand.vmem [shape: f32[1,4], index: 4, kind: input, shape index: {}]   ;;  %s12381_s5 = inlined_call_operand.vmem [shape: f32[2,256,4], index: 5, kind: output, shape index: {}]  }
   0x1 LB: > { %s7469_s19 = sadd.s32 4294967295, %s10338_s18   ;;  %p7473_p0 = scmp.ge.s32.totalorder %s10338_s18, 1  ;;  %s10338_s18 = sphi %s10371_s18, %s15_s18  }
   0x2   : > { %p187_p1 = scmp.lt.s32.totalorder %s10338_s18, 3 }
   0x4   : > { %p188_p2 = pnand %p7473_p0, %p187_p1 }
   0x6   : > { %191 = sbr.rel (%p188_p2) target bundleno = 1545 (0x609), region = 40 }
   0xd   : > { %v7477_v0 = vld [vmem:[%s12377_s1 + $0x4] sm:$0xf]  ;;  %vm389_vm0 = vcmask 1043456   ;;  %p215_p3 = scmp.lt.s32.totalorder %s7469_s19, 1  ;;  %v257_v1 = vld [vmem:[%s12377_s1] sm:$0xf] }
   0xe   : > { %8910 = vmatprep.subr.msk.mxu0 %vm389_vm0, %v7477_v0  ;;  %vm292_vm1 = vcmask 31744   ;;  %v10405_v5 = vld [vmem:[%s12377_s1 + $0x8] sm:$0xf]  ;;  %v10567_v38 = vld [vmem:[%s12377_s1 + $0xc] sm:$0xf]  ;;  %vm3747_vm2 = vcmask 25600  }
   0xf   : > { %8911 = vmatpush3.msk.msra.mxu0 %vm389_vm0, %v7477_v0  ;;  %s12667_s19 = smov (!%p215_p3, %s7469_s19), 1 }
  0x10   : > { %8960 = vmatprep.subr.msk.mxu0 %vm389_vm0, %v257_v1  ;;  %s10322_s24 = smul.u32 432, %s12667_s19  ;;  %s8315_s17 = sshll.u32 %s12667_s19, 8 }
  0x11   : > { %s12246_s22 = scalar_lea.vmem %s12381_s5, %s8315_s17 }
  0x12   : > { %s10394_s27 = scalar_lea.vmem %s12376_s0, %s10322_s24 }
  0x13   : > { %v258_v2 = vld [vmem:[%s10394_s27 + $0x1] sm:$0xff]  ;;  %v259_v3 = vld [vmem:[%s10394_s27 + $0x9] sm:$0xff]  ;;  %v10399_v4 = vld [vmem:[%s10394_s27 + $0x19] sm:$0xff] }
  0x14   : > { %8912 = vmatprep.mubr.msk.f32.mxu0 %vm292_vm1, %v258_v2  ;;  %v10412_v6 = vld [vmem:[%s10394_s27 + $0x21] sm:$0xff]  ;;  %v10415_v7 = vld [vmem:[%s10394_s27 + $0x31] sm:$0xff]  ;;  %v10424_v8 = vld [vmem:[%s10394_s27 + $0x39] sm:$0xff] }
  0x15   : > { %8913 = vmatmul.mubr.msk.f32.vlgmr.msra.gmra.mrb[0].mxu0 %vm292_vm1, %v259_v3  ;;  %v10427_v9 = vld [vmem:[%s10394_s27 + $0x49] sm:$0xff]  ;;  %v10434_v10 = vld [vmem:[%s10394_s27 + $0x51] sm:$0xff]  ;;  %v10437_v11 = vld [vmem:[%s10394_s27 + $0x61] sm:$0xff] }
  0x16   : > { %8961 = vmatpush3.msk.msra.mxu0 %vm389_vm0, %v257_v1  ;;  %8915 = vmatprep.mubr.msk.f32.mxu0 %vm292_vm1, %v10399_v4  ;;  %v10444_v12 = vld [vmem:[%s10394_s27 + $0x69] sm:$0xff]  ;;  %v10447_v13 = vld [vmem:[%s10394_s27 + $0x79] sm:$0xff]  ;;  %v10454_v14 = vld [vmem:[%s10394_s27 + $0x81] sm:$0xff] }
  0x17   : > { %9010 = vmatprep.subr.msk.mxu0 %vm389_vm0, %v10405_v5  ;;  %v10457_v15 = vld [vmem:[%s10394_s27 + $0x91] sm:$0xff]  ;;  %v10464_v16 = vld [vmem:[%s10394_s27 + $0x99] sm:$0xff]  ;;  %v10467_v17 = vld [vmem:[%s10394_s27 + $0xa9] sm:$0xff] }
  0x18   : > { %v10474_v18 = vld [vmem:[%s10394_s27 + $0xb1] sm:$0xff]  ;;  %v10477_v19 = vld [vmem:[%s10394_s27 + $0xc1] sm:$0xff]  ;;  %v10484_v20 = vld [vmem:[%s10394_s27 + $0xc9] sm:$0xff] }
  0x19   : > { %8916 = vmatmul.mubr.msk.f32.gmra.mrb[2].mxu0 %vm292_vm1, %v10412_v6  ;;  %v10487_v21 = vld [vmem:[%s10394_s27 + $0xd9] sm:$0xff]  ;;  %v10494_v22 = vld [vmem:[%s10394_s27 + $0xe1] sm:$0xff]  ;;  %v10497_v23 = vld [vmem:[%s10394_s27 + $0xf1] sm:$0xff] }
  0x1a   : > { %8918 = vmatprep.mubr.msk.f32.mxu0 %vm292_vm1, %v10415_v7  ;;  %v10504_v24 = vld [vmem:[%s10394_s27 + $0xf9] sm:$0xff]  ;;  %v10507_v25 = vld [vmem:[%s10394_s27 + $0x109] sm:$0xff]  ;;  %v10514_v26 = vld [vmem:[%s10394_s27 + $0x111] sm:$0xff] }
  0x1b   : > { %v10517_v27 = vld [vmem:[%s10394_s27 + $0x121] sm:$0xff]  ;;  %v10524_v28 = vld [vmem:[%s10394_s27 + $0x129] sm:$0xff]  ;;  %v10527_v29 = vld [vmem:[%s10394_s27 + $0x139] sm:$0xff] }
  0x1c   : > { %12499 = vst [vmem:[#allocation3_spill] sm:$0xff] %v10517_v27  ;;  %12500 = vst [vmem:[#allocation4_spill] sm:$0xff] %v10524_v28  ;;  %v10534_v30 = vld [vmem:[%s10394_s27 + $0x141] sm:$0xff]  ;;  %v10537_v31 = vld [vmem:[%s10394_s27 + $0x151] sm:$0xff] }
  0x1d   : > { %8919 = vmatmul.mubr.msk.f32.gmra.mrb[4].mxu0 %vm292_vm1, %v10424_v8  ;;  %12501 = vst [vmem:[#allocation5_spill] sm:$0xff] %v10527_v29  ;;  %12502 = vst [vmem:[#allocation6_spill] sm:$0xff] %v10534_v30  ;;  %v10544_v32 = vld [vmem:[%s10394_s27 + $0x159] sm:$0xff]  ;;  %v10547_v33 = vld [vmem:[%s10394_s27 + $0x169] sm:$0xff] }
  0x1e   : > { %8921 = vmatprep.mubr.msk.f32.mxu0 %vm292_vm1, %v10427_v9  ;;  %12503 = vst [vmem:[#allocation7_spill] sm:$0xff] %v10537_v31  ;;  %12504 = vst [vmem:[#allocation8_spill] sm:$0xff] %v10544_v32  ;;  %v10554_v34 = vld [vmem:[%s10394_s27 + $0x171] sm:$0xff]  ;;  %v225_v35 = vld [vmem:[%s10394_s27] sm:$0xff] }
  0x1f   : > { %12505 = vst [vmem:[#allocation9_spill] sm:$0xff] %v10547_v33  ;;  %12506 = vst [vmem:[#allocation10_spill] sm:$0xff] %v10554_v34  ;;  %v226_v36 = vld [vmem:[%s10394_s27 + $0x8] sm:$0xff]  ;;  %v10562_v37 = vld [vmem:[%s10394_s27 + $0x18] sm:$0xff] }
  0x20   : > { %v10575_v39 = vld [vmem:[%s10394_s27 + $0x20] sm:$0xff]  ;;  %v10578_v40 = vld [vmem:[%s10394_s27 + $0x30] sm:$0xff]  ;;  %v10587_v41 = vld [vmem:[%s10394_s27 + $0x38] sm:$0xff] }
  0x21   : > { %8922 = vmatmul.mubr.msk.f32.gmra.mrb[6].mxu0 %vm292_vm1, %v10434_v10  ;;  %v10590_v42 = vld [vmem:[%s10394_s27 + $0x48] sm:$0xff]  ;;  %v10597_v43 = vld [vmem:[%s10394_s27 + $0x50] sm:$0xff]  ;;  %v10600_v44 = vld [vmem:[%s10394_s27 + $0x60] sm:$0xff] }
  0x22   : > { %8924 = vmatprep.mubr.msk.f32.mxu0 %vm292_vm1, %v10437_v11  ;;  %v10607_v45 = vld [vmem:[%s10394_s27 + $0x68] sm:$0xff]  ;;  %v10610_v46 = vld [vmem:[%s10394_s27 + $0x78] sm:$0xff]  ;;  %v10617_v47 = vld [vmem:[%s10394_s27 + $0x80] sm:$0xff] }
  0x23   : > { %v10620_v48 = vld [vmem:[%s10394_s27 + $0x90] sm:$0xff]  ;;  %v10627_v49 = vld [vmem:[%s10394_s27 + $0x98] sm:$0xff]  ;;  %v10630_v50 = vld [vmem:[%s10394_s27 + $0xa8] sm:$0xff] }
  0x24   : > { %v10637_v51 = vld [vmem:[%s10394_s27 + $0xb0] sm:$0xff]  ;;  %v10640_v52 = vld [vmem:[%s10394_s27 + $0xc0] sm:$0xff]  ;;  %v10647_v53 = vld [vmem:[%s10394_s27 + $0xc8] sm:$0xff] }
  0x25   : > { %8925 = vmatmul.mubr.msk.f32.gmra.mrb[8].mxu0 %vm292_vm1, %v10444_v12  ;;  %v10650_v54 = vld [vmem:[%s10394_s27 + $0xd8] sm:$0xff]  ;;  %v10657_v55 = vld [vmem:[%s10394_s27 + $0xe0] sm:$0xff]  ;;  %v10660_v56 = vld [vmem:[%s10394_s27 + $0xf0] sm:$0xff] }
  0x26   : > { %8927 = vmatprep.mubr.msk.f32.mxu0 %vm292_vm1, %v10447_v13  ;;  %v10667_v57 = vld [vmem:[%s10394_s27 + $0xf8] sm:$0xff]  ;;  %v10670_v58 = vld [vmem:[%s10394_s27 + $0x108] sm:$0xff]  ;;  %v10677_v59 = vld [vmem:[%s10394_s27 + $0x110] sm:$0xff] }
  0x27   : > { %v10680_v60 = vld [vmem:[%s10394_s27 + $0x120] sm:$0xff]  ;;  %v10687_v61 = vld [vmem:[%s10394_s27 + $0x128] sm:$0xff]  ;;  %v10690_v62 = vld [vmem:[%s10394_s27 + $0x138] sm:$0xff] }
  0x28   : > { %v10697_v63 = vld [vmem:[%s10394_s27 + $0x140] sm:$0xff]  ;;  %v10700_v0 = vld [vmem:[%s10394_s27 + $0x150] sm:$0xff]  ;;  %v10707_v1 = vld [vmem:[%s10394_s27 + $0x158] sm:$0xff] }
  0x29   : > { %8928 = vmatmul.mubr.msk.f32.gmra.mrb[10].mxu0 %vm292_vm1, %v10454_v14  ;;  %v10710_v2 = vld [vmem:[%s10394_s27 + $0x168] sm:$0xff]  ;;  %v10717_v3 = vld [vmem:[%s10394_s27 + $0x170] sm:$0xff] }
  0x2a   : > { %8930 = vmatprep.mubr.msk.f32.mxu0 %vm292_vm1, %v10457_v15 }
  0x2d   : > { %8931 = vmatmul.mubr.msk.f32.gmra.mrb[12].mxu0 %vm292_vm1, %v10464_v16 }
  0x2e   : > { %8933 = vmatprep.mubr.msk.f32.mxu0 %vm292_vm1, %v10467_v17 }
  0x31   : > { %8934 = vmatmul.mubr.msk.f32.gmra.mrb[14].mxu0 %vm292_vm1, %v10474_v18 }
  0x32   : > { %8936 = vmatprep.mubr.msk.f32.mxu0 %vm292_vm1, %v10477_v19 }
  0x35   : > { %8937 = vmatmul.mubr.msk.f32.gmra.mrb[16].mxu0 %vm292_vm1, %v10484_v20 }
  0x36   : > { %8939 = vmatprep.mubr.msk.f32.mxu0 %vm292_vm1, %v10487_v21 }
  0x39   : > { %8940 = vmatmul.mubr.msk.f32.gmra.mrb[18].mxu0 %vm292_vm1, %v10494_v22 }
  0x3a   : > { %8942 = vmatprep.mubr.msk.f32.mxu0 %vm292_vm1, %v10497_v23 }
  0x3d   : > { %8943 = vmatmul.mubr.msk.f32.gmra.mrb[20].mxu0 %vm292_vm1, %v10504_v24 }
  0x3e   : > { %8945 = vmatprep.mubr.msk.f32.mxu0 %vm292_vm1, %v10507_v25 }
  0x41   : > { %8946 = vmatmul.mubr.msk.f32.gmra.mrb[22].mxu0 %vm292_vm1, %v10514_v26 }
  0x42   : > { %8948 = vmatprep.mubr.msk.f32.mxu0 %vm292_vm1, %v10517_v27 }
  0x45   : > { %8949 = vmatmul.mubr.msk.f32.gmra.mrb[24].mxu0 %vm292_vm1, %v10524_v28 }
  0x46   : > { %8951 = vmatprep.mubr.msk.f32.mxu0 %vm292_vm1, %v10527_v29 }
  0x49   : > { %8952 = vmatmul.mubr.msk.f32.gmra.mrb[26].mxu0 %vm292_vm1, %v10534_v30 }
  0x4a   : > { %8954 = vmatprep.mubr.msk.f32.mxu0 %vm292_vm1, %v10537_v31 }
  0x4d   : > { %8955 = vmatmul.mubr.msk.f32.gmra.mrb[28].mxu0 %vm292_vm1, %v10544_v32  ;;  %v10763_v32 = vld [vmem:[%s10394_s27 + $0x62] sm:$0xff] }
  0x4e   : > { %8957 = vmatprep.mubr.msk.f32.mxu0 %vm292_vm1, %v10547_v33  ;;  %v10741_v33 = vld [vmem:[%s10394_s27 + $0x32] sm:$0xff]  ;;  %12513 = vst [vmem:[#allocation17_spill] sm:$0xff] %v10763_v32 }
  0x4f   : > { %12509 = vst [vmem:[#allocation13_spill] sm:$0xff] %v10741_v33 }
  0x51   : > { %8958 = vmatmul.mubr.msk.f32.gmra.mrb[30].mxu0 %vm292_vm1, %v10554_v34  ;;  %v10730_v34 = vld [vmem:[%s12377_s1 + $0x10] sm:$0xf] }
  0x52   : > { %8962 = vmatprep.mubr.msk.f32.mxu0 %vm292_vm1, %v225_v35  ;;  %v943_v35 = vld [vmem:[%s10394_s27 + $0xa] sm:$0xff] }
  0x55   : > { %8963 = vmatmul.mubr.msk.f32.vlgmr.msra.gmra.mrb[0].mxu0 %vm292_vm1, %v226_v36  ;;  %v10725_v36 = vld [vmem:[%s10394_s27 + $0x1a] sm:$0xff] }
  0x56   : > { %9011 = vmatpush3.msk.msra.mxu0 %vm389_vm0, %v10405_v5  ;;  %8965 = vmatprep.mubr.msk.f32.mxu0 %vm292_vm1, %v10562_v37  ;;  %v942_v5 = vld [vmem:[%s10394_s27 + $0x2] sm:$0xff]  ;;  %12507 = vst [vmem:[#allocation11_spill] sm:$0xff] %v10725_v36 }
  0x57   : > { %9060 = vmatprep.subr.msk.mxu0 %vm389_vm0, %v10567_v38 }
  0x59   : > { %8966 = vmatmul.mubr.msk.f32.gmra.mrb[2].mxu0 %vm292_vm1, %v10575_v39 }
  0x5a   : > { %8968 = vmatprep.mubr.msk.f32.mxu0 %vm292_vm1, %v10578_v40 }
  0x5d   : > { %8969 = vmatmul.mubr.msk.f32.gmra.mrb[4].mxu0 %vm292_vm1, %v10587_v41 }
  0x5e   : > { %8971 = vmatprep.mubr.msk.f32.mxu0 %vm292_vm1, %v10590_v42 }
  0x61   : > { %8972 = vmatmul.mubr.msk.f32.gmra.mrb[6].mxu0 %vm292_vm1, %v10597_v43 }
  0x62   : > { %8974 = vmatprep.mubr.msk.f32.mxu0 %vm292_vm1, %v10600_v44 }
  0x65   : > { %8975 = vmatmul.mubr.msk.f32.gmra.mrb[8].mxu0 %vm292_vm1, %v10607_v45 }
  0x66   : > { %8977 = vmatprep.mubr.msk.f32.mxu0 %vm292_vm1, %v10610_v46 }
  0x69   : > { %8978 = vmatmul.mubr.msk.f32.gmra.mrb[10].mxu0 %vm292_vm1, %v10617_v47 }
  0x6a   : > { %8980 = vmatprep.mubr.msk.f32.mxu0 %vm292_vm1, %v10620_v48 }
  0x6d   : > { %8981 = vmatmul.mubr.msk.f32.gmra.mrb[12].mxu0 %vm292_vm1, %v10627_v49 }
  0x6e   : > { %8983 = vmatprep.mubr.msk.f32.mxu0 %vm292_vm1, %v10630_v50 }
  0x71   : > { %8984 = vmatmul.mubr.msk.f32.gmra.mrb[14].mxu0 %vm292_vm1, %v10637_v51 }
  0x72   : > { %8986 = vmatprep.mubr.msk.f32.mxu0 %vm292_vm1, %v10640_v52 }
  0x75   : > { %8987 = vmatmul.mubr.msk.f32.gmra.mrb[16].mxu0 %vm292_vm1, %v10647_v53 }
  0x76   : > { %8989 = vmatprep.mubr.msk.f32.mxu0 %vm292_vm1, %v10650_v54 }
  0x79   : > { %8990 = vmatmul.mubr.msk.f32.gmra.mrb[18].mxu0 %vm292_vm1, %v10657_v55 }
  0x7a   : > { %8992 = vmatprep.mubr.msk.f32.mxu0 %vm292_vm1, %v10660_v56 }
  0x7d   : > { %8993 = vmatmul.mubr.msk.f32.gmra.mrb[20].mxu0 %vm292_vm1, %v10667_v57 }
  0x7e   : > { %8995 = vmatprep.mubr.msk.f32.mxu0 %vm292_vm1, %v10670_v58 }
  0x81   : > { %8996 = vmatmul.mubr.msk.f32.gmra.mrb[22].mxu0 %vm292_vm1, %v10677_v59 }
  0x82   : > { %8998 = vmatprep.mubr.msk.f32.mxu0 %vm292_vm1, %v10680_v60 }
  0x85   : > { %8999 = vmatmul.mubr.msk.f32.gmra.mrb[24].mxu0 %vm292_vm1, %v10687_v61 }
  0x86   : > { %9001 = vmatprep.mubr.msk.f32.mxu0 %vm292_vm1, %v10690_v62 }
  0x89   : > { %9002 = vmatmul.mubr.msk.f32.gmra.mrb[26].mxu0 %vm292_vm1, %v10697_v63 }
  0x8a   : > { %9004 = vmatprep.mubr.msk.f32.mxu0 %vm292_vm1, %v10700_v0 }
  0x8d   : > { %9005 = vmatmul.mubr.msk.f32.gmra.mrb[28].mxu0 %vm292_vm1, %v10707_v1 }
  0x8e   : > { %9007 = vmatprep.mubr.msk.f32.mxu0 %vm292_vm1, %v10710_v2 }
  0x91   : > { %9008 = vmatmul.mubr.msk.f32.gmra.mrb[30].mxu0 %vm292_vm1, %v10717_v3 }
  0x92   : > { %9012 = vmatprep.mubr.msk.f32.mxu0 %vm292_vm1, %v942_v5  ;;  %v10738_v5 = vld [vmem:[%s10394_s27 + $0x22] sm:$0xff] }
  0x93   : > { %12508 = vst [vmem:[#allocation12_spill] sm:$0xff] %v10738_v5 }
  0x95   : > { %9013 = vmatmul.mubr.msk.f32.vlgmr.msra.gmra.mrb[0].mxu0 %vm292_vm1, %v943_v35  ;;  %v10753_v35 = vld [vmem:[%s10394_s27 + $0x4a] sm:$0xff] }
  0x96   : > { %9061 = vmatpush3.msk.msra.mxu0 %vm389_vm0, %v10567_v38  ;;  %9015 = vmatprep.mubr.msk.f32.mxu0 %vm292_vm1, %v10725_v36  ;;  %v10750_v38 = vld [vmem:[%s10394_s27 + $0x3a] sm:$0xff]  ;;  %12511 = vst [vmem:[#allocation15_spill] sm:$0xff] %v10753_v35  ;;  %v10760_v36 = vld [vmem:[%s10394_s27 + $0x52] sm:$0xff] }
  0x97   : > { %9110 = vmatprep.subr.msk.mxu0 %vm389_vm0, %v10730_v34  ;;  %12510 = vst [vmem:[#allocation14_spill] sm:$0xff] %v10750_v38  ;;  %12512 = vst [vmem:[#allocation16_spill] sm:$0xff] %v10760_v36 }
  0x99   : > { %9016 = vmatmul.mubr.msk.f32.gmra.mrb[2].mxu0 %vm292_vm1, %v10738_v5  ;;  %v10773_v5 = vld [vmem:[%s10394_s27 + $0x7a] sm:$0xff] }
  0x9a   : > { %9018 = vmatprep.mubr.msk.f32.mxu0 %vm292_vm1, %v10741_v33  ;;  %v10770_v33 = vld [vmem:[%s10394_s27 + $0x6a] sm:$0xff]  ;;  %12515 = vst [vmem:[#allocation19_spill] sm:$0xff] %v10773_v5 }
  0x9b   : > { %12514 = vst [vmem:[#allocation18_spill] sm:$0xff] %v10770_v33 }
  0x9d   : > { %9019 = vmatmul.mubr.msk.f32.gmra.mrb[4].mxu0 %vm292_vm1, %v10750_v38  ;;  %v10783_v38 = vld [vmem:[%s10394_s27 + $0x92] sm:$0xff] }
  0x9e   : > { %9021 = vmatprep.mubr.msk.f32.mxu0 %vm292_vm1, %v10753_v35  ;;  %v10780_v35 = vld [vmem:[%s10394_s27 + $0x82] sm:$0xff]  ;;  %12517 = vst [vmem:[#allocation21_spill] sm:$0xff] %v10783_v38 }
  0x9f   : > { %12516 = vst [vmem:[#allocation20_spill] sm:$0xff] %v10780_v35 }
  0xa1   : > { %9022 = vmatmul.mubr.msk.f32.gmra.mrb[6].mxu0 %vm292_vm1, %v10760_v36  ;;  %v10793_v36 = vld [vmem:[%s10394_s27 + $0xaa] sm:$0xff] }
  0xa2   : > { %9024 = vmatprep.mubr.msk.f32.mxu0 %vm292_vm1, %v10763_v32  ;;  %v10790_v32 = vld [vmem:[%s10394_s27 + $0x9a] sm:$0xff]  ;;  %12519 = vst [vmem:[#allocation23_spill] sm:$0xff] %v10793_v36 }
  0xa3   : > { %12518 = vst [vmem:[#allocation22_spill] sm:$0xff] %v10790_v32 }
  0xa5   : > { %9025 = vmatmul.mubr.msk.f32.gmra.mrb[8].mxu0 %vm292_vm1, %v10770_v33  ;;  %v10803_v33 = vld [vmem:[%s10394_s27 + $0xc2] sm:$0xff] }
  0xa6   : > { %9027 = vmatprep.mubr.msk.f32.mxu0 %vm292_vm1, %v10773_v5  ;;  %v10800_v5 = vld [vmem:[%s10394_s27 + $0xb2] sm:$0xff]  ;;  %12521 = vst [vmem:[#allocation25_spill] sm:$0xff] %v10803_v33 }
  0xa7   : > { %12520 = vst [vmem:[#allocation24_spill] sm:$0xff] %v10800_v5 }
  0xa9   : > { %9028 = vmatmul.mubr.msk.f32.gmra.mrb[10].mxu0 %vm292_vm1, %v10780_v35  ;;  %v10813_v35 = vld [vmem:[%s10394_s27 + $0xda] sm:$0xff] }
  0xaa   : > { %9030 = vmatprep.mubr.msk.f32.mxu0 %vm292_vm1, %v10783_v38  ;;  %v10810_v38 = vld [vmem:[%s10394_s27 + $0xca] sm:$0xff]  ;;  %12523 = vst [vmem:[#allocation27_spill] sm:$0xff] %v10813_v35 }
  0xab   : > { %12522 = vst [vmem:[#allocation26_spill] sm:$0xff] %v10810_v38 }
  0xad   : > { %9031 = vmatmul.mubr.msk.f32.gmra.mrb[12].mxu0 %vm292_vm1, %v10790_v32  ;;  %v10823_v32 = vld [vmem:[%s10394_s27 + $0xf2] sm:$0xff] }
  0xae   : > { %9033 = vmatprep.mubr.msk.f32.mxu0 %vm292_vm1, %v10793_v36  ;;  %v10820_v36 = vld [vmem:[%s10394_s27 + $0xe2] sm:$0xff]  ;;  %12525 = vst [vmem:[#allocation29_spill] sm:$0xff] %v10823_v32 }
  0xaf   : > { %12524 = vst [vmem:[#allocation28_spill] sm:$0xff] %v10820_v36 }
  0xb1   : > { %9034 = vmatmul.mubr.msk.f32.gmra.mrb[14].mxu0 %vm292_vm1, %v10800_v5  ;;  %v10833_v5 = vld [vmem:[%s10394_s27 + $0x10a] sm:$0xff] }
  0xb2   : > { %9036 = vmatprep.mubr.msk.f32.mxu0 %vm292_vm1, %v10803_v33  ;;  %v10830_v33 = vld [vmem:[%s10394_s27 + $0xfa] sm:$0xff]  ;;  %12527 = vst [vmem:[#allocation31_spill] sm:$0xff] %v10833_v5 }
  0xb3   : > { %12526 = vst [vmem:[#allocation30_spill] sm:$0xff] %v10830_v33 }
  0xb5   : > { %9037 = vmatmul.mubr.msk.f32.gmra.mrb[16].mxu0 %vm292_vm1, %v10810_v38  ;;  %v10843_v38 = vld [vmem:[%s10394_s27 + $0x122] sm:$0xff] }
  0xb6   : > { %9039 = vmatprep.mubr.msk.f32.mxu0 %vm292_vm1, %v10813_v35  ;;  %v10840_v35 = vld [vmem:[%s10394_s27 + $0x112] sm:$0xff]  ;;  %12529 = vst [vmem:[#allocation33_spill] sm:$0xff] %v10843_v38 }
  0xb7   : > { %12528 = vst [vmem:[#allocation32_spill] sm:$0xff] %v10840_v35 }
  0xb9   : > { %9040 = vmatmul.mubr.msk.f32.gmra.mrb[18].mxu0 %vm292_vm1, %v10820_v36  ;;  %v10853_v36 = vld [vmem:[%s10394_s27 + $0x13a] sm:$0xff] }
  0xba   : > { %9042 = vmatprep.mubr.msk.f32.mxu0 %vm292_vm1, %v10823_v32  ;;  %v10850_v32 = vld [vmem:[%s10394_s27 + $0x12a] sm:$0xff]  ;;  %12530 = vst [vmem:[#allocation34_spill] sm:$0xff] %v10853_v36 }
  0xbd   : > { %9043 = vmatmul.mubr.msk.f32.gmra.mrb[20].mxu0 %vm292_vm1, %v10830_v33  ;;  %v10863_v33 = vld [vmem:[%s10394_s27 + $0x152] sm:$0xff] }
  0xbe   : > { %9045 = vmatprep.mubr.msk.f32.mxu0 %vm292_vm1, %v10833_v5  ;;  %v10860_v5 = vld [vmem:[%s10394_s27 + $0x142] sm:$0xff]  ;;  %12531 = vst [vmem:[#allocation35_spill] sm:$0xff] %v10863_v33 }
  0xc1   : > { %9046 = vmatmul.mubr.msk.f32.gmra.mrb[22].mxu0 %vm292_vm1, %v10840_v35  ;;  %v10873_v35 = vld [vmem:[%s10394_s27 + $0x16a] sm:$0xff] }
  0xc2   : > { %9048 = vmatprep.mubr.msk.f32.mxu0 %vm292_vm1, %v10843_v38  ;;  %v10870_v38 = vld [vmem:[%s10394_s27 + $0x15a] sm:$0xff]  ;;  %12532 = vst [vmem:[#allocation36_spill] sm:$0xff] %v10873_v35 }
  0xc5   : > { %9049 = vmatmul.mubr.msk.f32.gmra.mrb[24].mxu0 %vm292_vm1, %v10850_v32 }
  0xc6   : > { %9051 = vmatprep.mubr.msk.f32.mxu0 %vm292_vm1, %v10853_v36  ;;  %v10880_v36 = vld [vmem:[%s10394_s27 + $0x172] sm:$0xff] }
  0xc9   : > { %9052 = vmatmul.mubr.msk.f32.gmra.mrb[26].mxu0 %vm292_vm1, %v10860_v5 }
  0xca   : > { %9054 = vmatprep.mubr.msk.f32.mxu0 %vm292_vm1, %v10863_v33  ;;  %v7742_v33 = vld [vmem:[%s12377_s1 + $0x14] sm:$0xf] }
  0xcd   : > { %9055 = vmatmul.mubr.msk.f32.gmra.mrb[28].mxu0 %vm292_vm1, %v10870_v38 }
  0xce   : > { %9057 = vmatprep.mubr.msk.f32.mxu0 %vm292_vm1, %v10873_v35 }
  0xd1   : > { %9058 = vmatmul.mubr.msk.f32.gmra.mrb[30].mxu0 %vm292_vm1, %v10880_v36 }
  0xd2   : > { %9062 = vmatprep.mubr.msk.f32.mxu0 %vm292_vm1, %v10562_v37  ;;  %v10956_v37 = vld [vmem:[%s10394_s27 + $0x188] sm:$0xff] }
  0xd5   : > { %9063 = vmatmul.mubr.msk.f32.vlgmr.msra.gmra.mrb[0].mxu0 %vm292_vm1, %v10575_v39  ;;  %v7808_v39 = vld [vmem:[%s12377_s1 + $0x18] sm:$0xf] }
  0xd6   : > { %9111 = vmatpush3.msk.msra.mxu0 %vm389_vm0, %v10730_v34  ;;  %9065 = vmatprep.mubr.msk.f32.mxu0 %vm292_vm1, %v10578_v40  ;;  %v10949_v34 = vld [vmem:[%s10394_s27 + $0x180] sm:$0xff] }
  0xd7   : > { %9160 = vmatprep.subr.msk.mxu0 %vm389_vm0, %v7742_v33 }
  0xd9   : > { %9066 = vmatmul.mubr.msk.f32.gmra.mrb[2].mxu0 %vm292_vm1, %v10587_v41 }
  0xda   : > { %9068 = vmatprep.mubr.msk.f32.mxu0 %vm292_vm1, %v10590_v42 }
  0xdd   : > { %9069 = vmatmul.mubr.msk.f32.gmra.mrb[4].mxu0 %vm292_vm1, %v10597_v43 }
  0xde   : > { %9071 = vmatprep.mubr.msk.f32.mxu0 %vm292_vm1, %v10600_v44 }
  0xe1   : > { %9072 = vmatmul.mubr.msk.f32.gmra.mrb[6].mxu0 %vm292_vm1, %v10607_v45 }
  0xe2   : > { %9074 = vmatprep.mubr.msk.f32.mxu0 %vm292_vm1, %v10610_v46 }
  0xe5   : > { %9075 = vmatmul.mubr.msk.f32.gmra.mrb[8].mxu0 %vm292_vm1, %v10617_v47 }
  0xe6   : > { %9077 = vmatprep.mubr.msk.f32.mxu0 %vm292_vm1, %v10620_v48 }
  0xe9   : > { %9078 = vmatmul.mubr.msk.f32.gmra.mrb[10].mxu0 %vm292_vm1, %v10627_v49 }
  0xea   : > { %9080 = vmatprep.mubr.msk.f32.mxu0 %vm292_vm1, %v10630_v50 }
  0xed   : > { %9081 = vmatmul.mubr.msk.f32.gmra.mrb[12].mxu0 %vm292_vm1, %v10637_v51 }
  0xee   : > { %9083 = vmatprep.mubr.msk.f32.mxu0 %vm292_vm1, %v10640_v52 }
  0xf1   : > { %9084 = vmatmul.mubr.msk.f32.gmra.mrb[14].mxu0 %vm292_vm1, %v10647_v53 }
  0xf2   : > { %9086 = vmatprep.mubr.msk.f32.mxu0 %vm292_vm1, %v10650_v54 }
  0xf5   : > { %9087 = vmatmul.mubr.msk.f32.gmra.mrb[16].mxu0 %vm292_vm1, %v10657_v55 }
  0xf6   : > { %9089 = vmatprep.mubr.msk.f32.mxu0 %vm292_vm1, %v10660_v56 }
  0xf9   : > { %9090 = vmatmul.mubr.msk.f32.gmra.mrb[18].mxu0 %vm292_vm1, %v10667_v57 }
  0xfa   : > { %9092 = vmatprep.mubr.msk.f32.mxu0 %vm292_vm1, %v10670_v58 }
  0xfd   : > { %9093 = vmatmul.mubr.msk.f32.gmra.mrb[20].mxu0 %vm292_vm1, %v10677_v59 }
  0xfe   : > { %9095 = vmatprep.mubr.msk.f32.mxu0 %vm292_vm1, %v10680_v60 }
 0x101   : > { %9096 = vmatmul.mubr.msk.f32.gmra.mrb[22].mxu0 %vm292_vm1, %v10687_v61 }
 0x102   : > { %9098 = vmatprep.mubr.msk.f32.mxu0 %vm292_vm1, %v10690_v62 }
 0x105   : > { %9099 = vmatmul.mubr.msk.f32.gmra.mrb[24].mxu0 %vm292_vm1, %v10697_v63 }
 0x106   : > { %9101 = vmatprep.mubr.msk.f32.mxu0 %vm292_vm1, %v10700_v0 }
 0x109   : > { %9102 = vmatmul.mubr.msk.f32.gmra.mrb[26].mxu0 %vm292_vm1, %v10707_v1 }
 0x10a   : > { %9104 = vmatprep.mubr.msk.f32.mxu0 %vm292_vm1, %v10710_v2 }
 0x10d   : > { %9105 = vmatmul.mubr.msk.f32.gmra.mrb[28].mxu0 %vm292_vm1, %v10717_v3 }
 0x10e   : > { %9107 = vmatprep.mubr.msk.f32.mxu0 %vm292_vm1, %v10949_v34 }
 0x111   : > { %9108 = vmatmul.mubr.msk.f32.gmra.mrb[30].mxu0 %vm292_vm1, %v10956_v37 }
 0x112   : > { %9112 = vmatprep.mubr.msk.f32.mxu0 %vm292_vm1, %v10399_v4  ;;  %v12533_v4 = vld [vmem:[#allocation8_spill] sm:$0xff] }
 0x115   : > { %9113 = vmatmul.mubr.msk.f32.vlgmr.msra.gmra.mrb[0].mxu0 %vm292_vm1, %v10412_v6  ;;  %v12534_v6 = vld [vmem:[#allocation9_spill] sm:$0xff] }
 0x116   : > { %9161 = vmatpush3.msk.msra.mxu0 %vm389_vm0, %v7742_v33  ;;  %9115 = vmatprep.mubr.msk.f32.mxu0 %vm292_vm1, %v10415_v7  ;;  %v11024_v33 = vld [vmem:[%s10394_s27 + $0x181] sm:$0xff] }
 0x117   : > { %9210 = vmatprep.subr.msk.mxu0 %vm389_vm0, %v7808_v39  ;;  %12535 = vst [vmem:[#allocation37_spill] sm:$0xff] %v11024_v33 }
 0x119   : > { %9116 = vmatmul.mubr.msk.f32.gmra.mrb[2].mxu0 %vm292_vm1, %v10424_v8 }
 0x11a   : > { %9118 = vmatprep.mubr.msk.f32.mxu0 %vm292_vm1, %v10427_v9 }
 0x11d   : > { %9119 = vmatmul.mubr.msk.f32.gmra.mrb[4].mxu0 %vm292_vm1, %v10434_v10 }
 0x11e   : > { %9121 = vmatprep.mubr.msk.f32.mxu0 %vm292_vm1, %v10437_v11 }
 0x121   : > { %9122 = vmatmul.mubr.msk.f32.gmra.mrb[6].mxu0 %vm292_vm1, %v10444_v12 }
 0x122   : > { %9124 = vmatprep.mubr.msk.f32.mxu0 %vm292_vm1, %v10447_v13 }
 0x125   : > { %9125 = vmatmul.mubr.msk.f32.gmra.mrb[8].mxu0 %vm292_vm1, %v10454_v14 }
 0x126   : > { %9127 = vmatprep.mubr.msk.f32.mxu0 %vm292_vm1, %v10457_v15 }
 0x129   : > { %9128 = vmatmul.mubr.msk.f32.gmra.mrb[10].mxu0 %vm292_vm1, %v10464_v16 }
 0x12a   : > { %9130 = vmatprep.mubr.msk.f32.mxu0 %vm292_vm1, %v10467_v17 }
 0x12d   : > { %9131 = vmatmul.mubr.msk.f32.gmra.mrb[12].mxu0 %vm292_vm1, %v10474_v18 }
 0x12e   : > { %9133 = vmatprep.mubr.msk.f32.mxu0 %vm292_vm1, %v10477_v19 }
 0x131   : > { %9134 = vmatmul.mubr.msk.f32.gmra.mrb[14].mxu0 %vm292_vm1, %v10484_v20 }
 0x132   : > { %9136 = vmatprep.mubr.msk.f32.mxu0 %vm292_vm1, %v10487_v21 }
 0x135   : > { %9137 = vmatmul.mubr.msk.f32.gmra.mrb[16].mxu0 %vm292_vm1, %v10494_v22 }
 0x136   : > { %9139 = vmatprep.mubr.msk.f32.mxu0 %vm292_vm1, %v10497_v23 }
 0x139   : > { %9140 = vmatmul.mubr.msk.f32.gmra.mrb[18].mxu0 %vm292_vm1, %v10504_v24 }
 0x13a   : > { %9142 = vmatprep.mubr.msk.f32.mxu0 %vm292_vm1, %v10507_v25 }
 0x13d   : > { %9143 = vmatmul.mubr.msk.f32.gmra.mrb[20].mxu0 %vm292_vm1, %v10514_v26 }
 0x13e   : > { %9145 = vmatprep.mubr.msk.f32.mxu0 %vm292_vm1, %v10517_v27  ;;  %v12536_v27 = vld [vmem:[#allocation10_spill] sm:$0xff] }
 0x141   : > { %9146 = vmatmul.mubr.msk.f32.gmra.mrb[22].mxu0 %vm292_vm1, %v10524_v28  ;;  %v12548_v28 = vld [vmem:[#allocation21_spill] sm:$0xff] }
 0x142   : > { %9148 = vmatprep.mubr.msk.f32.mxu0 %vm292_vm1, %v10527_v29  ;;  %v11031_v29 = vld [vmem:[%s10394_s27 + $0x189] sm:$0xff] }
 0x143   : > { %12537 = vst [vmem:[#allocation38_spill] sm:$0xff] %v11031_v29 }
 0x145   : > { %9149 = vmatmul.mubr.msk.f32.gmra.mrb[24].mxu0 %vm292_vm1, %v10534_v30  ;;  %v12544_v30 = vld [vmem:[#allocation17_spill] sm:$0xff] }
 0x146   : > { %9151 = vmatprep.mubr.msk.f32.mxu0 %vm292_vm1, %v10537_v31  ;;  %v12538_v31 = vld [vmem:[#allocation11_spill] sm:$0xff] }
 0x149   : > { %9152 = vmatmul.mubr.msk.f32.gmra.mrb[26].mxu0 %vm292_vm1, %v12533_v4  ;;  %v12539_v4 = vld [vmem:[#allocation12_spill] sm:$0xff] }
 0x14a   : > { %9154 = vmatprep.mubr.msk.f32.mxu0 %vm292_vm1, %v12534_v6  ;;  %v7874_v6 = vld [vmem:[%s12377_s1 + $0x1c] sm:$0xf] }
 0x14d   : > { %9155 = vmatmul.mubr.msk.f32.gmra.mrb[28].mxu0 %vm292_vm1, %v12536_v27  ;;  %v12540_v27 = vld [vmem:[#allocation13_spill] sm:$0xff] }
 0x14e   : > { %9157 = vmatprep.mubr.msk.f32.mxu0 %vm292_vm1, %v11024_v33  ;;  %v12541_v33 = vld [vmem:[#allocation14_spill] sm:$0xff] }
 0x151   : > { %9158 = vmatmul.mubr.msk.f32.gmra.mrb[30].mxu0 %vm292_vm1, %v11031_v29  ;;  %v12542_v29 = vld [vmem:[#allocation15_spill] sm:$0xff] }
 0x152   : > { %9162 = vmatprep.mubr.msk.f32.mxu0 %vm292_vm1, %v12538_v31  ;;  %v12543_v31 = vld [vmem:[#allocation16_spill] sm:$0xff] }
 0x155   : > { %9163 = vmatmul.mubr.msk.f32.vlgmr.msra.gmra.mrb[0].mxu0 %vm292_vm1, %v12539_v4  ;;  %v12545_v4 = vld [vmem:[#allocation18_spill] sm:$0xff] }
 0x156   : > { %9211 = vmatpush3.msk.msra.mxu0 %vm389_vm0, %v7808_v39  ;;  %9165 = vmatprep.mubr.msk.f32.mxu0 %vm292_vm1, %v12540_v27  ;;  %v12546_v39 = vld [vmem:[#allocation19_spill] sm:$0xff]  ;;  %v12547_v27 = vld [vmem:[#allocation20_spill] sm:$0xff] }
 0x157   : > { %9260 = vmatprep.subr.msk.mxu0 %vm389_vm0, %v7874_v6 }
 0x159   : > { %9166 = vmatmul.mubr.msk.f32.gmra.mrb[2].mxu0 %vm292_vm1, %v12541_v33  ;;  %v12549_v33 = vld [vmem:[#allocation22_spill] sm:$0xff] }
 0x15a   : > { %9168 = vmatprep.mubr.msk.f32.mxu0 %vm292_vm1, %v12542_v29  ;;  %v12550_v29 = vld [vmem:[#allocation23_spill] sm:$0xff] }
 0x15d   : > { %9169 = vmatmul.mubr.msk.f32.gmra.mrb[4].mxu0 %vm292_vm1, %v12543_v31  ;;  %v12551_v31 = vld [vmem:[#allocation24_spill] sm:$0xff] }
 0x15e   : > { %9171 = vmatprep.mubr.msk.f32.mxu0 %vm292_vm1, %v12544_v30  ;;  %v12552_v30 = vld [vmem:[#allocation25_spill] sm:$0xff] }
 0x161   : > { %9172 = vmatmul.mubr.msk.f32.gmra.mrb[6].mxu0 %vm292_vm1, %v12545_v4 }
 0x162   : > { %9174 = vmatprep.mubr.msk.f32.mxu0 %vm292_vm1, %v12546_v39  ;;  %v12553_v39 = vld [vmem:[#allocation26_spill] sm:$0xff] }
 0x165   : > { %9175 = vmatmul.mubr.msk.f32.gmra.mrb[8].mxu0 %vm292_vm1, %v12547_v27  ;;  %v12554_v27 = vld [vmem:[#allocation27_spill] sm:$0xff] }
 0x166   : > { %9177 = vmatprep.mubr.msk.f32.mxu0 %vm292_vm1, %v12548_v28  ;;  %v12555_v28 = vld [vmem:[#allocation28_spill] sm:$0xff] }
 0x169   : > { %9178 = vmatmul.mubr.msk.f32.gmra.mrb[10].mxu0 %vm292_vm1, %v12549_v33  ;;  %v12556_v33 = vld [vmem:[#allocation29_spill] sm:$0xff] }
 0x16a   : > { %9180 = vmatprep.mubr.msk.f32.mxu0 %vm292_vm1, %v12550_v29  ;;  %v12557_v29 = vld [vmem:[#allocation30_spill] sm:$0xff] }
 0x16d   : > { %9181 = vmatmul.mubr.msk.f32.gmra.mrb[12].mxu0 %vm292_vm1, %v12551_v31  ;;  %v12558_v31 = vld [vmem:[#allocation31_spill] sm:$0xff] }
 0x16e   : > { %9183 = vmatprep.mubr.msk.f32.mxu0 %vm292_vm1, %v12552_v30  ;;  %v12559_v30 = vld [vmem:[#allocation32_spill] sm:$0xff] }
 0x171   : > { %9184 = vmatmul.mubr.msk.f32.gmra.mrb[14].mxu0 %vm292_vm1, %v12553_v39  ;;  %v12560_v39 = vld [vmem:[#allocation33_spill] sm:$0xff] }
 0x172   : > { %9186 = vmatprep.mubr.msk.f32.mxu0 %vm292_vm1, %v12554_v27  ;;  %v12561_v27 = vld [vmem:[#allocation34_spill] sm:$0xff] }
 0x175   : > { %9187 = vmatmul.mubr.msk.f32.gmra.mrb[16].mxu0 %vm292_vm1, %v12555_v28 }
 0x176   : > { %9189 = vmatprep.mubr.msk.f32.mxu0 %vm292_vm1, %v12556_v33  ;;  %v12562_v33 = vld [vmem:[#allocation35_spill] sm:$0xff] }
 0x179   : > { %9190 = vmatmul.mubr.msk.f32.gmra.mrb[18].mxu0 %vm292_vm1, %v12557_v29 }
 0x17a   : > { %9192 = vmatprep.mubr.msk.f32.mxu0 %vm292_vm1, %v12558_v31 }
 0x17d   : > { %9193 = vmatmul.mubr.msk.f32.gmra.mrb[20].mxu0 %vm292_vm1, %v12559_v30  ;;  %v11099_v30 = vld [vmem:[%s10394_s27 + $0x182] sm:$0xff] }
 0x17e   : > { %9195 = vmatprep.mubr.msk.f32.mxu0 %vm292_vm1, %v12560_v39 }
 0x181   : > { %9196 = vmatmul.mubr.msk.f32.gmra.mrb[22].mxu0 %vm292_vm1, %v10850_v32 }
 0x182   : > { %9198 = vmatprep.mubr.msk.f32.mxu0 %vm292_vm1, %v12561_v27  ;;  %v11106_v27 = vld [vmem:[%s10394_s27 + $0x18a] sm:$0xff] }
 0x185   : > { %9199 = vmatmul.mubr.msk.f32.gmra.mrb[24].mxu0 %vm292_vm1, %v10860_v5 }
 0x186   : > { %9201 = vmatprep.mubr.msk.f32.mxu0 %vm292_vm1, %v12562_v33 }
 0x189   : > { %9202 = vmatmul.mubr.msk.f32.gmra.mrb[26].mxu0 %vm292_vm1, %v10870_v38 }
 0x18a   : > { %9204 = vmatprep.mubr.msk.f32.mxu0 %vm292_vm1, %v10873_v35  ;;  %v7940_v35 = vld [vmem:[%s12377_s1 + $0x20] sm:$0xf] }
 0x18d   : > { %9205 = vmatmul.mubr.msk.f32.gmra.mrb[28].mxu0 %vm292_vm1, %v10880_v36 }
 0x18e   : > { %9207 = vmatprep.mubr.msk.f32.mxu0 %vm292_vm1, %v11099_v30 }
 0x191   : > { %9208 = vmatmul.mubr.msk.f32.gmra.mrb[30].mxu0 %vm292_vm1, %v11106_v27 }
 0x192   : > { %9212 = vmatprep.mubr.msk.f32.mxu0 %vm292_vm1, %v10578_v40  ;;  %v7806_v40 = vld [vmem:[%s10394_s27 + $0x198] sm:$0xff] }
 0x195   : > { %9213 = vmatmul.mubr.msk.f32.vlgmr.msra.gmra.mrb[0].mxu0 %vm292_vm1, %v10587_v41  ;;  %v7807_v41 = vld [vmem:[%s10394_s27 + $0x1a0] sm:$0xff] }
 0x196   : > { %9261 = vmatpush3.msk.msra.mxu0 %vm389_vm0, %v7874_v6  ;;  %9215 = vmatprep.mubr.msk.f32.mxu0 %vm292_vm1, %v10590_v42  ;;  %v12581_v42 = vld [vmem:[#allocation22_spill] sm:$0xff] }
 0x197   : > { %9310 = vmatprep.subr.msk.mxu0 %vm389_vm0, %v7940_v35 }
 0x199   : > { %9216 = vmatmul.mubr.msk.f32.gmra.mrb[2].mxu0 %vm292_vm1, %v10597_v43  ;;  %v12582_v43 = vld [vmem:[#allocation23_spill] sm:$0xff] }
 0x19a   : > { %9218 = vmatprep.mubr.msk.f32.mxu0 %vm292_vm1, %v10600_v44  ;;  %v12583_v44 = vld [vmem:[#allocation24_spill] sm:$0xff] }
 0x19d   : > { %9219 = vmatmul.mubr.msk.f32.gmra.mrb[4].mxu0 %vm292_vm1, %v10607_v45  ;;  %v12584_v45 = vld [vmem:[#allocation25_spill] sm:$0xff] }
 0x19e   : > { %9221 = vmatprep.mubr.msk.f32.mxu0 %vm292_vm1, %v10610_v46  ;;  %v12585_v46 = vld [vmem:[#allocation26_spill] sm:$0xff] }
 0x1a1   : > { %9222 = vmatmul.mubr.msk.f32.gmra.mrb[6].mxu0 %vm292_vm1, %v10617_v47  ;;  %v12586_v47 = vld [vmem:[#allocation27_spill] sm:$0xff] }
 0x1a2   : > { %9224 = vmatprep.mubr.msk.f32.mxu0 %vm292_vm1, %v10620_v48  ;;  %v12587_v48 = vld [vmem:[#allocation29_spill] sm:$0xff] }
 0x1a5   : > { %9225 = vmatmul.mubr.msk.f32.gmra.mrb[8].mxu0 %vm292_vm1, %v10627_v49  ;;  %v12588_v49 = vld [vmem:[#allocation32_spill] sm:$0xff] }
 0x1a6   : > { %9227 = vmatprep.mubr.msk.f32.mxu0 %vm292_vm1, %v10630_v50  ;;  %v7939_v50 = vld [vmem:[%s10394_s27 + $0x1a2] sm:$0xff] }
 0x1a9   : > { %9228 = vmatmul.mubr.msk.f32.gmra.mrb[10].mxu0 %vm292_vm1, %v10637_v51  ;;  %v10340_v51 = vmov 0.0  }
 0x1aa   : > { %9230 = vmatprep.mubr.msk.f32.mxu0 %vm292_vm1, %v10640_v52  ;;  %3750 = vst.msk [vmem:[#allocation2 + $0x20] sm:$0xff] %vm292_vm1, %v10340_v51  ;;  %3745 = vst.msk [vmem:[#allocation2] sm:$0xff] %vm292_vm1, %v10340_v51 }
 0x1ab   : > { %3746 = vst.msk [vmem:[#allocation2 + $0x8] sm:$0xff] %vm292_vm1, %v10340_v51  ;;  %3749 = vst.msk [vmem:[#allocation2 + $0x18] sm:$0xff] %vm292_vm1, %v10340_v51 }
 0x1ac   : > { %3752 = vst.msk [vmem:[#allocation2 + $0x30] sm:$0xff] %vm292_vm1, %v10340_v51  ;;  %3753 = vst.msk [vmem:[#allocation2 + $0x38] sm:$0xff] %vm292_vm1, %v10340_v51 }
 0x1ad   : > { %9231 = vmatmul.mubr.msk.f32.gmra.mrb[12].mxu0 %vm292_vm1, %v10647_v53  ;;  %3755 = vst.msk [vmem:[#allocation2 + $0x48] sm:$0xff] %vm292_vm1, %v10340_v51  ;;  %3756 = vst.msk [vmem:[#allocation2 + $0x50] sm:$0xff] %vm292_vm1, %v10340_v51  ;;  %v3865_v53 = vld [vmem:[%s12379_s3] sm:$0xf] }
 0x1ae   : > { %9233 = vmatprep.mubr.msk.f32.mxu0 %vm292_vm1, %v10650_v54  ;;  %3758 = vst.msk [vmem:[#allocation2 + $0x60] sm:$0xff] %vm292_vm1, %v10340_v51  ;;  %3759 = vst.msk [vmem:[#allocation2 + $0x68] sm:$0xff] %vm292_vm1, %v10340_v51  ;;  %v11377_v54 = vld [vmem:[%s12379_s3 + $0x8] sm:$0xf] }
 0x1af   : > { %3761 = vst.msk [vmem:[#allocation2 + $0x78] sm:$0xff] %vm292_vm1, %v10340_v51  ;;  %3762 = vst.msk [vmem:[#allocation2 + $0x80] sm:$0xff] %vm292_vm1, %v10340_v51 }
 0x1b0   : > { %3764 = vst.msk [vmem:[#allocation2 + $0x90] sm:$0xff] %vm292_vm1, %v10340_v51  ;;  %3765 = vst.msk [vmem:[#allocation2 + $0x98] sm:$0xff] %vm292_vm1, %v10340_v51 }
 0x1b1   : > { %9234 = vmatmul.mubr.msk.f32.gmra.mrb[14].mxu0 %vm292_vm1, %v10657_v55  ;;  %3767 = vst.msk [vmem:[#allocation2 + $0xa8] sm:$0xff] %vm292_vm1, %v10340_v51  ;;  %3768 = vst.msk [vmem:[#allocation2 + $0xb0] sm:$0xff] %vm292_vm1, %v10340_v51  ;;  %v11384_v55 = vld [vmem:[%s12378_s2] ss:$0 sm:$0xff] }
 0x1b2   : > { %9236 = vmatprep.mubr.msk.f32.mxu0 %vm292_vm1, %v10660_v56  ;;  %3770 = vst.msk [vmem:[#allocation2 + $0xc0] sm:$0xff] %vm292_vm1, %v10340_v51  ;;  %3771 = vst.msk [vmem:[#allocation2 + $0xc8] sm:$0xff] %vm292_vm1, %v10340_v51 }
 0x1b3   : > { %3773 = vst.msk [vmem:[#allocation2 + $0xd8] sm:$0xff] %vm292_vm1, %v10340_v51  ;;  %3774 = vst.msk [vmem:[#allocation2 + $0xe0] sm:$0xff] %vm292_vm1, %v10340_v51 }
 0x1b4   : > { %3776 = vst.msk [vmem:[#allocation2 + $0xf0] sm:$0xff] %vm292_vm1, %v10340_v51  ;;  %3777 = vst.msk [vmem:[#allocation2 + $0xf8] sm:$0xff] %vm292_vm1, %v10340_v51 }
 0x1b5   : > { %9237 = vmatmul.mubr.msk.f32.gmra.mrb[16].mxu0 %vm292_vm1, %v10667_v57  ;;  %3779 = vst.msk [vmem:[#allocation2 + $0x108] sm:$0xff] %vm292_vm1, %v10340_v51  ;;  %3780 = vst.msk [vmem:[#allocation2 + $0x110] sm:$0xff] %vm292_vm1, %v10340_v51 }
 0x1b6   : > { %9239 = vmatprep.mubr.msk.f32.mxu0 %vm292_vm1, %v10670_v58  ;;  %3782 = vst.msk [vmem:[#allocation2 + $0x120] sm:$0xff] %vm292_vm1, %v10340_v51  ;;  %3783 = vst.msk [vmem:[#allocation2 + $0x128] sm:$0xff] %vm292_vm1, %v10340_v51 }
 0x1b7   : > { %3785 = vst.msk [vmem:[#allocation2 + $0x138] sm:$0xff] %vm292_vm1, %v10340_v51  ;;  %3786 = vst.msk [vmem:[#allocation2 + $0x140] sm:$0xff] %vm292_vm1, %v10340_v51 }
 0x1b8   : > { %3788 = vst.msk [vmem:[#allocation2 + $0x150] sm:$0xff] %vm292_vm1, %v10340_v51  ;;  %3789 = vst.msk [vmem:[#allocation2 + $0x158] sm:$0xff] %vm292_vm1, %v10340_v51 }
 0x1b9   : > { %9240 = vmatmul.mubr.msk.f32.gmra.mrb[18].mxu0 %vm292_vm1, %v10677_v59  ;;  %3791 = vst.msk [vmem:[#allocation2 + $0x168] sm:$0xff] %vm292_vm1, %v10340_v51  ;;  %3792 = vst.msk [vmem:[#allocation2 + $0x170] sm:$0xff] %vm292_vm1, %v10340_v51 }
 0x1ba   : > { %9242 = vmatprep.mubr.msk.f32.mxu0 %vm292_vm1, %v10680_v60  ;;  %3794 = vst.msk [vmem:[#allocation2 + $0x180] sm:$0xff] %vm292_vm1, %v10340_v51  ;;  %3795 = vst.msk [vmem:[#allocation2 + $0x188] sm:$0xff] %vm292_vm1, %v10340_v51 }
 0x1bb   : > { %3797 = vst.msk [vmem:[#allocation2 + $0x198] sm:$0xff] %vm292_vm1, %v10340_v51  ;;  %3798 = vst.msk [vmem:[#allocation2 + $0x1a0] sm:$0xff] %vm292_vm1, %v10340_v51 }
 0x1bc   : > { %3751 = vst.msk [vmem:[#allocation2 + $0x28] sm:$0x3] %vm3747_vm2, %v10340_v51  ;;  %3748 = vst.msk [vmem:[#allocation2 + $0x10] sm:$0x3] %vm3747_vm2, %v10340_v51 }
 0x1bd   : > { %9243 = vmatmul.mubr.msk.f32.gmra.mrb[20].mxu0 %vm292_vm1, %v10687_v61  ;;  %3754 = vst.msk [vmem:[#allocation2 + $0x40] sm:$0x3] %vm3747_vm2, %v10340_v51  ;;  %3757 = vst.msk [vmem:[#allocation2 + $0x58] sm:$0x3] %vm3747_vm2, %v10340_v51 }
 0x1be   : > { %9245 = vmatprep.mubr.msk.f32.mxu0 %vm292_vm1, %v10690_v62  ;;  %3760 = vst.msk [vmem:[#allocation2 + $0x70] sm:$0x3] %vm3747_vm2, %v10340_v51  ;;  %3763 = vst.msk [vmem:[#allocation2 + $0x88] sm:$0x3] %vm3747_vm2, %v10340_v51 }
 0x1bf   : > { %3766 = vst.msk [vmem:[#allocation2 + $0xa0] sm:$0x3] %vm3747_vm2, %v10340_v51  ;;  %3769 = vst.msk [vmem:[#allocation2 + $0xb8] sm:$0x3] %vm3747_vm2, %v10340_v51 }
 0x1c0   : > { %3772 = vst.msk [vmem:[#allocation2 + $0xd0] sm:$0x3] %vm3747_vm2, %v10340_v51  ;;  %3775 = vst.msk [vmem:[#allocation2 + $0xe8] sm:$0x3] %vm3747_vm2, %v10340_v51 }
 0x1c1   : > { %9246 = vmatmul.mubr.msk.f32.gmra.mrb[22].mxu0 %vm292_vm1, %v10697_v63  ;;  %3778 = vst.msk [vmem:[#allocation2 + $0x100] sm:$0x3] %vm3747_vm2, %v10340_v51  ;;  %3781 = vst.msk [vmem:[#allocation2 + $0x118] sm:$0x3] %vm3747_vm2, %v10340_v51 }
 0x1c2   : > { %9248 = vmatprep.mubr.msk.f32.mxu0 %vm292_vm1, %v10700_v0  ;;  %3784 = vst.msk [vmem:[#allocation2 + $0x130] sm:$0x3] %vm3747_vm2, %v10340_v51  ;;  %3787 = vst.msk [vmem:[#allocation2 + $0x148] sm:$0x3] %vm3747_vm2, %v10340_v51 }
 0x1c3   : > { %3790 = vst.msk [vmem:[#allocation2 + $0x160] sm:$0x3] %vm3747_vm2, %v10340_v51  ;;  %3793 = vst.msk [vmem:[#allocation2 + $0x178] sm:$0x3] %vm3747_vm2, %v10340_v51  ;;  %v3867_v52 = vld [vmem:[#allocation2 + $0x9] sm:$0xff] }
 0x1c4   : > { %3796 = vst.msk [vmem:[#allocation2 + $0x190] sm:$0x3] %vm3747_vm2, %v10340_v51  ;;  %3799 = vst.msk [vmem:[#allocation2 + $0x1a8] sm:$0x3] %vm3747_vm2, %v10340_v51 }
 0x1c5   : > { %9249 = vmatmul.mubr.msk.f32.gmra.mrb[24].mxu0 %vm292_vm1, %v10707_v1 }
 0x1c6   : > { %9251 = vmatprep.mubr.msk.f32.mxu0 %vm292_vm1, %v10710_v2 }
 0x1c9   : > { %9252 = vmatmul.mubr.msk.f32.gmra.mrb[26].mxu0 %vm292_vm1, %v10717_v3 }
 0x1ca   : > { %9254 = vmatprep.mubr.msk.f32.mxu0 %vm292_vm1, %v10949_v34 }
 0x1cd   : > { %9255 = vmatmul.mubr.msk.f32.gmra.mrb[28].mxu0 %vm292_vm1, %v10956_v37 }
 0x1ce   : > { %9257 = vmatprep.mubr.msk.f32.mxu0 %vm292_vm1, %v7806_v40 }
 0x1d1   : > { %9258 = vmatmul.mubr.msk.f32.gmra.mrb[30].mxu0 %vm292_vm1, %v7807_v41 }
 0x1d2   : > { %9262 = vmatprep.mubr.msk.f32.mxu0 %vm292_vm1, %v10415_v7  ;;  %v12563_v7 = vld [vmem:[#allocation3_spill] sm:$0xff] }
 0x1d5   : > { %9263 = vmatmul.mubr.msk.f32.vlgmr.msra.gmra.mrb[0].mxu0 %vm292_vm1, %v10424_v8  ;;  %v12564_v8 = vld [vmem:[#allocation4_spill] sm:$0xff] }
 0x1d6   : > { %9311 = vmatpush3.msk.msra.mxu0 %vm389_vm0, %v7940_v35  ;;  %9265 = vmatprep.mubr.msk.f32.mxu0 %vm292_vm1, %v10427_v9  ;;  %v12565_v9 = vld [vmem:[#allocation5_spill] sm:$0xff] }
 0x1d9   : > { %9266 = vmatmul.mubr.msk.f32.gmra.mrb[2].mxu0 %vm292_vm1, %v10434_v10  ;;  %v12566_v10 = vld [vmem:[#allocation6_spill] sm:$0xff] }
 0x1da   : > { %9268 = vmatprep.mubr.msk.f32.mxu0 %vm292_vm1, %v10437_v11  ;;  %v12567_v11 = vld [vmem:[#allocation7_spill] sm:$0xff] }
 0x1dd   : > { %9269 = vmatmul.mubr.msk.f32.gmra.mrb[4].mxu0 %vm292_vm1, %v10444_v12  ;;  %v12568_v12 = vld [vmem:[#allocation8_spill] sm:$0xff] }
 0x1de   : > { %9271 = vmatprep.mubr.msk.f32.mxu0 %vm292_vm1, %v10447_v13  ;;  %v12569_v13 = vld [vmem:[#allocation9_spill] sm:$0xff] }
 0x1e1   : > { %9272 = vmatmul.mubr.msk.f32.gmra.mrb[6].mxu0 %vm292_vm1, %v10454_v14  ;;  %v12570_v14 = vld [vmem:[#allocation10_spill] sm:$0xff] }
 0x1e2   : > { %9274 = vmatprep.mubr.msk.f32.mxu0 %vm292_vm1, %v10457_v15  ;;  %v12571_v15 = vld [vmem:[#allocation37_spill] sm:$0xff] }
 0x1e5   : > { %9275 = vmatmul.mubr.msk.f32.gmra.mrb[8].mxu0 %vm292_vm1, %v10464_v16  ;;  %v7872_v16 = vld [vmem:[%s10394_s27 + $0x199] sm:$0xff] }
 0x1e6   : > { %9277 = vmatprep.mubr.msk.f32.mxu0 %vm292_vm1, %v10467_v17  ;;  %v12572_v17 = vld [vmem:[#allocation38_spill] sm:$0xff] }
 0x1e9   : > { %9278 = vmatmul.mubr.msk.f32.gmra.mrb[10].mxu0 %vm292_vm1, %v10474_v18  ;;  %v7873_v18 = vld [vmem:[%s10394_s27 + $0x1a1] sm:$0xff] }
 0x1ea   : > { %9280 = vmatprep.mubr.msk.f32.mxu0 %vm292_vm1, %v10477_v19  ;;  %v12573_v19 = vld [vmem:[#allocation13_spill] sm:$0xff] }
 0x1ed   : > { %9281 = vmatmul.mubr.msk.f32.gmra.mrb[12].mxu0 %vm292_vm1, %v10484_v20  ;;  %v12574_v20 = vld [vmem:[#allocation14_spill] sm:$0xff] }
 0x1ee   : > { %9283 = vmatprep.mubr.msk.f32.mxu0 %vm292_vm1, %v10487_v21  ;;  %v12575_v21 = vld [vmem:[#allocation15_spill] sm:$0xff] }
 0x1f1   : > { %9284 = vmatmul.mubr.msk.f32.gmra.mrb[14].mxu0 %vm292_vm1, %v10494_v22  ;;  %v12576_v22 = vld [vmem:[#allocation16_spill] sm:$0xff] }
 0x1f2   : > { %9286 = vmatprep.mubr.msk.f32.mxu0 %vm292_vm1, %v10497_v23  ;;  %v12577_v23 = vld [vmem:[#allocation17_spill] sm:$0xff] }
 0x1f5   : > { %9287 = vmatmul.mubr.msk.f32.gmra.mrb[16].mxu0 %vm292_vm1, %v10504_v24  ;;  %v12578_v24 = vld [vmem:[#allocation19_spill] sm:$0xff] }
 0x1f6   : > { %9289 = vmatprep.mubr.msk.f32.mxu0 %vm292_vm1, %v10507_v25  ;;  %v12579_v25 = vld [vmem:[#allocation20_spill] sm:$0xff] }
 0x1f9   : > { %9290 = vmatmul.mubr.msk.f32.gmra.mrb[18].mxu0 %vm292_vm1, %v10514_v26  ;;  %v12580_v26 = vld [vmem:[#allocation21_spill] sm:$0xff] }
 0x1fa   : > { %9292 = vmatprep.mubr.msk.f32.mxu0 %vm292_vm1, %v12563_v7 }
 0x1fd   : > { %9293 = vmatmul.mubr.msk.f32.gmra.mrb[20].mxu0 %vm292_vm1, %v12564_v8 }
 0x1fe   : > { %9295 = vmatprep.mubr.msk.f32.mxu0 %vm292_vm1, %v12565_v9 }
 0x201   : > { %9296 = vmatmul.mubr.msk.f32.gmra.mrb[22].mxu0 %vm292_vm1, %v12566_v10 }
 0x202   : > { %9298 = vmatprep.mubr.msk.f32.mxu0 %vm292_vm1, %v12567_v11 }
 0x205   : > { %9299 = vmatmul.mubr.msk.f32.gmra.mrb[24].mxu0 %vm292_vm1, %v12568_v12 }
 0x206   : > { %9301 = vmatprep.mubr.msk.f32.mxu0 %vm292_vm1, %v12569_v13 }
 0x209   : > { %9302 = vmatmul.mubr.msk.f32.gmra.mrb[26].mxu0 %vm292_vm1, %v12570_v14 }
 0x20a   : > { %9304 = vmatprep.mubr.msk.f32.mxu0 %vm292_vm1, %v12571_v15 }
 0x20d   : > { %9305 = vmatmul.mubr.msk.f32.gmra.mrb[28].mxu0 %vm292_vm1, %v12572_v17 }
 0x20e   : > { %9307 = vmatprep.mubr.msk.f32.mxu0 %vm292_vm1, %v7872_v16 }
 0x211   : > { %9308 = vmatmul.mubr.msk.f32.gmra.mrb[30].mxu0 %vm292_vm1, %v7873_v18 }
 0x212   : > { %9312 = vmatprep.mubr.msk.f32.mxu0 %vm292_vm1, %v12573_v19 }
 0x215   : > { %9313 = vmatmul.mubr.msk.f32.vlgmr.msra.gmra.mrb[0].mxu0 %vm292_vm1, %v12574_v20 }
 0x216   : > { %9315 = vmatprep.mubr.msk.f32.mxu0 %vm292_vm1, %v12575_v21 }
 0x219   : > { %9316 = vmatmul.mubr.msk.f32.gmra.mrb[2].mxu0 %vm292_vm1, %v12576_v22 }
 0x21a   : > { %9318 = vmatprep.mubr.msk.f32.mxu0 %vm292_vm1, %v12577_v23 }
 0x21d   : > { %9319 = vmatmul.mubr.msk.f32.gmra.mrb[4].mxu0 %vm292_vm1, %v12545_v4 }
 0x21e   : > { %9321 = vmatprep.mubr.msk.f32.mxu0 %vm292_vm1, %v12578_v24 }
 0x221   : > { %9322 = vmatmul.mubr.msk.f32.gmra.mrb[6].mxu0 %vm292_vm1, %v12579_v25 }
 0x222   : > { %9324 = vmatprep.mubr.msk.f32.mxu0 %vm292_vm1, %v12580_v26 }
 0x225   : > { %9325 = vmatmul.mubr.msk.f32.gmra.mrb[8].mxu0 %vm292_vm1, %v12581_v42 }
 0x226   : > { %9327 = vmatprep.mubr.msk.f32.mxu0 %vm292_vm1, %v12582_v43 }
 0x229   : > { %9328 = vmatmul.mubr.msk.f32.gmra.mrb[10].mxu0 %vm292_vm1, %v12583_v44 }
 0x22a   : > { %9330 = vmatprep.mubr.msk.f32.mxu0 %vm292_vm1, %v12584_v45 }
 0x22d   : > { %9331 = vmatmul.mubr.msk.f32.gmra.mrb[12].mxu0 %vm292_vm1, %v12585_v46 }
 0x22e   : > { %9333 = vmatprep.mubr.msk.f32.mxu0 %vm292_vm1, %v12586_v47 }
 0x231   : > { %9334 = vmatmul.mubr.msk.f32.gmra.mrb[14].mxu0 %vm292_vm1, %v12555_v28  ;;  %v12589_v28 = vld [vmem:[#allocation34_spill] sm:$0xff] }
 0x232   : > { %9336 = vmatprep.mubr.msk.f32.mxu0 %vm292_vm1, %v12587_v48 }
 0x235   : > { %9337 = vmatmul.mubr.msk.f32.gmra.mrb[16].mxu0 %vm292_vm1, %v12557_v29  ;;  %v12590_v29 = vld [vmem:[#allocation36_spill] sm:$0xff] }
 0x236   : > { %9339 = vmatprep.mubr.msk.f32.mxu0 %vm292_vm1, %v12558_v31 }
 0x239   : > { %9340 = vmatmul.mubr.msk.f32.gmra.mrb[18].mxu0 %vm292_vm1, %v12588_v49 }
 0x23a   : > { %9342 = vmatprep.mubr.msk.f32.mxu0 %vm292_vm1, %v12560_v39 }
 0x23d   : > { %9343 = vmatmul.mubr.msk.f32.gmra.mrb[20].mxu0 %vm292_vm1, %v10850_v32  ;;  %v7938_v32 = vld [vmem:[%s10394_s27 + $0x19a] sm:$0xff] }
 0x23e   : > { %9345 = vmatprep.mubr.msk.f32.mxu0 %vm292_vm1, %v12589_v28 }
 0x241   : > { %9346 = vmatmul.mubr.msk.f32.gmra.mrb[22].mxu0 %vm292_vm1, %v10860_v5 }
 0x242   : > { %9348 = vmatprep.mubr.msk.f32.mxu0 %vm292_vm1, %v12562_v33 }
 0x245   : > { %9349 = vmatmul.mubr.msk.f32.gmra.mrb[24].mxu0 %vm292_vm1, %v10870_v38 }
 0x246   : > { %9351 = vmatprep.mubr.msk.f32.mxu0 %vm292_vm1, %v12590_v29 }
 0x249   : > { %9352 = vmatmul.mubr.msk.f32.gmra.mrb[26].mxu0 %vm292_vm1, %v10880_v36 }
 0x24a   : > { %9354 = vmatprep.mubr.msk.f32.mxu0 %vm292_vm1, %v11099_v30  ;;  %v3866_v30 = vld [vmem:[#allocation2 + $0x1] sm:$0xff] }
 0x24b   : > { %9362 = vmatprep.mubr.msk.f32.mxu1 %vm292_vm1, %v3866_v30 }
 0x24d   : > { %9355 = vmatmul.mubr.msk.f32.gmra.mrb[28].mxu0 %vm292_vm1, %v11106_v27  ;;  %v7975_v27 = vld [vmem:[%s12379_s3 + $0x4] sm:$0xf] }
 0x24e   : > { %9357 = vmatprep.mubr.msk.f32.mxu0 %vm292_vm1, %v7938_v32  ;;  %9360 = vmatprep.subr.msk.mxu1 %vm389_vm0, %v7975_v27 }
 0x24f   : > { %9361 = vmatpush3.msk.msra.mxu1 %vm389_vm0, %v7975_v27 }
 0x250   : > { %9363 = vmatmul.mubr.msk.f32.vlgmr.msra.gmra.mrb[0].mxu1 %vm292_vm1, %v3867_v52  ;;  %9410 = vmatprep.subr.msk.mxu1 %vm389_vm0, %v3865_v53 }
 0x251   : > { %9358 = vmatmul.mubr.msk.f32.gmra.mrb[30].mxu0 %vm292_vm1, %v7939_v50  ;;  %9411 = vmatpush3.msk.msra.mxu1 %vm389_vm0, %v3865_v53 }
 0x252   : > { %9460 = vmatprep.subr.msk.mxu1 %vm389_vm0, %v11377_v54 }
 0x2e8   : > { %v9314_v56 = vpop.f32.mrb[0].mxu0 }
 0x2e9   : > { %v3682_v57 = vadd.f32 %v9314_v56, %v11384_v55  ;;  %v3483_v58 = vpop.f32.mrb[1].mxu0 }
 0x2ea   : > { %v3681_v59 = vadd.f32 %v11384_v55, %v3483_v58 }
 0x2eb   : > { %v3714_v60 = vmax.f32 %v3682_v57, 0.0 }
 0x2ec   : > { %v3713_v61 = vmax.f32 %v3681_v59, 0.0  ;;  %v9317_v62 = vpop.f32.mrb[2].mxu0 }
 0x2ed   : > { %3802 = vst.msk [vmem:[#allocation2 + $0x21] sm:$0xff] %vm292_vm1, %v3714_v60  ;;  %v3684_v63 = vadd.f32 %v9317_v62, %v11384_v55  ;;  %v3493_v0 = vpop.f32.mrb[3].mxu0 }
 0x2ee   : > { %3801 = vst.msk [vmem:[#allocation2 + $0x19] sm:$0xff] %vm292_vm1, %v3713_v61  ;;  %v3683_v1 = vadd.f32 %v11384_v55, %v3493_v0 }
 0x2ef   : > { %v3716_v2 = vmax.f32 %v3684_v63, 0.0 }
 0x2f0   : > { %v3715_v3 = vmax.f32 %v3683_v1, 0.0  ;;  %v9320_v36 = vpop.f32.mrb[4].mxu0 }
 0x2f1   : > { %3804 = vst.msk [vmem:[#allocation2 + $0x39] sm:$0xff] %vm292_vm1, %v3716_v2  ;;  %v3686_v5 = vadd.f32 %v9320_v36, %v11384_v55  ;;  %v3503_v38 = vpop.f32.mrb[5].mxu0 }
 0x2f2   : > { %3803 = vst.msk [vmem:[#allocation2 + $0x31] sm:$0xff] %vm292_vm1, %v3715_v3  ;;  %v3685_v35 = vadd.f32 %v11384_v55, %v3503_v38 }
 0x2f3   : > { %v3718_v34 = vmax.f32 %v3686_v5, 0.0 }
 0x2f4   : > { %v3717_v37 = vmax.f32 %v3685_v35, 0.0  ;;  %v9323_v6 = vpop.f32.mrb[6].mxu0  ;;  %v11404_v40 = vld [vmem:[#allocation2 + $0x21] sm:$0xff] }
 0x2f5   : > { %3806 = vst.msk [vmem:[#allocation2 + $0x51] sm:$0xff] %vm292_vm1, %v3718_v34  ;;  %v3688_v33 = vadd.f32 %v9323_v6, %v11384_v55  ;;  %v3513_v31 = vpop.f32.mrb[7].mxu0  ;;  %v11398_v4 = vld [vmem:[#allocation2 + $0x19] sm:$0xff] }
 0x2f6   : > { %3805 = vst.msk [vmem:[#allocation2 + $0x49] sm:$0xff] %vm292_vm1, %v3717_v37  ;;  %v3687_v39 = vadd.f32 %v11384_v55, %v3513_v31  ;;  %9365 = vmatprep.mubr.msk.f32.mxu1 %vm292_vm1, %v11398_v4 }
 0x2f7   : > { %v3720_v41 = vmax.f32 %v3688_v33, 0.0  ;;  %9366 = vmatmul.mubr.msk.f32.gmra.mrb[2].mxu1 %vm292_vm1, %v11404_v40 }
 0x2f8   : > { %v3719_v7 = vmax.f32 %v3687_v39, 0.0  ;;  %v9326_v8 = vpop.f32.mrb[8].mxu0  ;;  %v11416_v13 = vld [vmem:[#allocation2 + $0x39] sm:$0xff] }
 0x2f9   : > { %3808 = vst.msk [vmem:[#allocation2 + $0x69] sm:$0xff] %vm292_vm1, %v3720_v41  ;;  %v3690_v9 = vadd.f32 %v9326_v8, %v11384_v55  ;;  %v3523_v10 = vpop.f32.mrb[9].mxu0  ;;  %v11410_v11 = vld [vmem:[#allocation2 + $0x31] sm:$0xff] }
 0x2fa   : > { %3807 = vst.msk [vmem:[#allocation2 + $0x61] sm:$0xff] %vm292_vm1, %v3719_v7  ;;  %v3689_v12 = vadd.f32 %v11384_v55, %v3523_v10  ;;  %9368 = vmatprep.mubr.msk.f32.mxu1 %vm292_vm1, %v11410_v11 }
 0x2fb   : > { %v3722_v14 = vmax.f32 %v3690_v9, 0.0  ;;  %9369 = vmatmul.mubr.msk.f32.gmra.mrb[4].mxu1 %vm292_vm1, %v11416_v13 }
 0x2fc   : > { %v3721_v15 = vmax.f32 %v3689_v12, 0.0  ;;  %v9329_v16 = vpop.f32.mrb[10].mxu0  ;;  %v11428_v21 = vld [vmem:[#allocation2 + $0x51] sm:$0xff] }
 0x2fd   : > { %3810 = vst.msk [vmem:[#allocation2 + $0x81] sm:$0xff] %vm292_vm1, %v3722_v14  ;;  %v3692_v17 = vadd.f32 %v9329_v16, %v11384_v55  ;;  %v3533_v18 = vpop.f32.mrb[11].mxu0  ;;  %v11422_v19 = vld [vmem:[#allocation2 + $0x49] sm:$0xff] }
 0x2fe   : > { %3809 = vst.msk [vmem:[#allocation2 + $0x79] sm:$0xff] %vm292_vm1, %v3721_v15  ;;  %v3691_v20 = vadd.f32 %v11384_v55, %v3533_v18  ;;  %9371 = vmatprep.mubr.msk.f32.mxu1 %vm292_vm1, %v11422_v19 }
 0x2ff   : > { %v3724_v22 = vmax.f32 %v3692_v17, 0.0  ;;  %9372 = vmatmul.mubr.msk.f32.gmra.mrb[6].mxu1 %vm292_vm1, %v11428_v21 }
 0x300   : > { %v3723_v23 = vmax.f32 %v3691_v20, 0.0  ;;  %v9332_v24 = vpop.f32.mrb[12].mxu0  ;;  %v11440_v44 = vld [vmem:[#allocation2 + $0x69] sm:$0xff] }
 0x301   : > { %3812 = vst.msk [vmem:[#allocation2 + $0x99] sm:$0xff] %vm292_vm1, %v3724_v22  ;;  %v3694_v25 = vadd.f32 %v9332_v24, %v11384_v55  ;;  %v3543_v26 = vpop.f32.mrb[13].mxu0  ;;  %v11434_v42 = vld [vmem:[#allocation2 + $0x61] sm:$0xff] }
 0x302   : > { %3811 = vst.msk [vmem:[#allocation2 + $0x91] sm:$0xff] %vm292_vm1, %v3723_v23  ;;  %v3693_v43 = vadd.f32 %v11384_v55, %v3543_v26  ;;  %9374 = vmatprep.mubr.msk.f32.mxu1 %vm292_vm1, %v11434_v42 }
 0x303   : > { %v3726_v45 = vmax.f32 %v3694_v25, 0.0  ;;  %9375 = vmatmul.mubr.msk.f32.gmra.mrb[8].mxu1 %vm292_vm1, %v11440_v44 }
 0x304   : > { %v3725_v46 = vmax.f32 %v3693_v43, 0.0  ;;  %v9335_v47 = vpop.f32.mrb[14].mxu0  ;;  %v11452_v32 = vld [vmem:[#allocation2 + $0x81] sm:$0xff] }
 0x305   : > { %3814 = vst.msk [vmem:[#allocation2 + $0xb1] sm:$0xff] %vm292_vm1, %v3726_v45  ;;  %v3696_v48 = vadd.f32 %v9335_v47, %v11384_v55  ;;  %v3553_v49 = vpop.f32.mrb[15].mxu0  ;;  %v11446_v28 = vld [vmem:[#allocation2 + $0x79] sm:$0xff] }
 0x306   : > { %3813 = vst.msk [vmem:[#allocation2 + $0xa9] sm:$0xff] %vm292_vm1, %v3725_v46  ;;  %v3695_v29 = vadd.f32 %v11384_v55, %v3553_v49  ;;  %9377 = vmatprep.mubr.msk.f32.mxu1 %vm292_vm1, %v11446_v28 }
 0x307   : > { %v3728_v50 = vmax.f32 %v3696_v48, 0.0  ;;  %9378 = vmatmul.mubr.msk.f32.gmra.mrb[10].mxu1 %vm292_vm1, %v11452_v32 }
 0x308   : > { %v3727_v51 = vmax.f32 %v3695_v29, 0.0  ;;  %v9338_v27 = vpop.f32.mrb[16].mxu0  ;;  %v11464_v57 = vld [vmem:[#allocation2 + $0x99] sm:$0xff] }
 0x309   : > { %3816 = vst.msk [vmem:[#allocation2 + $0xc9] sm:$0xff] %vm292_vm1, %v3728_v50  ;;  %v3698_v30 = vadd.f32 %v9338_v27, %v11384_v55  ;;  %v3563_v52 = vpop.f32.mrb[17].mxu0  ;;  %v11458_v53 = vld [vmem:[#allocation2 + $0x91] sm:$0xff] }
 0x30a   : > { %3815 = vst.msk [vmem:[#allocation2 + $0xc1] sm:$0xff] %vm292_vm1, %v3727_v51  ;;  %v3697_v56 = vadd.f32 %v11384_v55, %v3563_v52  ;;  %9380 = vmatprep.mubr.msk.f32.mxu1 %vm292_vm1, %v11458_v53 }
 0x30b   : > { %v3730_v58 = vmax.f32 %v3698_v30, 0.0  ;;  %9381 = vmatmul.mubr.msk.f32.gmra.mrb[12].mxu1 %vm292_vm1, %v11464_v57 }
 0x30c   : > { %v3729_v59 = vmax.f32 %v3697_v56, 0.0  ;;  %v9341_v60 = vpop.f32.mrb[18].mxu0  ;;  %v11476_v1 = vld [vmem:[#allocation2 + $0xb1] sm:$0xff] }
 0x30d   : > { %3818 = vst.msk [vmem:[#allocation2 + $0xe1] sm:$0xff] %vm292_vm1, %v3730_v58  ;;  %v3700_v61 = vadd.f32 %v9341_v60, %v11384_v55  ;;  %v3573_v62 = vpop.f32.mrb[19].mxu0  ;;  %v11470_v63 = vld [vmem:[#allocation2 + $0xa9] sm:$0xff] }
 0x30e   : > { %3817 = vst.msk [vmem:[#allocation2 + $0xd9] sm:$0xff] %vm292_vm1, %v3729_v59  ;;  %v3699_v0 = vadd.f32 %v11384_v55, %v3573_v62  ;;  %9383 = vmatprep.mubr.msk.f32.mxu1 %vm292_vm1, %v11470_v63 }
 0x30f   : > { %v3732_v2 = vmax.f32 %v3700_v61, 0.0  ;;  %9384 = vmatmul.mubr.msk.f32.gmra.mrb[14].mxu1 %vm292_vm1, %v11476_v1 }
 0x310   : > { %v3731_v3 = vmax.f32 %v3699_v0, 0.0  ;;  %v9344_v36 = vpop.f32.mrb[20].mxu0  ;;  %v11488_v37 = vld [vmem:[#allocation2 + $0xc9] sm:$0xff] }
 0x311   : > { %3820 = vst.msk [vmem:[#allocation2 + $0xf9] sm:$0xff] %vm292_vm1, %v3732_v2  ;;  %v3702_v5 = vadd.f32 %v9344_v36, %v11384_v55  ;;  %v3583_v38 = vpop.f32.mrb[21].mxu0  ;;  %v11482_v35 = vld [vmem:[#allocation2 + $0xc1] sm:$0xff] }
 0x312   : > { %3819 = vst.msk [vmem:[#allocation2 + $0xf1] sm:$0xff] %vm292_vm1, %v3731_v3  ;;  %v3701_v34 = vadd.f32 %v11384_v55, %v3583_v38  ;;  %9386 = vmatprep.mubr.msk.f32.mxu1 %vm292_vm1, %v11482_v35  ;;  %v3833_v38 = vld [vmem:[#allocation2] sm:$0xff] }
 0x313   : > { %v3734_v6 = vmax.f32 %v3702_v5, 0.0  ;;  %9387 = vmatmul.mubr.msk.f32.gmra.mrb[16].mxu1 %vm292_vm1, %v11488_v37 }
 0x314   : > { %v3733_v33 = vmax.f32 %v3701_v34, 0.0  ;;  %v9347_v31 = vpop.f32.mrb[22].mxu0  ;;  %v11500_v9 = vld [vmem:[#allocation2 + $0xe1] sm:$0xff] }
 0x315   : > { %3822 = vst.msk [vmem:[#allocation2 + $0x111] sm:$0xff] %vm292_vm1, %v3734_v6  ;;  %v3704_v39 = vadd.f32 %v9347_v31, %v11384_v55  ;;  %v3593_v41 = vpop.f32.mrb[23].mxu0  ;;  %v11494_v7 = vld [vmem:[#allocation2 + $0xd9] sm:$0xff]  ;;  %v3834_v6 = vld [vmem:[#allocation2 + $0x8] sm:$0xff] }
 0x316   : > { %3821 = vst.msk [vmem:[#allocation2 + $0x109] sm:$0xff] %vm292_vm1, %v3733_v33  ;;  %v3703_v8 = vadd.f32 %v11384_v55, %v3593_v41  ;;  %9389 = vmatprep.mubr.msk.f32.mxu1 %vm292_vm1, %v11494_v7  ;;  %v11574_v33 = vld [vmem:[%s12379_s3 + $0xc] sm:$0xf]  ;;  %v11577_v31 = vld [vmem:[#allocation2 + $0x18] sm:$0xff]  ;;  %v11589_v41 = vld [vmem:[#allocation2 + $0x30] sm:$0xff] }
 0x317   : > { %v3736_v10 = vmax.f32 %v3704_v39, 0.0  ;;  %9390 = vmatmul.mubr.msk.f32.gmra.mrb[18].mxu1 %vm292_vm1, %v11500_v9  ;;  %v11585_v39 = vld [vmem:[#allocation2 + $0x20] sm:$0xff] }
 0x318   : > { %v3735_v12 = vmax.f32 %v3703_v8, 0.0  ;;  %v9350_v14 = vpop.f32.mrb[24].mxu0  ;;  %v11512_v20 = vld [vmem:[#allocation2 + $0xf9] sm:$0xff] }
 0x319   : > { %3824 = vst.msk [vmem:[#allocation2 + $0x129] sm:$0xff] %vm292_vm1, %v3736_v10  ;;  %v3706_v15 = vadd.f32 %v9350_v14, %v11384_v55  ;;  %v3603_v16 = vpop.f32.mrb[25].mxu0  ;;  %v11506_v17 = vld [vmem:[#allocation2 + $0xf1] sm:$0xff]  ;;  %v11609_v14 = vld [vmem:[#allocation2 + $0x68] sm:$0xff] }
 0x31a   : > { %3823 = vst.msk [vmem:[#allocation2 + $0x121] sm:$0xff] %vm292_vm1, %v3735_v12  ;;  %v3705_v18 = vadd.f32 %v11384_v55, %v3603_v16  ;;  %9392 = vmatprep.mubr.msk.f32.mxu1 %vm292_vm1, %v11506_v17  ;;  %v11593_v8 = vld [vmem:[#allocation2 + $0x38] sm:$0xff]  ;;  %v11601_v10 = vld [vmem:[#allocation2 + $0x50] sm:$0xff]  ;;  %v11605_v12 = vld [vmem:[#allocation2 + $0x60] sm:$0xff] }
 0x31b   : > { %v3738_v22 = vmax.f32 %v3706_v15, 0.0  ;;  %9393 = vmatmul.mubr.msk.f32.gmra.mrb[20].mxu1 %vm292_vm1, %v11512_v20  ;;  %v11613_v15 = vld [vmem:[#allocation2 + $0x78] sm:$0xff]  ;;  %v11617_v16 = vld [vmem:[#allocation2 + $0x80] sm:$0xff] }
 0x31c   : > { %v3737_v23 = vmax.f32 %v3705_v18, 0.0  ;;  %v9353_v24 = vpop.f32.mrb[26].mxu0  ;;  %v11524_v46 = vld [vmem:[#allocation2 + $0x111] sm:$0xff] }
 0x31d   : > { %3826 = vst.msk [vmem:[#allocation2 + $0x141] sm:$0xff] %vm292_vm1, %v3738_v22  ;;  %v3708_v25 = vadd.f32 %v9353_v24, %v11384_v55  ;;  %v3613_v26 = vpop.f32.mrb[27].mxu0  ;;  %v11518_v43 = vld [vmem:[#allocation2 + $0x109] sm:$0xff]  ;;  %v11625_v22 = vld [vmem:[#allocation2 + $0x98] sm:$0xff] }
 0x31e   : > { %3825 = vst.msk [vmem:[#allocation2 + $0x139] sm:$0xff] %vm292_vm1, %v3737_v23  ;;  %v3707_v45 = vadd.f32 %v11384_v55, %v3613_v26  ;;  %9395 = vmatprep.mubr.msk.f32.mxu1 %vm292_vm1, %v11518_v43  ;;  %v11621_v18 = vld [vmem:[#allocation2 + $0x90] sm:$0xff]  ;;  %v11629_v23 = vld [vmem:[#allocation2 + $0xa8] sm:$0xff] }
 0x31f   : > { %v3740_v47 = vmax.f32 %v3708_v25, 0.0  ;;  %9396 = vmatmul.mubr.msk.f32.gmra.mrb[22].mxu1 %vm292_vm1, %v11524_v46  ;;  %v11633_v24 = vld [vmem:[#allocation2 + $0xb0] sm:$0xff]  ;;  %v11637_v25 = vld [vmem:[#allocation2 + $0xc0] sm:$0xff]  ;;  %v11641_v26 = vld [vmem:[#allocation2 + $0xc8] sm:$0xff] }
 0x320   : > { %v3739_v48 = vmax.f32 %v3707_v45, 0.0  ;;  %v9356_v49 = vpop.f32.mrb[28].mxu0  ;;  %v11536_v30 = vld [vmem:[#allocation2 + $0x129] sm:$0xff]  ;;  %v11645_v45 = vld [vmem:[#allocation2 + $0xd8] sm:$0xff] }
 0x321   : > { %3828 = vst.msk [vmem:[#allocation2 + $0x159] sm:$0xff] %vm292_vm1, %v3740_v47  ;;  %v3710_v29 = vadd.f32 %v9356_v49, %v11384_v55  ;;  %v3623_v50 = vpop.f32.mrb[29].mxu0  ;;  %v11530_v51 = vld [vmem:[#allocation2 + $0x121] sm:$0xff]  ;;  %v11657_v49 = vld [vmem:[#allocation2 + $0xf8] sm:$0xff] }
 0x322   : > { %3827 = vst.msk [vmem:[#allocation2 + $0x151] sm:$0xff] %vm292_vm1, %v3739_v48  ;;  %v3709_v27 = vadd.f32 %v11384_v55, %v3623_v50  ;;  %9398 = vmatprep.mubr.msk.f32.mxu1 %vm292_vm1, %v11530_v51  ;;  %v11649_v47 = vld [vmem:[#allocation2 + $0xe0] sm:$0xff]  ;;  %v11653_v48 = vld [vmem:[#allocation2 + $0xf0] sm:$0xff] }
 0x323   : > { %v3742_v52 = vmax.f32 %v3710_v29, 0.0  ;;  %9399 = vmatmul.mubr.msk.f32.gmra.mrb[24].mxu1 %vm292_vm1, %v11536_v30  ;;  %v11661_v29 = vld [vmem:[#allocation2 + $0x108] sm:$0xff]  ;;  %v11665_v50 = vld [vmem:[#allocation2 + $0x110] sm:$0xff] }
 0x324   : > { %v3741_v56 = vmax.f32 %v3709_v27, 0.0  ;;  %v9359_v58 = vpop.f32.mrb[30].mxu0  ;;  %v11548_v0 = vld [vmem:[#allocation2 + $0x141] sm:$0xff] }
 0x325   : > { %3830 = vst.msk [vmem:[#allocation2 + $0x171] sm:$0xff] %vm292_vm1, %v3742_v52  ;;  %v3712_v59 = vadd.f32 %v9359_v58, %v11384_v55  ;;  %v3633_v60 = vpop.f32.mrb[31].mxu0  ;;  %v11542_v61 = vld [vmem:[#allocation2 + $0x139] sm:$0xff]  ;;  %v11673_v52 = vld [vmem:[#allocation2 + $0x128] sm:$0xff] }
 0x326   : > { %3829 = vst.msk [vmem:[#allocation2 + $0x169] sm:$0xff] %vm292_vm1, %v3741_v56  ;;  %v3711_v62 = vadd.f32 %v11384_v55, %v3633_v60  ;;  %9401 = vmatprep.mubr.msk.f32.mxu1 %vm292_vm1, %v11542_v61  ;;  %v11669_v27 = vld [vmem:[#allocation2 + $0x120] sm:$0xff]  ;;  %v11677_v56 = vld [vmem:[#allocation2 + $0x138] sm:$0xff] }
 0x327   : > { %v3744_v2 = vmax.f32 %v3712_v59, 0.0  ;;  %9402 = vmatmul.mubr.msk.f32.gmra.mrb[26].mxu1 %vm292_vm1, %v11548_v0  ;;  %v11681_v58 = vld [vmem:[#allocation2 + $0x140] sm:$0xff] }
 0x328   : > { %v3743_v3 = vmax.f32 %v3711_v62, 0.0  ;;  %v11558_v55 = vld [vmem:[#allocation2 + $0x159] sm:$0xff] }
 0x329   : > { %3832 = vst.msk [vmem:[#allocation2 + $0x189] sm:$0xff] %vm292_vm1, %v3744_v2  ;;  %v11553_v36 = vld [vmem:[#allocation2 + $0x151] sm:$0xff]  ;;  %v4548_v2 = vld [vmem:[#allocation2 + $0x2] sm:$0xff] }
 0x32a   : > { %3831 = vst.msk [vmem:[#allocation2 + $0x181] sm:$0xff] %vm292_vm1, %v3743_v3  ;;  %9404 = vmatprep.mubr.msk.f32.mxu1 %vm292_vm1, %v11553_v36  ;;  %v11685_v59 = vld [vmem:[#allocation2 + $0x150] sm:$0xff]  ;;  %v11689_v60 = vld [vmem:[#allocation2 + $0x158] sm:$0xff] }
 0x32b   : > { %9405 = vmatmul.mubr.msk.f32.gmra.mrb[28].mxu1 %vm292_vm1, %v11558_v55 }
 0x32c   : > { %v11566_v34 = vld [vmem:[#allocation2 + $0x171] sm:$0xff] }
 0x32d   : > { %v11562_v5 = vld [vmem:[#allocation2 + $0x169] sm:$0xff]  ;;  %12592 = vst [vmem:[#allocation12_spill] sm:$0xff] %v11566_v34 }
 0x32e   : > { %12591 = vst [vmem:[#allocation11_spill] sm:$0xff] %v11562_v5  ;;  %9407 = vmatprep.mubr.msk.f32.mxu1 %vm292_vm1, %v11562_v5  ;;  %v11693_v62 = vld [vmem:[#allocation2 + $0x168] sm:$0xff]  ;;  %v11697_v3 = vld [vmem:[#allocation2 + $0x170] sm:$0xff] }
 0x32f   : > { %9408 = vmatmul.mubr.msk.f32.gmra.mrb[30].mxu1 %vm292_vm1, %v11566_v34  ;;  %v11708_v34 = vld [vmem:[#allocation2 + $0x1a] sm:$0xff]  ;;  %v11720_v5 = vld [vmem:[#allocation2 + $0x32] sm:$0xff] }
 0x330   : > { %9412 = vmatprep.mubr.msk.f32.mxu1 %vm292_vm1, %v3833_v38  ;;  %v4549_v38 = vld [vmem:[#allocation2 + $0xa] sm:$0xff]  ;;  %12593 = vst [vmem:[#allocation18_spill] sm:$0xff] %v11708_v34  ;;  %12595 = vst [vmem:[#allocation30_spill] sm:$0xff] %v11720_v5 }
 0x333   : > { %9413 = vmatmul.mubr.msk.f32.vlgmr.msra.gmra.mrb[0].mxu1 %vm292_vm1, %v3834_v6  ;;  %v11705_v6 = vld [vmem:[%s12379_s3 + $0x10] sm:$0xf] }
 0x334   : > { %9461 = vmatpush3.msk.msra.mxu1 %vm389_vm0, %v11377_v54  ;;  %9415 = vmatprep.mubr.msk.f32.mxu1 %vm292_vm1, %v11577_v31  ;;  %v11597_v54 = vld [vmem:[#allocation2 + $0x48] sm:$0xff] }
 0x335   : > { %9510 = vmatprep.subr.msk.mxu1 %vm389_vm0, %v11574_v33 }
 0x337   : > { %9416 = vmatmul.mubr.msk.f32.gmra.mrb[2].mxu1 %vm292_vm1, %v11585_v39 }
 0x338   : > { %9418 = vmatprep.mubr.msk.f32.mxu1 %vm292_vm1, %v11589_v41 }
 0x33b   : > { %9419 = vmatmul.mubr.msk.f32.gmra.mrb[4].mxu1 %vm292_vm1, %v11593_v8 }
 0x33c   : > { %9421 = vmatprep.mubr.msk.f32.mxu1 %vm292_vm1, %v11597_v54 }
 0x33f   : > { %9422 = vmatmul.mubr.msk.f32.gmra.mrb[6].mxu1 %vm292_vm1, %v11601_v10 }
 0x340   : > { %9424 = vmatprep.mubr.msk.f32.mxu1 %vm292_vm1, %v11605_v12 }
 0x343   : > { %9425 = vmatmul.mubr.msk.f32.gmra.mrb[8].mxu1 %vm292_vm1, %v11609_v14 }
 0x344   : > { %9427 = vmatprep.mubr.msk.f32.mxu1 %vm292_vm1, %v11613_v15 }
 0x347   : > { %9428 = vmatmul.mubr.msk.f32.gmra.mrb[10].mxu1 %vm292_vm1, %v11617_v16 }
 0x348   : > { %9430 = vmatprep.mubr.msk.f32.mxu1 %vm292_vm1, %v11621_v18 }
 0x34b   : > { %9431 = vmatmul.mubr.msk.f32.gmra.mrb[12].mxu1 %vm292_vm1, %v11625_v22 }
 0x34c   : > { %9433 = vmatprep.mubr.msk.f32.mxu1 %vm292_vm1, %v11629_v23 }
 0x34f   : > { %9434 = vmatmul.mubr.msk.f32.gmra.mrb[14].mxu1 %vm292_vm1, %v11633_v24 }
 0x350   : > { %9436 = vmatprep.mubr.msk.f32.mxu1 %vm292_vm1, %v11637_v25 }
 0x353   : > { %9437 = vmatmul.mubr.msk.f32.gmra.mrb[16].mxu1 %vm292_vm1, %v11641_v26 }
 0x354   : > { %9439 = vmatprep.mubr.msk.f32.mxu1 %vm292_vm1, %v11645_v45 }
 0x357   : > { %9440 = vmatmul.mubr.msk.f32.gmra.mrb[18].mxu1 %vm292_vm1, %v11649_v47 }
 0x358   : > { %9442 = vmatprep.mubr.msk.f32.mxu1 %vm292_vm1, %v11653_v48 }
 0x35b   : > { %9443 = vmatmul.mubr.msk.f32.gmra.mrb[20].mxu1 %vm292_vm1, %v11657_v49 }
 0x35c   : > { %9445 = vmatprep.mubr.msk.f32.mxu1 %vm292_vm1, %v11661_v29 }
 0x35f   : > { %9446 = vmatmul.mubr.msk.f32.gmra.mrb[22].mxu1 %vm292_vm1, %v11665_v50 }
 0x360   : > { %9448 = vmatprep.mubr.msk.f32.mxu1 %vm292_vm1, %v11669_v27 }
 0x363   : > { %9449 = vmatmul.mubr.msk.f32.gmra.mrb[24].mxu1 %vm292_vm1, %v11673_v52 }
 0x364   : > { %9451 = vmatprep.mubr.msk.f32.mxu1 %vm292_vm1, %v11677_v56 }
 0x367   : > { %9452 = vmatmul.mubr.msk.f32.gmra.mrb[26].mxu1 %vm292_vm1, %v11681_v58 }
 0x368   : > { %9454 = vmatprep.mubr.msk.f32.mxu1 %vm292_vm1, %v11685_v59 }
 0x36b   : > { %9455 = vmatmul.mubr.msk.f32.gmra.mrb[28].mxu1 %vm292_vm1, %v11689_v60 }
 0x36c   : > { %9457 = vmatprep.mubr.msk.f32.mxu1 %vm292_vm1, %v11693_v62 }
 0x36f   : > { %9458 = vmatmul.mubr.msk.f32.gmra.mrb[30].mxu1 %vm292_vm1, %v11697_v3 }
 0x370   : > { %9462 = vmatprep.mubr.msk.f32.mxu1 %vm292_vm1, %v4548_v2  ;;  %v11716_v2 = vld [vmem:[#allocation2 + $0x22] sm:$0xff] }
 0x371   : > { %12594 = vst [vmem:[#allocation28_spill] sm:$0xff] %v11716_v2 }
 0x373   : > { %9463 = vmatmul.mubr.msk.f32.vlgmr.msra.gmra.mrb[0].mxu1 %vm292_vm1, %v4549_v38  ;;  %v11724_v38 = vld [vmem:[#allocation2 + $0x3a] sm:$0xff] }
 0x374   : > { %9511 = vmatpush3.msk.msra.mxu1 %vm389_vm0, %v11574_v33  ;;  %9465 = vmatprep.mubr.msk.f32.mxu1 %vm292_vm1, %v11708_v34  ;;  %12596 = vst [vmem:[#allocation31_spill] sm:$0xff] %v11724_v38  ;;  %v11728_v33 = vld [vmem:[#allocation2 + $0x4a] sm:$0xff]  ;;  %v11732_v34 = vld [vmem:[#allocation2 + $0x52] sm:$0xff] }
 0x375   : > { %9560 = vmatprep.subr.msk.mxu1 %vm389_vm0, %v11705_v6  ;;  %12597 = vst [vmem:[#allocation33_spill] sm:$0xff] %v11728_v33  ;;  %12598 = vst [vmem:[#allocation35_spill] sm:$0xff] %v11732_v34 }
 0x377   : > { %9466 = vmatmul.mubr.msk.f32.gmra.mrb[2].mxu1 %vm292_vm1, %v11716_v2  ;;  %v11736_v2 = vld [vmem:[#allocation2 + $0x62] sm:$0xff] }
 0x378   : > { %9468 = vmatprep.mubr.msk.f32.mxu1 %vm292_vm1, %v11720_v5  ;;  %12599 = vst [vmem:[#allocation3_spill] sm:$0xff] %v11736_v2  ;;  %v11740_v5 = vld [vmem:[#allocation2 + $0x6a] sm:$0xff] }
 0x379   : > { %12600 = vst [vmem:[#allocation4_spill] sm:$0xff] %v11740_v5 }
 0x37b   : > { %9469 = vmatmul.mubr.msk.f32.gmra.mrb[4].mxu1 %vm292_vm1, %v11724_v38  ;;  %v11744_v38 = vld [vmem:[#allocation2 + $0x7a] sm:$0xff] }
 0x37c   : > { %9471 = vmatprep.mubr.msk.f32.mxu1 %vm292_vm1, %v11728_v33  ;;  %12601 = vst [vmem:[#allocation5_spill] sm:$0xff] %v11744_v38  ;;  %v11748_v33 = vld [vmem:[#allocation2 + $0x82] sm:$0xff] }
 0x37d   : > { %12602 = vst [vmem:[#allocation6_spill] sm:$0xff] %v11748_v33 }
 0x37f   : > { %9472 = vmatmul.mubr.msk.f32.gmra.mrb[6].mxu1 %vm292_vm1, %v11732_v34  ;;  %v11752_v34 = vld [vmem:[#allocation2 + $0x92] sm:$0xff] }
 0x380   : > { %9474 = vmatprep.mubr.msk.f32.mxu1 %vm292_vm1, %v11736_v2  ;;  %12603 = vst [vmem:[#allocation7_spill] sm:$0xff] %v11752_v34  ;;  %v11756_v2 = vld [vmem:[#allocation2 + $0x9a] sm:$0xff] }
 0x381   : > { %12604 = vst [vmem:[#allocation8_spill] sm:$0xff] %v11756_v2 }
 0x383   : > { %9475 = vmatmul.mubr.msk.f32.gmra.mrb[8].mxu1 %vm292_vm1, %v11740_v5  ;;  %v11760_v5 = vld [vmem:[#allocation2 + $0xaa] sm:$0xff] }
 0x384   : > { %9477 = vmatprep.mubr.msk.f32.mxu1 %vm292_vm1, %v11744_v38  ;;  %12605 = vst [vmem:[#allocation9_spill] sm:$0xff] %v11760_v5  ;;  %v11764_v38 = vld [vmem:[#allocation2 + $0xb2] sm:$0xff] }
 0x385   : > { %12606 = vst [vmem:[#allocation10_spill] sm:$0xff] %v11764_v38 }
 0x387   : > { %9478 = vmatmul.mubr.msk.f32.gmra.mrb[10].mxu1 %vm292_vm1, %v11748_v33  ;;  %v11768_v33 = vld [vmem:[#allocation2 + $0xc2] sm:$0xff] }
 0x388   : > { %9480 = vmatprep.mubr.msk.f32.mxu1 %vm292_vm1, %v11752_v34  ;;  %12607 = vst [vmem:[#allocation37_spill] sm:$0xff] %v11768_v33  ;;  %v11772_v34 = vld [vmem:[#allocation2 + $0xca] sm:$0xff] }
 0x389   : > { %12608 = vst [vmem:[#allocation38_spill] sm:$0xff] %v11772_v34 }
 0x38b   : > { %9481 = vmatmul.mubr.msk.f32.gmra.mrb[12].mxu1 %vm292_vm1, %v11756_v2  ;;  %v11776_v2 = vld [vmem:[#allocation2 + $0xda] sm:$0xff] }
 0x38c   : > { %9483 = vmatprep.mubr.msk.f32.mxu1 %vm292_vm1, %v11760_v5  ;;  %12609 = vst [vmem:[#allocation13_spill] sm:$0xff] %v11776_v2  ;;  %v11780_v5 = vld [vmem:[#allocation2 + $0xe2] sm:$0xff] }
 0x38d   : > { %12610 = vst [vmem:[#allocation14_spill] sm:$0xff] %v11780_v5 }
 0x38f   : > { %9484 = vmatmul.mubr.msk.f32.gmra.mrb[14].mxu1 %vm292_vm1, %v11764_v38  ;;  %v11784_v38 = vld [vmem:[#allocation2 + $0xf2] sm:$0xff] }
 0x390   : > { %9486 = vmatprep.mubr.msk.f32.mxu1 %vm292_vm1, %v11768_v33  ;;  %12611 = vst [vmem:[#allocation15_spill] sm:$0xff] %v11784_v38  ;;  %v11788_v33 = vld [vmem:[#allocation2 + $0xfa] sm:$0xff] }
 0x391   : > { %12612 = vst [vmem:[#allocation16_spill] sm:$0xff] %v11788_v33 }
 0x393   : > { %9487 = vmatmul.mubr.msk.f32.gmra.mrb[16].mxu1 %vm292_vm1, %v11772_v34  ;;  %v11792_v34 = vld [vmem:[#allocation2 + $0x10a] sm:$0xff] }
 0x394   : > { %9489 = vmatprep.mubr.msk.f32.mxu1 %vm292_vm1, %v11776_v2  ;;  %12613 = vst [vmem:[#allocation17_spill] sm:$0xff] %v11792_v34  ;;  %v11796_v2 = vld [vmem:[#allocation2 + $0x112] sm:$0xff] }
 0x395   : > { %12614 = vst [vmem:[#allocation19_spill] sm:$0xff] %v11796_v2 }
 0x397   : > { %9490 = vmatmul.mubr.msk.f32.gmra.mrb[18].mxu1 %vm292_vm1, %v11780_v5  ;;  %v11800_v5 = vld [vmem:[#allocation2 + $0x122] sm:$0xff] }
 0x398   : > { %9492 = vmatprep.mubr.msk.f32.mxu1 %vm292_vm1, %v11784_v38  ;;  %12615 = vst [vmem:[#allocation20_spill] sm:$0xff] %v11800_v5  ;;  %v11804_v38 = vld [vmem:[#allocation2 + $0x12a] sm:$0xff] }
 0x399   : > { %12616 = vst [vmem:[#allocation21_spill] sm:$0xff] %v11804_v38 }
 0x39b   : > { %9493 = vmatmul.mubr.msk.f32.gmra.mrb[20].mxu1 %vm292_vm1, %v11788_v33  ;;  %v11808_v33 = vld [vmem:[#allocation2 + $0x13a] sm:$0xff] }
 0x39c   : > { %9495 = vmatprep.mubr.msk.f32.mxu1 %vm292_vm1, %v11792_v34  ;;  %12617 = vst [vmem:[#allocation22_spill] sm:$0xff] %v11808_v33  ;;  %v11812_v34 = vld [vmem:[#allocation2 + $0x142] sm:$0xff] }
 0x39f   : > { %9496 = vmatmul.mubr.msk.f32.gmra.mrb[22].mxu1 %vm292_vm1, %v11796_v2  ;;  %v11816_v2 = vld [vmem:[#allocation2 + $0x152] sm:$0xff] }
 0x3a0   : > { %9498 = vmatprep.mubr.msk.f32.mxu1 %vm292_vm1, %v11800_v5  ;;  %12618 = vst [vmem:[#allocation23_spill] sm:$0xff] %v11816_v2  ;;  %v11820_v5 = vld [vmem:[#allocation2 + $0x15a] sm:$0xff] }
 0x3a3   : > { %9499 = vmatmul.mubr.msk.f32.gmra.mrb[24].mxu1 %vm292_vm1, %v11804_v38  ;;  %v11824_v38 = vld [vmem:[#allocation2 + $0x16a] sm:$0xff] }
 0x3a4   : > { %9501 = vmatprep.mubr.msk.f32.mxu1 %vm292_vm1, %v11808_v33  ;;  %12619 = vst [vmem:[#allocation24_spill] sm:$0xff] %v11824_v38  ;;  %v11828_v33 = vld [vmem:[#allocation2 + $0x172] sm:$0xff] }
 0x3a7   : > { %9502 = vmatmul.mubr.msk.f32.gmra.mrb[26].mxu1 %vm292_vm1, %v11812_v34 }
 0x3a8   : > { %9504 = vmatprep.mubr.msk.f32.mxu1 %vm292_vm1, %v11816_v2  ;;  %v8144_v2 = vld [vmem:[%s12379_s3 + $0x14] sm:$0xf] }
 0x3ab   : > { %9505 = vmatmul.mubr.msk.f32.gmra.mrb[28].mxu1 %vm292_vm1, %v11820_v5 }
 0x3ac   : > { %9507 = vmatprep.mubr.msk.f32.mxu1 %vm292_vm1, %v11824_v38 }
 0x3af   : > { %9508 = vmatmul.mubr.msk.f32.gmra.mrb[30].mxu1 %vm292_vm1, %v11828_v33 }
 0x3b0   : > { %9512 = vmatprep.mubr.msk.f32.mxu1 %vm292_vm1, %v11577_v31  ;;  %v11898_v31 = vld [vmem:[#allocation2 + $0x180] sm:$0xff] }
 0x3b3   : > { %9513 = vmatmul.mubr.msk.f32.vlgmr.msra.gmra.mrb[0].mxu1 %vm292_vm1, %v11585_v39  ;;  %v11902_v39 = vld [vmem:[#allocation2 + $0x188] sm:$0xff] }
 0x3b4   : > { %9561 = vmatpush3.msk.msra.mxu1 %vm389_vm0, %v11705_v6  ;;  %9515 = vmatprep.mubr.msk.f32.mxu1 %vm292_vm1, %v11589_v41  ;;  %v8178_v6 = vld [vmem:[%s12379_s3 + $0x18] sm:$0xf] }
 0x3b5   : > { %9610 = vmatprep.subr.msk.mxu1 %vm389_vm0, %v8144_v2 }
 0x3b7   : > { %9516 = vmatmul.mubr.msk.f32.gmra.mrb[2].mxu1 %vm292_vm1, %v11593_v8 }
 0x3b8   : > { %9518 = vmatprep.mubr.msk.f32.mxu1 %vm292_vm1, %v11597_v54 }
 0x3bb   : > { %9519 = vmatmul.mubr.msk.f32.gmra.mrb[4].mxu1 %vm292_vm1, %v11601_v10 }
 0x3bc   : > { %9521 = vmatprep.mubr.msk.f32.mxu1 %vm292_vm1, %v11605_v12 }
 0x3bf   : > { %9522 = vmatmul.mubr.msk.f32.gmra.mrb[6].mxu1 %vm292_vm1, %v11609_v14 }
 0x3c0   : > { %9524 = vmatprep.mubr.msk.f32.mxu1 %vm292_vm1, %v11613_v15 }
 0x3c3   : > { %9525 = vmatmul.mubr.msk.f32.gmra.mrb[8].mxu1 %vm292_vm1, %v11617_v16 }
 0x3c4   : > { %9527 = vmatprep.mubr.msk.f32.mxu1 %vm292_vm1, %v11621_v18 }
 0x3c7   : > { %9528 = vmatmul.mubr.msk.f32.gmra.mrb[10].mxu1 %vm292_vm1, %v11625_v22 }
 0x3c8   : > { %9530 = vmatprep.mubr.msk.f32.mxu1 %vm292_vm1, %v11629_v23 }
 0x3cb   : > { %9531 = vmatmul.mubr.msk.f32.gmra.mrb[12].mxu1 %vm292_vm1, %v11633_v24 }
 0x3cc   : > { %9533 = vmatprep.mubr.msk.f32.mxu1 %vm292_vm1, %v11637_v25 }
 0x3cf   : > { %9534 = vmatmul.mubr.msk.f32.gmra.mrb[14].mxu1 %vm292_vm1, %v11641_v26 }
 0x3d0   : > { %9536 = vmatprep.mubr.msk.f32.mxu1 %vm292_vm1, %v11645_v45 }
 0x3d3   : > { %9537 = vmatmul.mubr.msk.f32.gmra.mrb[16].mxu1 %vm292_vm1, %v11649_v47 }
 0x3d4   : > { %9539 = vmatprep.mubr.msk.f32.mxu1 %vm292_vm1, %v11653_v48 }
 0x3d7   : > { %9540 = vmatmul.mubr.msk.f32.gmra.mrb[18].mxu1 %vm292_vm1, %v11657_v49 }
 0x3d8   : > { %9542 = vmatprep.mubr.msk.f32.mxu1 %vm292_vm1, %v11661_v29 }
 0x3db   : > { %9543 = vmatmul.mubr.msk.f32.gmra.mrb[20].mxu1 %vm292_vm1, %v11665_v50 }
 0x3dc   : > { %9545 = vmatprep.mubr.msk.f32.mxu1 %vm292_vm1, %v11669_v27 }
 0x3df   : > { %9546 = vmatmul.mubr.msk.f32.gmra.mrb[22].mxu1 %vm292_vm1, %v11673_v52 }
 0x3e0   : > { %9548 = vmatprep.mubr.msk.f32.mxu1 %vm292_vm1, %v11677_v56 }
 0x3e3   : > { %9549 = vmatmul.mubr.msk.f32.gmra.mrb[24].mxu1 %vm292_vm1, %v11681_v58 }
 0x3e4   : > { %9551 = vmatprep.mubr.msk.f32.mxu1 %vm292_vm1, %v11685_v59 }
 0x3e7   : > { %9552 = vmatmul.mubr.msk.f32.gmra.mrb[26].mxu1 %vm292_vm1, %v11689_v60 }
 0x3e8   : > { %9554 = vmatprep.mubr.msk.f32.mxu1 %vm292_vm1, %v11693_v62 }
 0x3eb   : > { %9555 = vmatmul.mubr.msk.f32.gmra.mrb[28].mxu1 %vm292_vm1, %v11697_v3 }
 0x3ec   : > { %9557 = vmatprep.mubr.msk.f32.mxu1 %vm292_vm1, %v11898_v31 }
 0x3ef   : > { %9558 = vmatmul.mubr.msk.f32.gmra.mrb[30].mxu1 %vm292_vm1, %v11902_v39 }
 0x3f0   : > { %9562 = vmatprep.mubr.msk.f32.mxu1 %vm292_vm1, %v11398_v4  ;;  %v12620_v4 = vld [vmem:[#allocation11_spill] sm:$0xff] }
 0x3f3   : > { %9563 = vmatmul.mubr.msk.f32.vlgmr.msra.gmra.mrb[0].mxu1 %vm292_vm1, %v11404_v40  ;;  %v12621_v40 = vld [vmem:[#allocation12_spill] sm:$0xff] }
 0x3f4   : > { %9611 = vmatpush3.msk.msra.mxu1 %vm389_vm0, %v8144_v2  ;;  %9565 = vmatprep.mubr.msk.f32.mxu1 %vm292_vm1, %v11410_v11  ;;  %v11971_v11 = vld [vmem:[#allocation2 + $0x181] sm:$0xff]  ;;  %v12629_v2 = vld [vmem:[#allocation4_spill] sm:$0xff] }
 0x3f5   : > { %9660 = vmatprep.subr.msk.mxu1 %vm389_vm0, %v8178_v6 }
 0x3f7   : > { %9566 = vmatmul.mubr.msk.f32.gmra.mrb[2].mxu1 %vm292_vm1, %v11416_v13  ;;  %v11975_v13 = vld [vmem:[#allocation2 + $0x189] sm:$0xff] }
 0x3f8   : > { %9568 = vmatprep.mubr.msk.f32.mxu1 %vm292_vm1, %v11422_v19  ;;  %v12622_v19 = vld [vmem:[#allocation18_spill] sm:$0xff] }
 0x3fb   : > { %9569 = vmatmul.mubr.msk.f32.gmra.mrb[4].mxu1 %vm292_vm1, %v11428_v21  ;;  %v8212_v21 = vld [vmem:[%s12379_s3 + $0x1c] sm:$0xf] }
 0x3fc   : > { %9571 = vmatprep.mubr.msk.f32.mxu1 %vm292_vm1, %v11434_v42  ;;  %v12623_v42 = vld [vmem:[#allocation28_spill] sm:$0xff] }
 0x3ff   : > { %9572 = vmatmul.mubr.msk.f32.gmra.mrb[6].mxu1 %vm292_vm1, %v11440_v44  ;;  %v12624_v44 = vld [vmem:[#allocation30_spill] sm:$0xff] }
 0x400   : > { %9574 = vmatprep.mubr.msk.f32.mxu1 %vm292_vm1, %v11446_v28  ;;  %v12625_v28 = vld [vmem:[#allocation31_spill] sm:$0xff] }
 0x403   : > { %9575 = vmatmul.mubr.msk.f32.gmra.mrb[8].mxu1 %vm292_vm1, %v11452_v32  ;;  %v12626_v32 = vld [vmem:[#allocation33_spill] sm:$0xff] }
 0x404   : > { %9577 = vmatprep.mubr.msk.f32.mxu1 %vm292_vm1, %v11458_v53  ;;  %v12627_v53 = vld [vmem:[#allocation35_spill] sm:$0xff] }
 0x407   : > { %9578 = vmatmul.mubr.msk.f32.gmra.mrb[10].mxu1 %vm292_vm1, %v11464_v57  ;;  %v12628_v57 = vld [vmem:[#allocation3_spill] sm:$0xff] }
 0x408   : > { %9580 = vmatprep.mubr.msk.f32.mxu1 %vm292_vm1, %v11470_v63 }
 0x40b   : > { %9581 = vmatmul.mubr.msk.f32.gmra.mrb[12].mxu1 %vm292_vm1, %v11476_v1 }
 0x40c   : > { %9583 = vmatprep.mubr.msk.f32.mxu1 %vm292_vm1, %v11482_v35 }
 0x40f   : > { %9584 = vmatmul.mubr.msk.f32.gmra.mrb[14].mxu1 %vm292_vm1, %v11488_v37 }
 0x410   : > { %9586 = vmatprep.mubr.msk.f32.mxu1 %vm292_vm1, %v11494_v7 }
 0x413   : > { %9587 = vmatmul.mubr.msk.f32.gmra.mrb[16].mxu1 %vm292_vm1, %v11500_v9 }
 0x414   : > { %9589 = vmatprep.mubr.msk.f32.mxu1 %vm292_vm1, %v11506_v17 }
 0x417   : > { %9590 = vmatmul.mubr.msk.f32.gmra.mrb[18].mxu1 %vm292_vm1, %v11512_v20 }
 0x418   : > { %9592 = vmatprep.mubr.msk.f32.mxu1 %vm292_vm1, %v11518_v43 }
 0x41b   : > { %9593 = vmatmul.mubr.msk.f32.gmra.mrb[20].mxu1 %vm292_vm1, %v11524_v46 }
 0x41c   : > { %9595 = vmatprep.mubr.msk.f32.mxu1 %vm292_vm1, %v11530_v51 }
 0x41f   : > { %9596 = vmatmul.mubr.msk.f32.gmra.mrb[22].mxu1 %vm292_vm1, %v11536_v30 }
 0x420   : > { %9598 = vmatprep.mubr.msk.f32.mxu1 %vm292_vm1, %v11542_v61 }
 0x423   : > { %9599 = vmatmul.mubr.msk.f32.gmra.mrb[24].mxu1 %vm292_vm1, %v11548_v0 }
 0x424   : > { %9601 = vmatprep.mubr.msk.f32.mxu1 %vm292_vm1, %v11553_v36 }
 0x427   : > { %9602 = vmatmul.mubr.msk.f32.gmra.mrb[26].mxu1 %vm292_vm1, %v11558_v55 }
 0x428   : > { %9604 = vmatprep.mubr.msk.f32.mxu1 %vm292_vm1, %v12620_v4 }
 0x42b   : > { %9605 = vmatmul.mubr.msk.f32.gmra.mrb[28].mxu1 %vm292_vm1, %v12621_v40 }
 0x42c   : > { %9607 = vmatprep.mubr.msk.f32.mxu1 %vm292_vm1, %v11971_v11 }
 0x42f   : > { %9608 = vmatmul.mubr.msk.f32.gmra.mrb[30].mxu1 %vm292_vm1, %v11975_v13 }
 0x430   : > { %9612 = vmatprep.mubr.msk.f32.mxu1 %vm292_vm1, %v12622_v19  ;;  %v12631_v19 = vld [vmem:[#allocation6_spill] sm:$0xff] }
 0x433   : > { %9613 = vmatmul.mubr.msk.f32.vlgmr.msra.gmra.mrb[0].mxu1 %vm292_vm1, %v12623_v42  ;;  %v12632_v42 = vld [vmem:[#allocation7_spill] sm:$0xff] }
 0x434   : > { %9661 = vmatpush3.msk.msra.mxu1 %vm389_vm0, %v8178_v6  ;;  %9615 = vmatprep.mubr.msk.f32.mxu1 %vm292_vm1, %v12624_v44  ;;  %v12630_v6 = vld [vmem:[#allocation5_spill] sm:$0xff] }
 0x435   : > { %9710 = vmatprep.subr.msk.mxu1 %vm389_vm0, %v8212_v21 }
 0x437   : > { %9616 = vmatmul.mubr.msk.f32.gmra.mrb[2].mxu1 %vm292_vm1, %v12625_v28  ;;  %v12633_v28 = vld [vmem:[#allocation8_spill] sm:$0xff] }
 0x438   : > { %9618 = vmatprep.mubr.msk.f32.mxu1 %vm292_vm1, %v12626_v32  ;;  %v12634_v32 = vld [vmem:[#allocation9_spill] sm:$0xff] }
 0x43b   : > { %9619 = vmatmul.mubr.msk.f32.gmra.mrb[4].mxu1 %vm292_vm1, %v12627_v53  ;;  %v12635_v53 = vld [vmem:[#allocation10_spill] sm:$0xff] }
 0x43c   : > { %9621 = vmatprep.mubr.msk.f32.mxu1 %vm292_vm1, %v12628_v57  ;;  %v12636_v57 = vld [vmem:[#allocation37_spill] sm:$0xff] }
 0x43f   : > { %9622 = vmatmul.mubr.msk.f32.gmra.mrb[6].mxu1 %vm292_vm1, %v12629_v2  ;;  %v12637_v2 = vld [vmem:[#allocation38_spill] sm:$0xff] }
 0x440   : > { %9624 = vmatprep.mubr.msk.f32.mxu1 %vm292_vm1, %v12630_v6  ;;  %v12638_v6 = vld [vmem:[#allocation13_spill] sm:$0xff] }
 0x443   : > { %9625 = vmatmul.mubr.msk.f32.gmra.mrb[8].mxu1 %vm292_vm1, %v12631_v19  ;;  %v12639_v19 = vld [vmem:[#allocation14_spill] sm:$0xff] }
 0x444   : > { %9627 = vmatprep.mubr.msk.f32.mxu1 %vm292_vm1, %v12632_v42  ;;  %v12640_v42 = vld [vmem:[#allocation15_spill] sm:$0xff] }
 0x447   : > { %9628 = vmatmul.mubr.msk.f32.gmra.mrb[10].mxu1 %vm292_vm1, %v12633_v28  ;;  %v12641_v28 = vld [vmem:[#allocation16_spill] sm:$0xff] }
 0x448   : > { %9630 = vmatprep.mubr.msk.f32.mxu1 %vm292_vm1, %v12634_v32  ;;  %v12642_v32 = vld [vmem:[#allocation17_spill] sm:$0xff] }
 0x44b   : > { %9631 = vmatmul.mubr.msk.f32.gmra.mrb[12].mxu1 %vm292_vm1, %v12635_v53  ;;  %v12643_v53 = vld [vmem:[#allocation19_spill] sm:$0xff] }
 0x44c   : > { %9633 = vmatprep.mubr.msk.f32.mxu1 %vm292_vm1, %v12636_v57  ;;  %v12644_v57 = vld [vmem:[#allocation20_spill] sm:$0xff] }
 0x44f   : > { %9634 = vmatmul.mubr.msk.f32.gmra.mrb[14].mxu1 %vm292_vm1, %v12637_v2  ;;  %v12645_v2 = vld [vmem:[#allocation21_spill] sm:$0xff] }
 0x450   : > { %9636 = vmatprep.mubr.msk.f32.mxu1 %vm292_vm1, %v12638_v6  ;;  %v12646_v6 = vld [vmem:[#allocation22_spill] sm:$0xff] }
 0x453   : > { %9637 = vmatmul.mubr.msk.f32.gmra.mrb[16].mxu1 %vm292_vm1, %v12639_v19 }
 0x454   : > { %9639 = vmatprep.mubr.msk.f32.mxu1 %vm292_vm1, %v12640_v42  ;;  %v12647_v42 = vld [vmem:[#allocation23_spill] sm:$0xff] }
 0x457   : > { %9640 = vmatmul.mubr.msk.f32.gmra.mrb[18].mxu1 %vm292_vm1, %v12641_v28 }
 0x458   : > { %9642 = vmatprep.mubr.msk.f32.mxu1 %vm292_vm1, %v12642_v32 }
 0x45b   : > { %9643 = vmatmul.mubr.msk.f32.gmra.mrb[20].mxu1 %vm292_vm1, %v12643_v53 }
 0x45c   : > { %9645 = vmatprep.mubr.msk.f32.mxu1 %vm292_vm1, %v12644_v57  ;;  %v12044_v57 = vld [vmem:[#allocation2 + $0x182] sm:$0xff] }
 0x45f   : > { %9646 = vmatmul.mubr.msk.f32.gmra.mrb[22].mxu1 %vm292_vm1, %v12645_v2 }
 0x460   : > { %9648 = vmatprep.mubr.msk.f32.mxu1 %vm292_vm1, %v12646_v6  ;;  %v12048_v6 = vld [vmem:[#allocation2 + $0x18a] sm:$0xff] }
 0x463   : > { %9649 = vmatmul.mubr.msk.f32.gmra.mrb[24].mxu1 %vm292_vm1, %v11812_v34 }
 0x464   : > { %9651 = vmatprep.mubr.msk.f32.mxu1 %vm292_vm1, %v12647_v42 }
 0x467   : > { %9652 = vmatmul.mubr.msk.f32.gmra.mrb[26].mxu1 %vm292_vm1, %v11820_v5 }
 0x468   : > { %9654 = vmatprep.mubr.msk.f32.mxu1 %vm292_vm1, %v11824_v38  ;;  %v8246_v38 = vld [vmem:[%s12379_s3 + $0x20] sm:$0xf] }
 0x46b   : > { %9655 = vmatmul.mubr.msk.f32.gmra.mrb[28].mxu1 %vm292_vm1, %v11828_v33 }
 0x46c   : > { %9657 = vmatprep.mubr.msk.f32.mxu1 %vm292_vm1, %v12044_v57 }
 0x46f   : > { %9658 = vmatmul.mubr.msk.f32.gmra.mrb[30].mxu1 %vm292_vm1, %v12048_v6 }
 0x470   : > { %9662 = vmatprep.mubr.msk.f32.mxu1 %vm292_vm1, %v11589_v41  ;;  %v6139_v41 = vld [vmem:[#allocation2 + $0x198] sm:$0xff] }
 0x473   : > { %9663 = vmatmul.mubr.msk.f32.vlgmr.msra.gmra.mrb[0].mxu1 %vm292_vm1, %v11593_v8  ;;  %v6140_v8 = vld [vmem:[#allocation2 + $0x1a0] sm:$0xff] }
 0x474   : > { %9711 = vmatpush3.msk.msra.mxu1 %vm389_vm0, %v8212_v21  ;;  %9665 = vmatprep.mubr.msk.f32.mxu1 %vm292_vm1, %v11597_v54  ;;  %v6499_v54 = vld [vmem:[#allocation2 + $0x31] sm:$0xff] }
 0x475   : > { %9760 = vmatprep.subr.msk.mxu1 %vm389_vm0, %v8246_v38 }
 0x477   : > { %9666 = vmatmul.mubr.msk.f32.gmra.mrb[2].mxu1 %vm292_vm1, %v11601_v10  ;;  %v6500_v10 = vld [vmem:[#allocation2 + $0x39] sm:$0xff] }
 0x478   : > { %9668 = vmatprep.mubr.msk.f32.mxu1 %vm292_vm1, %v11605_v12  ;;  %v6501_v12 = vld [vmem:[#allocation2 + $0x49] sm:$0xff] }
 0x47b   : > { %9669 = vmatmul.mubr.msk.f32.gmra.mrb[4].mxu1 %vm292_vm1, %v11609_v14  ;;  %v6502_v14 = vld [vmem:[#allocation2 + $0x51] sm:$0xff] }
 0x47c   : > { %9671 = vmatprep.mubr.msk.f32.mxu1 %vm292_vm1, %v11613_v15  ;;  %v6503_v15 = vld [vmem:[#allocation2 + $0x61] sm:$0xff] }
 0x47f   : > { %9672 = vmatmul.mubr.msk.f32.gmra.mrb[6].mxu1 %vm292_vm1, %v11617_v16  ;;  %v6504_v16 = vld [vmem:[#allocation2 + $0x69] sm:$0xff] }
 0x480   : > { %9674 = vmatprep.mubr.msk.f32.mxu1 %vm292_vm1, %v11621_v18  ;;  %v6505_v18 = vld [vmem:[#allocation2 + $0x79] sm:$0xff] }
 0x483   : > { %9675 = vmatmul.mubr.msk.f32.gmra.mrb[8].mxu1 %vm292_vm1, %v11625_v22  ;;  %v6506_v22 = vld [vmem:[#allocation2 + $0x81] sm:$0xff] }
 0x484   : > { %9677 = vmatprep.mubr.msk.f32.mxu1 %vm292_vm1, %v11629_v23  ;;  %v6507_v23 = vld [vmem:[#allocation2 + $0x91] sm:$0xff] }
 0x487   : > { %9678 = vmatmul.mubr.msk.f32.gmra.mrb[10].mxu1 %vm292_vm1, %v11633_v24  ;;  %v6508_v24 = vld [vmem:[#allocation2 + $0x99] sm:$0xff] }
 0x488   : > { %9680 = vmatprep.mubr.msk.f32.mxu1 %vm292_vm1, %v11637_v25  ;;  %v12662_v25 = vld [vmem:[#allocation15_spill] sm:$0xff] }
 0x48b   : > { %9681 = vmatmul.mubr.msk.f32.gmra.mrb[12].mxu1 %vm292_vm1, %v11641_v26  ;;  %v12663_v26 = vld [vmem:[#allocation20_spill] sm:$0xff] }
 0x48c   : > { %9683 = vmatprep.mubr.msk.f32.mxu1 %vm292_vm1, %v11645_v45  ;;  %v12664_v45 = vld [vmem:[#allocation22_spill] sm:$0xff] }
 0x48f   : > { %9684 = vmatmul.mubr.msk.f32.gmra.mrb[14].mxu1 %vm292_vm1, %v11649_v47  ;;  %v12665_v47 = vld [vmem:[#allocation24_spill] sm:$0xff] }
 0x490   : > { %9686 = vmatprep.mubr.msk.f32.mxu1 %vm292_vm1, %v11653_v48  ;;  %v6919_v48 = vld [vmem:[#allocation2 + $0x19a] sm:$0xff] }
 0x493   : > { %9687 = vmatmul.mubr.msk.f32.gmra.mrb[16].mxu1 %vm292_vm1, %v11657_v49 }
 0x494   : > { %9689 = vmatprep.mubr.msk.f32.mxu1 %vm292_vm1, %v11661_v29  ;;  %v8282_v29 = vld [vmem:[%s10394_s27 + $0x21] sm:$0xff] }
 0x497   : > { %9690 = vmatmul.mubr.msk.f32.gmra.mrb[18].mxu1 %vm292_vm1, %v11665_v50 }
 0x498   : > { %9692 = vmatprep.mubr.msk.f32.mxu1 %vm292_vm1, %v11669_v27 }
 0x49b   : > { %9693 = vmatmul.mubr.msk.f32.gmra.mrb[20].mxu1 %vm292_vm1, %v11673_v52  ;;  %v8281_v52 = vld [vmem:[%s10394_s27 + $0x19] sm:$0xff] }
 0x49c   : > { %9695 = vmatprep.mubr.msk.f32.mxu1 %vm292_vm1, %v11677_v56 }
 0x49f   : > { %9696 = vmatmul.mubr.msk.f32.gmra.mrb[22].mxu1 %vm292_vm1, %v11681_v58 }
 0x4a0   : > { %9698 = vmatprep.mubr.msk.f32.mxu1 %vm292_vm1, %v11685_v59 }
 0x4a3   : > { %9699 = vmatmul.mubr.msk.f32.gmra.mrb[24].mxu1 %vm292_vm1, %v11689_v60 }
 0x4a4   : > { %9701 = vmatprep.mubr.msk.f32.mxu1 %vm292_vm1, %v11693_v62  ;;  %v8284_v62 = vld [vmem:[%s10394_s27 + $0x39] sm:$0xff] }
 0x4a7   : > { %9702 = vmatmul.mubr.msk.f32.gmra.mrb[26].mxu1 %vm292_vm1, %v11697_v3 }
 0x4a8   : > { %9704 = vmatprep.mubr.msk.f32.mxu1 %vm292_vm1, %v11898_v31 }
 0x4ab   : > { %9705 = vmatmul.mubr.msk.f32.gmra.mrb[28].mxu1 %vm292_vm1, %v11902_v39 }
 0x4ac   : > { %9707 = vmatprep.mubr.msk.f32.mxu1 %vm292_vm1, %v6139_v41 }
 0x4af   : > { %9708 = vmatmul.mubr.msk.f32.gmra.mrb[30].mxu1 %vm292_vm1, %v6140_v8 }
 0x4b0   : > { %9712 = vmatprep.mubr.msk.f32.mxu1 %vm292_vm1, %v6499_v54 }
 0x4b3   : > { %9713 = vmatmul.mubr.msk.f32.vlgmr.msra.gmra.mrb[0].mxu1 %vm292_vm1, %v6500_v10 }
 0x4b4   : > { %9761 = vmatpush3.msk.msra.mxu1 %vm389_vm0, %v8246_v38  ;;  %9715 = vmatprep.mubr.msk.f32.mxu1 %vm292_vm1, %v6501_v12  ;;  %v8290_v12 = vld [vmem:[%s10394_s27 + $0x81] sm:$0xff] }
 0x4b7   : > { %9716 = vmatmul.mubr.msk.f32.gmra.mrb[2].mxu1 %vm292_vm1, %v6502_v14 }
 0x4b8   : > { %9718 = vmatprep.mubr.msk.f32.mxu1 %vm292_vm1, %v6503_v15 }
 0x4bb   : > { %9719 = vmatmul.mubr.msk.f32.gmra.mrb[4].mxu1 %vm292_vm1, %v6504_v16  ;;  %v8289_v16 = vld [vmem:[%s10394_s27 + $0x79] sm:$0xff] }
 0x4bc   : > { %9721 = vmatprep.mubr.msk.f32.mxu1 %vm292_vm1, %v6505_v18 }
 0x4bf   : > { %9722 = vmatmul.mubr.msk.f32.gmra.mrb[6].mxu1 %vm292_vm1, %v6506_v22 }
 0x4c0   : > { %9724 = vmatprep.mubr.msk.f32.mxu1 %vm292_vm1, %v6507_v23 }
 0x4c3   : > { %9725 = vmatmul.mubr.msk.f32.gmra.mrb[8].mxu1 %vm292_vm1, %v6508_v24 }
 0x4c4   : > { %9727 = vmatprep.mubr.msk.f32.mxu1 %vm292_vm1, %v11470_v63  ;;  %v6529_v63 = vld [vmem:[#allocation2 + $0x199] sm:$0xff] }
 0x4c7   : > { %9728 = vmatmul.mubr.msk.f32.gmra.mrb[10].mxu1 %vm292_vm1, %v11476_v1  ;;  %v6530_v1 = vld [vmem:[#allocation2 + $0x1a1] sm:$0xff] }
 0x4c8   : > { %9730 = vmatprep.mubr.msk.f32.mxu1 %vm292_vm1, %v11482_v35  ;;  %v12648_v35 = vld [vmem:[#allocation31_spill] sm:$0xff] }
 0x4cb   : > { %9731 = vmatmul.mubr.msk.f32.gmra.mrb[12].mxu1 %vm292_vm1, %v11488_v37  ;;  %v12649_v37 = vld [vmem:[#allocation33_spill] sm:$0xff] }
 0x4cc   : > { %9733 = vmatprep.mubr.msk.f32.mxu1 %vm292_vm1, %v11494_v7  ;;  %v12650_v7 = vld [vmem:[#allocation35_spill] sm:$0xff] }
 0x4cf   : > { %9734 = vmatmul.mubr.msk.f32.gmra.mrb[14].mxu1 %vm292_vm1, %v11500_v9  ;;  %v12651_v9 = vld [vmem:[#allocation3_spill] sm:$0xff] }
 0x4d0   : > { %9736 = vmatprep.mubr.msk.f32.mxu1 %vm292_vm1, %v11506_v17  ;;  %v12652_v17 = vld [vmem:[#allocation4_spill] sm:$0xff] }
 0x4d3   : > { %9737 = vmatmul.mubr.msk.f32.gmra.mrb[16].mxu1 %vm292_vm1, %v11512_v20  ;;  %v12653_v20 = vld [vmem:[#allocation5_spill] sm:$0xff] }
 0x4d4   : > { %9739 = vmatprep.mubr.msk.f32.mxu1 %vm292_vm1, %v11518_v43  ;;  %v12654_v43 = vld [vmem:[#allocation6_spill] sm:$0xff] }
 0x4d7   : > { %9740 = vmatmul.mubr.msk.f32.gmra.mrb[18].mxu1 %vm292_vm1, %v11524_v46  ;;  %v12655_v46 = vld [vmem:[#allocation7_spill] sm:$0xff] }
 0x4d8   : > { %9742 = vmatprep.mubr.msk.f32.mxu1 %vm292_vm1, %v11530_v51  ;;  %v12656_v51 = vld [vmem:[#allocation8_spill] sm:$0xff] }
 0x4db   : > { %9743 = vmatmul.mubr.msk.f32.gmra.mrb[20].mxu1 %vm292_vm1, %v11536_v30  ;;  %v12657_v30 = vld [vmem:[#allocation9_spill] sm:$0xff] }
 0x4dc   : > { %9745 = vmatprep.mubr.msk.f32.mxu1 %vm292_vm1, %v11542_v61  ;;  %v12658_v61 = vld [vmem:[#allocation10_spill] sm:$0xff] }
 0x4df   : > { %9746 = vmatmul.mubr.msk.f32.gmra.mrb[22].mxu1 %vm292_vm1, %v11548_v0  ;;  %v12659_v0 = vld [vmem:[#allocation37_spill] sm:$0xff] }
 0x4e0   : > { %9748 = vmatprep.mubr.msk.f32.mxu1 %vm292_vm1, %v11553_v36  ;;  %v12660_v36 = vld [vmem:[#allocation38_spill] sm:$0xff] }
 0x4e3   : > { %9749 = vmatmul.mubr.msk.f32.gmra.mrb[24].mxu1 %vm292_vm1, %v11558_v55  ;;  %v12661_v55 = vld [vmem:[#allocation13_spill] sm:$0xff] }
 0x4e4   : > { %9751 = vmatprep.mubr.msk.f32.mxu1 %vm292_vm1, %v12620_v4 }
 0x4e7   : > { %9752 = vmatmul.mubr.msk.f32.gmra.mrb[26].mxu1 %vm292_vm1, %v12621_v40 }
 0x4e8   : > { %9754 = vmatprep.mubr.msk.f32.mxu1 %vm292_vm1, %v11971_v11  ;;  %v8286_v11 = vld [vmem:[%s10394_s27 + $0x51] sm:$0xff] }
 0x4eb   : > { %9755 = vmatmul.mubr.msk.f32.gmra.mrb[28].mxu1 %vm292_vm1, %v11975_v13 }
 0x4ec   : > { %9757 = vmatprep.mubr.msk.f32.mxu1 %vm292_vm1, %v6529_v63  ;;  %v8292_v63 = vld [vmem:[%s10394_s27 + $0x99] sm:$0xff] }
 0x4ef   : > { %9758 = vmatmul.mubr.msk.f32.gmra.mrb[30].mxu1 %vm292_vm1, %v6530_v1 }
 0x4f0   : > { %9762 = vmatprep.mubr.msk.f32.mxu1 %vm292_vm1, %v12624_v44  ;;  %v8285_v44 = vld [vmem:[%s10394_s27 + $0x49] sm:$0xff] }
 0x4f3   : > { %9763 = vmatmul.mubr.msk.f32.vlgmr.msra.gmra.mrb[0].mxu1 %vm292_vm1, %v12648_v35 }
 0x4f4   : > { %9765 = vmatprep.mubr.msk.f32.mxu1 %vm292_vm1, %v12649_v37  ;;  %v8291_v37 = vld [vmem:[%s10394_s27 + $0x91] sm:$0xff] }
 0x4f7   : > { %9766 = vmatmul.mubr.msk.f32.gmra.mrb[2].mxu1 %vm292_vm1, %v12650_v7 }
 0x4f8   : > { %9768 = vmatprep.mubr.msk.f32.mxu1 %vm292_vm1, %v12651_v9 }
 0x4fb   : > { %9769 = vmatmul.mubr.msk.f32.gmra.mrb[4].mxu1 %vm292_vm1, %v12652_v17 }
 0x4fc   : > { %9771 = vmatprep.mubr.msk.f32.mxu1 %vm292_vm1, %v12653_v20 }
 0x4ff   : > { %9772 = vmatmul.mubr.msk.f32.gmra.mrb[6].mxu1 %vm292_vm1, %v12654_v43  ;;  %v8294_v43 = vld [vmem:[%s10394_s27 + $0xb1] sm:$0xff] }
 0x500   : > { %9774 = vmatprep.mubr.msk.f32.mxu1 %vm292_vm1, %v12655_v46 }
 0x503   : > { %9775 = vmatmul.mubr.msk.f32.gmra.mrb[8].mxu1 %vm292_vm1, %v12656_v51 }
 0x504   : > { %9777 = vmatprep.mubr.msk.f32.mxu1 %vm292_vm1, %v12657_v30  ;;  %v8293_v30 = vld [vmem:[%s10394_s27 + $0xa9] sm:$0xff] }
 0x507   : > { %9778 = vmatmul.mubr.msk.f32.gmra.mrb[10].mxu1 %vm292_vm1, %v12658_v61 }
 0x508   : > { %9780 = vmatprep.mubr.msk.f32.mxu1 %vm292_vm1, %v12659_v0 }
 0x50b   : > { %9781 = vmatmul.mubr.msk.f32.gmra.mrb[12].mxu1 %vm292_vm1, %v12660_v36 }
 0x50c   : > { %9783 = vmatprep.mubr.msk.f32.mxu1 %vm292_vm1, %v12661_v55 }
 0x50f   : > { %9784 = vmatmul.mubr.msk.f32.gmra.mrb[14].mxu1 %vm292_vm1, %v12639_v19 }
 0x510   : > { %9786 = vmatprep.mubr.msk.f32.mxu1 %vm292_vm1, %v12662_v25  ;;  %v8296_v25 = vld [vmem:[%s10394_s27 + $0xc9] sm:$0xff] }
 0x513   : > { %9787 = vmatmul.mubr.msk.f32.gmra.mrb[16].mxu1 %vm292_vm1, %v12641_v28 }
 0x514   : > { %9789 = vmatprep.mubr.msk.f32.mxu1 %vm292_vm1, %v12642_v32 }
 0x517   : > { %9790 = vmatmul.mubr.msk.f32.gmra.mrb[18].mxu1 %vm292_vm1, %v12643_v53 }
 0x518   : > { %9792 = vmatprep.mubr.msk.f32.mxu1 %vm292_vm1, %v12663_v26 }
 0x51b   : > { %9793 = vmatmul.mubr.msk.f32.gmra.mrb[20].mxu1 %vm292_vm1, %v12645_v2  ;;  %v8288_v2 = vld [vmem:[%s10394_s27 + $0x69] sm:$0xff] }
 0x51c   : > { %9795 = vmatprep.mubr.msk.f32.mxu1 %vm292_vm1, %v12664_v45 }
 0x51f   : > { %9796 = vmatmul.mubr.msk.f32.gmra.mrb[22].mxu1 %vm292_vm1, %v11812_v34  ;;  %v6920_v34 = vld [vmem:[#allocation2 + $0x1a2] sm:$0xff] }
 0x520   : > { %9798 = vmatprep.mubr.msk.f32.mxu1 %vm292_vm1, %v12647_v42  ;;  %v8287_v42 = vld [vmem:[%s10394_s27 + $0x61] sm:$0xff] }
 0x523   : > { %9799 = vmatmul.mubr.msk.f32.gmra.mrb[24].mxu1 %vm292_vm1, %v11820_v5  ;;  %v12237_v5 = vld [vmem:[%s12380_s4] ss:$0 sm:$0xff] }
 0x524   : > { %9801 = vmatprep.mubr.msk.f32.mxu1 %vm292_vm1, %v12665_v47  ;;  %v8295_v47 = vld [vmem:[%s10394_s27 + $0xc1] sm:$0xff] }
 0x527   : > { %9802 = vmatmul.mubr.msk.f32.gmra.mrb[26].mxu1 %vm292_vm1, %v11828_v33  ;;  %v8283_v33 = vld [vmem:[%s10394_s27 + $0x31] sm:$0xff] }
 0x528   : > { %9804 = vmatprep.mubr.msk.f32.mxu1 %vm292_vm1, %v12044_v57 }
 0x52b   : > { %9805 = vmatmul.mubr.msk.f32.gmra.mrb[28].mxu1 %vm292_vm1, %v12048_v6 }
 0x52c   : > { %9807 = vmatprep.mubr.msk.f32.mxu1 %vm292_vm1, %v6919_v48 }
 0x52f   : > { %9808 = vmatmul.mubr.msk.f32.gmra.mrb[30].mxu1 %vm292_vm1, %v6920_v34 }
 0x5c6   : > { %v9764_v49 = vpop.f32.mrb[0].mxu1 }
 0x5c7   : > { %v7287_v50 = vadd.f32 %v9764_v49, %v12237_v5  ;;  %v7088_v27 = vpop.f32.mrb[1].mxu1 }
 0x5c8   : > { %v7286_v56 = vadd.f32 %v12237_v5, %v7088_v27 }
 0x5c9   : > { %v7351_v58 = vadd.f32 %v8282_v29, %v7287_v50  ;;  %v8298_v50 = vld [vmem:[%s10394_s27 + $0xe1] sm:$0xff] }
 0x5ca   : > { %v7350_v59 = vadd.f32 %v8281_v52, %v7286_v56  ;;  %v9767_v60 = vpop.f32.mrb[2].mxu1  ;;  %v8297_v56 = vld [vmem:[%s10394_s27 + $0xd9] sm:$0xff] }
 0x5cb   : > { %7383 = vst.msk [vmem:[%s12246_s22 + $0x8] sm:$0xff] %vm292_vm1, %v7351_v58  ;;  %v7289_v3 = vadd.f32 %v9767_v60, %v12237_v5  ;;  %v7098_v38 = vpop.f32.mrb[3].mxu1 }
 0x5cc   : > { %7382 = vst.msk [vmem:[%s12246_s22] sm:$0xff] %vm292_vm1, %v7350_v59  ;;  %v7288_v31 = vadd.f32 %v12237_v5, %v7098_v38 }
 0x5cd   : > { %v7353_v39 = vadd.f32 %v8284_v62, %v7289_v3  ;;  %v8300_v3 = vld [vmem:[%s10394_s27 + $0xf9] sm:$0xff] }
 0x5ce   : > { %v7352_v4 = vadd.f32 %v8283_v33, %v7288_v31  ;;  %v9770_v40 = vpop.f32.mrb[4].mxu1  ;;  %v8299_v31 = vld [vmem:[%s10394_s27 + $0xf1] sm:$0xff] }
 0x5cf   : > { %7385 = vst.msk [vmem:[%s12246_s22 + $0x18] sm:$0xff] %vm292_vm1, %v7353_v39  ;;  %v7291_v13 = vadd.f32 %v9770_v40, %v12237_v5  ;;  %v7108_v21 = vpop.f32.mrb[5].mxu1 }
 0x5d0   : > { %7384 = vst.msk [vmem:[%s12246_s22 + $0x10] sm:$0xff] %vm292_vm1, %v7352_v4  ;;  %v7290_v28 = vadd.f32 %v12237_v5, %v7108_v21 }
 0x5d1   : > { %v7355_v32 = vadd.f32 %v8286_v11, %v7291_v13  ;;  %v8302_v13 = vld [vmem:[%s10394_s27 + $0x111] sm:$0xff] }
 0x5d2   : > { %v7354_v53 = vadd.f32 %v8285_v44, %v7290_v28  ;;  %v9773_v57 = vpop.f32.mrb[6].mxu1  ;;  %v8301_v28 = vld [vmem:[%s10394_s27 + $0x109] sm:$0xff] }
 0x5d3   : > { %7387 = vst.msk [vmem:[%s12246_s22 + $0x28] sm:$0xff] %vm292_vm1, %v7355_v32  ;;  %v7293_v6 = vadd.f32 %v9773_v57, %v12237_v5  ;;  %v7118_v19 = vpop.f32.mrb[7].mxu1 }
 0x5d4   : > { %7386 = vst.msk [vmem:[%s12246_s22 + $0x20] sm:$0xff] %vm292_vm1, %v7354_v53  ;;  %v7292_v41 = vadd.f32 %v12237_v5, %v7118_v19 }
 0x5d5   : > { %v7357_v8 = vadd.f32 %v8288_v2, %v7293_v6  ;;  %v8304_v6 = vld [vmem:[%s10394_s27 + $0x129] sm:$0xff] }
 0x5d6   : > { %v7356_v54 = vadd.f32 %v8287_v42, %v7292_v41  ;;  %v9776_v10 = vpop.f32.mrb[8].mxu1  ;;  %v8303_v41 = vld [vmem:[%s10394_s27 + $0x121] sm:$0xff] }
 0x5d7   : > { %7389 = vst.msk [vmem:[%s12246_s22 + $0x38] sm:$0xff] %vm292_vm1, %v7357_v8  ;;  %v7295_v14 = vadd.f32 %v9776_v10, %v12237_v5  ;;  %v7128_v15 = vpop.f32.mrb[9].mxu1 }
 0x5d8   : > { %7388 = vst.msk [vmem:[%s12246_s22 + $0x30] sm:$0xff] %vm292_vm1, %v7356_v54  ;;  %v7294_v18 = vadd.f32 %v12237_v5, %v7128_v15 }
 0x5d9   : > { %v7359_v22 = vadd.f32 %v8290_v12, %v7295_v14  ;;  %v8306_v14 = vld [vmem:[%s10394_s27 + $0x141] sm:$0xff] }
 0x5da   : > { %v7358_v23 = vadd.f32 %v8289_v16, %v7294_v18  ;;  %v9779_v24 = vpop.f32.mrb[10].mxu1  ;;  %v8305_v18 = vld [vmem:[%s10394_s27 + $0x139] sm:$0xff] }
 0x5db   : > { %7391 = vst.msk [vmem:[%s12246_s22 + $0x48] sm:$0xff] %vm292_vm1, %v7359_v22  ;;  %v7297_v1 = vadd.f32 %v9779_v24, %v12237_v5  ;;  %v7138_v35 = vpop.f32.mrb[11].mxu1 }
 0x5dc   : > { %7390 = vst.msk [vmem:[%s12246_s22 + $0x40] sm:$0xff] %vm292_vm1, %v7358_v23  ;;  %v7296_v7 = vadd.f32 %v12237_v5, %v7138_v35 }
 0x5dd   : > { %v7361_v9 = vadd.f32 %v8292_v63, %v7297_v1  ;;  %v8308_v1 = vld [vmem:[%s10394_s27 + $0x159] sm:$0xff] }
 0x5de   : > { %v7360_v17 = vadd.f32 %v8291_v37, %v7296_v7  ;;  %v9782_v20 = vpop.f32.mrb[12].mxu1  ;;  %v8307_v7 = vld [vmem:[%s10394_s27 + $0x151] sm:$0xff] }
 0x5df   : > { %7393 = vst.msk [vmem:[%s12246_s22 + $0x58] sm:$0xff] %vm292_vm1, %v7361_v9  ;;  %v7299_v46 = vadd.f32 %v9782_v20, %v12237_v5  ;;  %v7148_v51 = vpop.f32.mrb[13].mxu1 }
 0x5e0   : > { %7392 = vst.msk [vmem:[%s12246_s22 + $0x50] sm:$0xff] %vm292_vm1, %v7360_v17  ;;  %v7298_v61 = vadd.f32 %v12237_v5, %v7148_v51 }
 0x5e1   : > { %v7363_v0 = vadd.f32 %v8294_v43, %v7299_v46  ;;  %v8310_v46 = vld [vmem:[%s10394_s27 + $0x171] sm:$0xff] }
 0x5e2   : > { %v7362_v36 = vadd.f32 %v8293_v30, %v7298_v61  ;;  %v9785_v55 = vpop.f32.mrb[14].mxu1  ;;  %v8309_v61 = vld [vmem:[%s10394_s27 + $0x169] sm:$0xff] }
 0x5e3   : > { %7395 = vst.msk [vmem:[%s12246_s22 + $0x68] sm:$0xff] %vm292_vm1, %v7363_v0  ;;  %v7301_v26 = vadd.f32 %v9785_v55, %v12237_v5  ;;  %v7158_v45 = vpop.f32.mrb[15].mxu1 }
 0x5e4   : > { %7394 = vst.msk [vmem:[%s12246_s22 + $0x60] sm:$0xff] %vm292_vm1, %v7362_v36  ;;  %v7300_v48 = vadd.f32 %v12237_v5, %v7158_v45 }
 0x5e5   : > { %v7365_v34 = vadd.f32 %v8296_v25, %v7301_v26  ;;  %v8312_v26 = vld [vmem:[%s10394_s27 + $0x189] sm:$0xff] }
 0x5e6   : > { %v7364_v49 = vadd.f32 %v8295_v47, %v7300_v48  ;;  %v9788_v29 = vpop.f32.mrb[16].mxu1  ;;  %v8311_v48 = vld [vmem:[%s10394_s27 + $0x181] sm:$0xff] }
 0x5e7   : > { %7397 = vst.msk [vmem:[%s12246_s22 + $0x78] sm:$0xff] %vm292_vm1, %v7365_v34  ;;  %v7303_v27 = vadd.f32 %v9788_v29, %v12237_v5  ;;  %v7168_v52 = vpop.f32.mrb[17].mxu1 }
 0x5e8   : > { %7396 = vst.msk [vmem:[%s12246_s22 + $0x70] sm:$0xff] %vm292_vm1, %v7364_v49  ;;  %v7302_v58 = vadd.f32 %v12237_v5, %v7168_v52 }
 0x5e9   : > { %v7367_v59 = vadd.f32 %v8298_v50, %v7303_v27 }
 0x5ea   : > { %v7366_v60 = vadd.f32 %v8297_v56, %v7302_v58  ;;  %v9791_v62 = vpop.f32.mrb[18].mxu1 }
 0x5eb   : > { %7399 = vst.msk [vmem:[%s12246_s22 + $0x88] sm:$0xff] %vm292_vm1, %v7367_v59  ;;  %v7305_v38 = vadd.f32 %v9791_v62, %v12237_v5  ;;  %v7178_v33 = vpop.f32.mrb[19].mxu1 }
 0x5ec   : > { %7398 = vst.msk [vmem:[%s12246_s22 + $0x80] sm:$0xff] %vm292_vm1, %v7366_v60  ;;  %v7304_v39 = vadd.f32 %v12237_v5, %v7178_v33 }
 0x5ed   : > { %v7369_v4 = vadd.f32 %v8300_v3, %v7305_v38 }
 0x5ee   : > { %v7368_v40 = vadd.f32 %v8299_v31, %v7304_v39  ;;  %v9794_v11 = vpop.f32.mrb[20].mxu1 }
 0x5ef   : > { %7401 = vst.msk [vmem:[%s12246_s22 + $0x98] sm:$0xff] %vm292_vm1, %v7369_v4  ;;  %v7307_v21 = vadd.f32 %v9794_v11, %v12237_v5  ;;  %v7188_v44 = vpop.f32.mrb[21].mxu1 }
 0x5f0   : > { %7400 = vst.msk [vmem:[%s12246_s22 + $0x90] sm:$0xff] %vm292_vm1, %v7368_v40  ;;  %v7306_v32 = vadd.f32 %v12237_v5, %v7188_v44 }
 0x5f1   : > { %v7371_v53 = vadd.f32 %v8302_v13, %v7307_v21 }
 0x5f2   : > { %v7370_v57 = vadd.f32 %v8301_v28, %v7306_v32  ;;  %v9797_v2 = vpop.f32.mrb[22].mxu1 }
 0x5f3   : > { %7403 = vst.msk [vmem:[%s12246_s22 + $0xa8] sm:$0xff] %vm292_vm1, %v7371_v53  ;;  %v7309_v19 = vadd.f32 %v9797_v2, %v12237_v5  ;;  %v7198_v42 = vpop.f32.mrb[23].mxu1 }
 0x5f4   : > { %7402 = vst.msk [vmem:[%s12246_s22 + $0xa0] sm:$0xff] %vm292_vm1, %v7370_v57  ;;  %v7308_v8 = vadd.f32 %v12237_v5, %v7198_v42 }
 0x5f5   : > { %v7373_v54 = vadd.f32 %v8304_v6, %v7309_v19 }
 0x5f6   : > { %v7372_v10 = vadd.f32 %v8303_v41, %v7308_v8  ;;  %v9800_v12 = vpop.f32.mrb[24].mxu1 }
 0x5f7   : > { %7405 = vst.msk [vmem:[%s12246_s22 + $0xb8] sm:$0xff] %vm292_vm1, %v7373_v54  ;;  %v7311_v15 = vadd.f32 %v9800_v12, %v12237_v5  ;;  %v7208_v16 = vpop.f32.mrb[25].mxu1 }
 0x5f8   : > { %7404 = vst.msk [vmem:[%s12246_s22 + $0xb0] sm:$0xff] %vm292_vm1, %v7372_v10  ;;  %v7310_v22 = vadd.f32 %v12237_v5, %v7208_v16 }
 0x5f9   : > { %v7375_v23 = vadd.f32 %v8306_v14, %v7311_v15 }
 0x5fa   : > { %v7374_v24 = vadd.f32 %v8305_v18, %v7310_v22  ;;  %v9803_v63 = vpop.f32.mrb[26].mxu1 }
 0x5fb   : > { %7407 = vst.msk [vmem:[%s12246_s22 + $0xc8] sm:$0xff] %vm292_vm1, %v7375_v23  ;;  %v7313_v35 = vadd.f32 %v9803_v63, %v12237_v5  ;;  %v7218_v37 = vpop.f32.mrb[27].mxu1 }
 0x5fc   : > { %7406 = vst.msk [vmem:[%s12246_s22 + $0xc0] sm:$0xff] %vm292_vm1, %v7374_v24  ;;  %v7312_v9 = vadd.f32 %v12237_v5, %v7218_v37 }
 0x5fd   : > { %v7377_v17 = vadd.f32 %v8308_v1, %v7313_v35 }
 0x5fe   : > { %v7376_v20 = vadd.f32 %v8307_v7, %v7312_v9  ;;  %v9806_v43 = vpop.f32.mrb[28].mxu1 }
 0x5ff   : > { %7409 = vst.msk [vmem:[%s12246_s22 + $0xd8] sm:$0xff] %vm292_vm1, %v7377_v17  ;;  %v7315_v51 = vadd.f32 %v9806_v43, %v12237_v5  ;;  %v7228_v30 = vpop.f32.mrb[29].mxu1 }
 0x600   : > { %7408 = vst.msk [vmem:[%s12246_s22 + $0xd0] sm:$0xff] %vm292_vm1, %v7376_v20  ;;  %v7314_v0 = vadd.f32 %v12237_v5, %v7228_v30 }
 0x601   : > { %v7379_v36 = vadd.f32 %v8310_v46, %v7315_v51 }
 0x602   : > { %v7378_v55 = vadd.f32 %v8309_v61, %v7314_v0  ;;  %v9809_v25 = vpop.f32.mrb[30].mxu1 }
 0x603   : > { %7411 = vst.msk [vmem:[%s12246_s22 + $0xe8] sm:$0xff] %vm292_vm1, %v7379_v36  ;;  %v7317_v45 = vadd.f32 %v9809_v25, %v12237_v5  ;;  %v7238_v47 = vpop.f32.mrb[31].mxu1 }
 0x604   : > { %7410 = vst.msk [vmem:[%s12246_s22 + $0xe0] sm:$0xff] %vm292_vm1, %v7378_v55  ;;  %v7316_v34 = vadd.f32 %v12237_v5, %v7238_v47 }
 0x605   : > { %v7381_v49 = vadd.f32 %v8312_v26, %v7317_v45 }
 0x606   : > { %v7380_v29 = vadd.f32 %v8311_v48, %v7316_v34 }
 0x607   : > { %7413 = vst.msk [vmem:[%s12246_s22 + $0xf8] sm:$0xff] %vm292_vm1, %v7381_v49 }
 0x608   : > { %7412 = vst.msk [vmem:[%s12246_s22 + $0xf0] sm:$0xff] %vm292_vm1, %v7380_v29 }
 0x609 PF: > { %s15_s18 = sadd.s32 1, %s10338_s18  }
 0x60a   : > { %p12_p4 = scmp.ge.s32.totalorder %s15_s18, 4  }
 0x60c   :  { %14 = sbr.rel (!%p12_p4) target bundleno = 1 (0x1), region = 90 }

</bundles_post_ra>
